<compile_context>
chip_gen: v7x
topology: tpu7x:2x2x1
jax: 0.10.0
libtpu: 0.0.40
codegen_flags: <defaults>
</compile_context>

<pallas_src>
import functools
import math

import jax
import jax.numpy as jnp
from jax.experimental import pallas as pl
from jax.experimental.pallas import tpu as pltpu

# ----------------------------- configuration --------------------------------
INPUT_DIM = 16
OUTPUT_DIM = 24
TIME_REDUCTION_STRIDE = 2
D = 32                      # conformer_input_dim
FFN_DIM = 64                # conformer_ffn_dim
NUM_LAYERS = 2
NUM_HEADS = 4
HEAD_DIM = D // NUM_HEADS
DW_KERNEL = 5               # depthwise_conv_kernel_size ((K-1) % 2 == 0)
EPS = 1e-5
NEG_INF = -1e30


# --------------------------- in-kernel helpers --------------------------------
def _layernorm(x, g, b):
    mean = jnp.mean(x, axis=-1, keepdims=True)
    var = jnp.mean((x - mean) ** 2, axis=-1, keepdims=True)
    return (x - mean) * jax.lax.rsqrt(var + EPS) * g + b


def _ffn(x, lp):
    # torchaudio _FeedForwardModule: LN -> Linear -> SiLU -> Linear (dropout = 0)
    xn = _layernorm(x, lp["ln_g"][...], lp["ln_b"][...])
    h = jnp.dot(xn, lp["w1"][...], preferred_element_type=jnp.float32) + lp["b1"][...]
    h = h * jax.nn.sigmoid(h)                                   # SiLU
    return jnp.dot(h, lp["w2"][...], preferred_element_type=jnp.float32) + lp["b2"][...]


# ------------------------------ fused kernel ----------------------------------
def _encoder_kernel(treedef, T, len_ref, x_ref, *refs):
    # refs = (*weight_refs_in_tree_flatten_order, out_ref)
    out_ref = refs[-1]
    p = jax.tree_util.tree_unflatten(treedef, list(refs[:-1]))

    b = pl.program_id(0)
    valid_len = len_ref[b]                                      # scalar int32 (SMEM)

    x = x_ref[...].astype(jnp.float32)                          # (T, Din*stride)

    # input_linear
    h = jnp.dot(x, p["in_w"][...], preferred_element_type=jnp.float32) + p["in_b"][...]

    # Additive key-padding mask (1, T): 0 for valid keys, -1e30 for padding.
    key_idx = jax.lax.broadcasted_iota(jnp.int32, (1, T), 1)
    attn_mask = jnp.where(key_idx < valid_len, 0.0, NEG_INF).astype(jnp.float32)

    # Shift matrices for the zero-padded depthwise conv: (S_k @ g)[t] = g[t + k - pad],
    # zero outside [0, T).  Built once per sample, reused by both layers; runs on MXU.
    ti = jax.lax.broadcasted_iota(jnp.int32, (T, T), 0)
    tj = jax.lax.broadcasted_iota(jnp.int32, (T, T), 1)
    pad = (DW_KERNEL - 1) // 2
    shift_mats = [(tj == ti + (k - pad)).astype(jnp.float32) for k in range(DW_KERNEL)]

    scale = 1.0 / math.sqrt(HEAD_DIM)
    inv_cnt = 1.0 / float(T * D)

    for lp in p["layers"]:                                      # static unroll (2 layers)
        # ---- FFN1 (half-step residual) ----
        h = h + 0.5 * _ffn(h, lp["ffn1"])

        # ---- convolution module (convolution_first=True) ----
        ln = _layernorm(h, lp["conv_ln_g"][...], lp["conv_ln_b"][...])
        pw1 = jnp.dot(ln, lp["conv_pw1_w"][...],
                      preferred_element_type=jnp.float32) + lp["conv_pw1_b"][...]
        glu = pw1[:, :D] * jax.nn.sigmoid(pw1[:, D:])           # GLU over channels
        dw_w = lp["conv_dw_w"][...]                             # (K, D)
        acc = jnp.zeros((T, D), jnp.float32)
        for k in range(DW_KERNEL):                              # static unrolled taps
            shifted = jnp.dot(shift_mats[k], glu, preferred_element_type=jnp.float32)
            acc = acc + shifted * dw_w[k:k + 1, :]
        acc = acc + lp["conv_dw_b"][...]
        # GroupNorm(num_groups=1): normalize over all (T, C) of this sample.
        s1 = jnp.sum(jnp.sum(acc, axis=1, keepdims=True), axis=0, keepdims=True)
        mean = s1 * inv_cnt
        d = acc - mean
        s2 = jnp.sum(jnp.sum(d * d, axis=1, keepdims=True), axis=0, keepdims=True)
        var = s2 * inv_cnt
        gn = d * jax.lax.rsqrt(var + EPS)
        gn = gn * lp["conv_gn_g"][...] + lp["conv_gn_b"][...]
        act = gn * jax.nn.sigmoid(gn)                           # SiLU
        conv_out = jnp.dot(act, lp["conv_pw2_w"][...],
                           preferred_element_type=jnp.float32) + lp["conv_pw2_b"][...]
        h = h + conv_out

        # ---- self-attention ----
        ln = _layernorm(h, lp["attn_ln_g"][...], lp["attn_ln_b"][...])
        qkv = jnp.dot(ln, lp["attn_qkv_w"][...],
                      preferred_element_type=jnp.float32) + lp["attn_qkv_b"][...]
        heads = []
        for hh in range(NUM_HEADS):                             # static unroll (4 heads)
            lo = hh * HEAD_DIM
            qh = qkv[:, lo:lo + HEAD_DIM]
            kh = qkv[:, D + lo:D + lo + HEAD_DIM]
            vh = qkv[:, 2 * D + lo:2 * D + lo + HEAD_DIM]
            logits = jax.lax.dot_general(
                qh, kh, (((1,), (1,)), ((), ())),
                preferred_element_type=jnp.float32) * scale + attn_mask
            logits = logits - jnp.max(logits, axis=-1, keepdims=True)
            pexp = jnp.exp(logits)
            pnorm = pexp * pl.reciprocal(jnp.sum(pexp, axis=-1, keepdims=True),
                                         approx=True)
            heads.append(jnp.dot(pnorm, vh, preferred_element_type=jnp.float32))
        attn = jnp.concatenate(heads, axis=1)                   # (T, D)
        attn = jnp.dot(attn, lp["attn_out_w"][...],
                       preferred_element_type=jnp.float32) + lp["attn_out_b"][...]
        h = h + attn

        # ---- FFN2 (half-step residual) + final LayerNorm ----
        h = h + 0.5 * _ffn(h, lp["ffn2"])
        h = _layernorm(h, lp["final_ln_g"][...], lp["final_ln_b"][...])

    # output_linear + LayerNorm
    y = jnp.dot(h, p["out_w"][...], preferred_element_type=jnp.float32) + p["out_b"][...]
    y = _layernorm(y, p["ln_g"][...], p["ln_b"][...])
    out_ref[...] = y.astype(out_ref.dtype)


# ------------------------------ model (wrapper) --------------------------------
def conformer_encoder(x, lengths, params):
    B, T, Din = x.shape
    s = TIME_REDUCTION_STRIDE

    # _TimeReduction: drop trailing frames, stack `s` consecutive frames.
    num_frames = T - (T % s)
    Tr = num_frames // s
    x_red = x[:, :num_frames, :].reshape(B * Tr, Din * s)
    out_lengths = (lengths // s).astype(jnp.int32)

    leaves, treedef = jax.tree_util.tree_flatten(params)
    kernel = functools.partial(_encoder_kernel, treedef, Tr)

    grid_spec = pltpu.PrefetchScalarGridSpec(
        num_scalar_prefetch=1,                                   # out_lengths -> SMEM
        grid=(B,),
        in_specs=(
            [pl.BlockSpec((Tr, Din * s), lambda b, lens: (b, 0))]        # activation
            + [pl.BlockSpec(w.shape, lambda b, lens: (0, 0)) for w in leaves]  # resident weights
        ),
        out_specs=pl.BlockSpec((Tr, OUTPUT_DIM), lambda b, lens: (b, 0)),
    )

    y = pl.pallas_call(
        kernel,
        out_shape=jax.ShapeDtypeStruct((B * Tr, OUTPUT_DIM), x.dtype),
        grid_spec=grid_spec,
        compiler_params=pltpu.CompilerParams(
            dimension_semantics=("parallel",)),                  # one sample per TC on v7x
    )(out_lengths, x_red, *leaves)

    return y.reshape(B, Tr, OUTPUT_DIM), out_lengths


# --------------------------- pure-JAX reference --------------------------------
def _ref_ln(x, g, b):
    mean = x.mean(-1, keepdims=True)
    var = ((x - mean) ** 2).mean(-1, keepdims=True)
    return (x - mean) / jnp.sqrt(var + EPS) * g + b


def reference_encoder(x, lengths, params):
    B, T, Din = x.shape
    s = TIME_REDUCTION_STRIDE
    num_frames = T - (T % s)
    Tr = num_frames // s
    xr = x[:, :num_frames, :].reshape(B, Tr, Din * s)
    out_len = (lengths // s).astype(jnp.int32)
    h = xr @ params["in_w"] + params["in_b"]
    mask = jnp.arange(Tr)[None, :] < out_len[:, None]            # (B, Tr) True = valid key
    pad = (DW_KERNEL - 1) // 2

    def ffn(x_, fp):
        xn = _ref_ln(x_, fp["ln_g"], fp["ln_b"])
        hh = xn @ fp["w1"] + fp["b1"]
        hh = hh * jax.nn.sigmoid(hh)
        return hh @ fp["w2"] + fp["b2"]

    for lp in params["layers"]:
        h = h + 0.5 * ffn(h, lp["ffn1"])

        ln = _ref_ln(h, lp["conv_ln_g"], lp["conv_ln_b"])
        pw1 = ln @ lp["conv_pw1_w"] + lp["conv_pw1_b"]
        glu = pw1[..., :D] * jax.nn.sigmoid(pw1[..., D:])
        glu_pad = jnp.pad(glu, ((0, 0), (pad, pad), (0, 0)))
        acc = lp["conv_dw_b"] + sum(
            glu_pad[:, k:k + Tr, :] * lp["conv_dw_w"][k] for k in range(DW_KERNEL))
        mean = acc.mean(axis=(1, 2), keepdims=True)
        var = ((acc - mean) ** 2).mean(axis=(1, 2), keepdims=True)
        gn = (acc - mean) / jnp.sqrt(var + EPS) * lp["conv_gn_g"] + lp["conv_gn_b"]
        act = gn * jax.nn.sigmoid(gn)
        h = h + act @ lp["conv_pw2_w"] + lp["conv_pw2_b"]

        ln = _ref_ln(h, lp["attn_ln_g"], lp["attn_ln_b"])
        qkv = ln @ lp["attn_qkv_w"] + lp["attn_qkv_b"]
        q = qkv[..., :D].reshape(B, Tr, NUM_HEADS, HEAD_DIM)
        k = qkv[..., D:2 * D].reshape(B, Tr, NUM_HEADS, HEAD_DIM)
        v = qkv[..., 2 * D:].reshape(B, Tr, NUM_HEADS, HEAD_DIM)
        logits = jnp.einsum("bqhd,bkhd->bhqk", q, k) / math.sqrt(HEAD_DIM)
        logits = jnp.where(mask[:, None, None, :], logits, NEG_INF)
        logits = logits - logits.max(-1, keepdims=True)
        pr = jnp.exp(logits)
        pr = pr / pr.sum(-1, keepdims=True)
        attn = jnp.einsum("bhqk,bkhd->bqhd", pr, v).reshape(B, Tr, D)
        h = h + attn @ lp["attn_out_w"] + lp["attn_out_b"]

        h = h + 0.5 * ffn(h, lp["ffn2"])
        h = _ref_ln(h, lp["final_ln_g"], lp["final_ln_b"])

    y = h @ params["out_w"] + params["out_b"]
    y = _ref_ln(y, params["ln_g"], params["ln_b"])
    return y, out_len


# ------------------------------ parameters ------------------------------------
def init_params(key):
    keys = iter(jax.random.split(key, 128))

    def nrm(shape, scale=0.05):
        return jax.random.normal(next(keys), shape, dtype=jnp.float32) * scale

    def ones(n):
        return jnp.ones((1, n), jnp.float32)

    def zeros(n):
        return jnp.zeros((1, n), jnp.float32)

    def ffn_params():
        return {"ln_g": ones(D), "ln_b": zeros(D),
                "w1": nrm((D, FFN_DIM)), "b1": nrm((1, FFN_DIM), 0.01),
                "w2": nrm((FFN_DIM, D)), "b2": nrm((1, D), 0.01)}

    params = {
        "in_w": nrm((INPUT_DIM * TIME_REDUCTION_STRIDE, D)),
        "in_b": nrm((1, D), 0.01),
        "layers": [],
        "out_w": nrm((D, OUTPUT_DIM)),
        "out_b": nrm((1, OUTPUT_DIM), 0.01),
        "ln_g": ones(OUTPUT_DIM),
        "ln_b": zeros(OUTPUT_DIM),
    }
    for _ in range(NUM_LAYERS):
        params["layers"].append({
            "ffn1": ffn_params(),
            "conv_ln_g": ones(D), "conv_ln_b": zeros(D),
            "conv_pw1_w": nrm((D, 2 * D)), "conv_pw1_b": nrm((1, 2 * D), 0.01),
            "conv_dw_w": nrm((DW_KERNEL, D)), "conv_dw_b": nrm((1, D), 0.01),
            "conv_gn_g": ones(D), "conv_gn_b": zeros(D),
            "conv_pw2_w": nrm((D, D)), "conv_pw2_b": nrm((1, D), 0.01),
            "attn_ln_g": ones(D), "attn_ln_b": zeros(D),
            "attn_qkv_w": nrm((D, 3 * D)), "attn_qkv_b": nrm((1, 3 * D), 0.01),
            "attn_out_w": nrm((D, D)), "attn_out_b": nrm((1, D), 0.01),
            "ffn2": ffn_params(),
            "final_ln_g": ones(D), "final_ln_b": zeros(D),
        })
    return params


# --------------------------------- main ---------------------------------------
if __name__ == "__main__":
    B, T = 2, 16
    key = jax.random.PRNGKey(0)
    kx, kp = jax.random.split(key)
    x = jax.random.normal(kx, (B, T, INPUT_DIM), dtype=jnp.float32)
    lengths = jnp.array([16, 12], dtype=jnp.int32)
    params = init_params(kp)

    # TODO(synk): the module's streaming `infer()` raises in PyTorch and is not implemented here.
    run = jax.jit(conformer_encoder)
    out, out_lengths = run(x, lengths, params)
    out = jax.block_until_ready(out)
    out_lengths = jax.block_until_ready(out_lengths)

    assert out.shape == (B, T // TIME_REDUCTION_STRIDE, OUTPUT_DIM), out.shape
    assert out_lengths.shape == (B,)
    assert bool(jnp.all(jnp.isfinite(out)))

    # Correctness check against a pure-JAX reference (tolerance accounts for the
    # approximate-reciprocal softmax denominator).
    ref_out, ref_len = reference_encoder(x, lengths, params)
    ref_out = jax.block_until_ready(ref_out)
    assert bool(jnp.all(out_lengths == ref_len))
    max_err = float(jnp.max(jnp.abs(out - ref_out)))
    assert max_err < 5e-2, f"max abs err {max_err}"

    print("KERNEL_OK")
</pallas_src>

<mosaic_0001>
module attributes {stable_mosaic.version = 11 : i64} {
  func.func @_encoder_kernel(%arg0: i32, %arg1: memref<2xi32, #tpu.memory_space<smem>>, %arg2: memref<8x32xf32, #tpu.memory_space<vmem>>, %arg3: memref<1x32xf32, #tpu.memory_space<vmem>>, %arg4: memref<32x32xf32, #tpu.memory_space<vmem>>, %arg5: memref<1x32xf32, #tpu.memory_space<vmem>>, %arg6: memref<1x32xf32, #tpu.memory_space<vmem>>, %arg7: memref<1x32xf32, #tpu.memory_space<vmem>>, %arg8: memref<32x32xf32, #tpu.memory_space<vmem>>, %arg9: memref<1x96xf32, #tpu.memory_space<vmem>>, %arg10: memref<32x96xf32, #tpu.memory_space<vmem>>, %arg11: memref<1x32xf32, #tpu.memory_space<vmem>>, %arg12: memref<5x32xf32, #tpu.memory_space<vmem>>, %arg13: memref<1x32xf32, #tpu.memory_space<vmem>>, %arg14: memref<1x32xf32, #tpu.memory_space<vmem>>, %arg15: memref<1x32xf32, #tpu.memory_space<vmem>>, %arg16: memref<1x32xf32, #tpu.memory_space<vmem>>, %arg17: memref<1x64xf32, #tpu.memory_space<vmem>>, %arg18: memref<32x64xf32, #tpu.memory_space<vmem>>, %arg19: memref<1x32xf32, #tpu.memory_space<vmem>>, %arg20: memref<32x32xf32, #tpu.memory_space<vmem>>, %arg21: memref<1x64xf32, #tpu.memory_space<vmem>>, %arg22: memref<1x32xf32, #tpu.memory_space<vmem>>, %arg23: memref<1x32xf32, #tpu.memory_space<vmem>>, %arg24: memref<1x32xf32, #tpu.memory_space<vmem>>, %arg25: memref<32x64xf32, #tpu.memory_space<vmem>>, %arg26: memref<64x32xf32, #tpu.memory_space<vmem>>, %arg27: memref<1x64xf32, #tpu.memory_space<vmem>>, %arg28: memref<1x32xf32, #tpu.memory_space<vmem>>, %arg29: memref<1x32xf32, #tpu.memory_space<vmem>>, %arg30: memref<1x32xf32, #tpu.memory_space<vmem>>, %arg31: memref<32x64xf32, #tpu.memory_space<vmem>>, %arg32: memref<64x32xf32, #tpu.memory_space<vmem>>, %arg33: memref<1x32xf32, #tpu.memory_space<vmem>>, %arg34: memref<1x32xf32, #tpu.memory_space<vmem>>, %arg35: memref<1x32xf32, #tpu.memory_space<vmem>>, %arg36: memref<1x32xf32, #tpu.memory_space<vmem>>, %arg37: memref<1x32xf32, #tpu.memory_space<vmem>>, %arg38: memref<32x32xf32, #tpu.memory_space<vmem>>, %arg39: memref<1x96xf32, #tpu.memory_space<vmem>>, %arg40: memref<32x96xf32, #tpu.memory_space<vmem>>, %arg41: memref<1x32xf32, #tpu.memory_space<vmem>>, %arg42: memref<5x32xf32, #tpu.memory_space<vmem>>, %arg43: memref<1x32xf32, #tpu.memory_space<vmem>>, %arg44: memref<1x32xf32, #tpu.memory_space<vmem>>, %arg45: memref<1x32xf32, #tpu.memory_space<vmem>>, %arg46: memref<1x32xf32, #tpu.memory_space<vmem>>, %arg47: memref<1x64xf32, #tpu.memory_space<vmem>>, %arg48: memref<32x64xf32, #tpu.memory_space<vmem>>, %arg49: memref<1x32xf32, #tpu.memory_space<vmem>>, %arg50: memref<32x32xf32, #tpu.memory_space<vmem>>, %arg51: memref<1x64xf32, #tpu.memory_space<vmem>>, %arg52: memref<1x32xf32, #tpu.memory_space<vmem>>, %arg53: memref<1x32xf32, #tpu.memory_space<vmem>>, %arg54: memref<1x32xf32, #tpu.memory_space<vmem>>, %arg55: memref<32x64xf32, #tpu.memory_space<vmem>>, %arg56: memref<64x32xf32, #tpu.memory_space<vmem>>, %arg57: memref<1x64xf32, #tpu.memory_space<vmem>>, %arg58: memref<1x32xf32, #tpu.memory_space<vmem>>, %arg59: memref<1x32xf32, #tpu.memory_space<vmem>>, %arg60: memref<1x32xf32, #tpu.memory_space<vmem>>, %arg61: memref<32x64xf32, #tpu.memory_space<vmem>>, %arg62: memref<64x32xf32, #tpu.memory_space<vmem>>, %arg63: memref<1x32xf32, #tpu.memory_space<vmem>>, %arg64: memref<1x32xf32, #tpu.memory_space<vmem>>, %arg65: memref<1x24xf32, #tpu.memory_space<vmem>>, %arg66: memref<1x24xf32, #tpu.memory_space<vmem>>, %arg67: memref<1x24xf32, #tpu.memory_space<vmem>>, %arg68: memref<32x24xf32, #tpu.memory_space<vmem>>, %arg69: memref<8x24xf32, #tpu.memory_space<vmem>>) attributes {dimension_semantics = [#tpu.dimension_semantics<parallel>], iteration_bounds = array<i64: 2>, scalar_prefetch = 1 : i64, scratch_operands = 0 : i64, tpu.core_type = #tpu.core_type<tc>, window_params = [{transform_indices = @transform_0, window_bounds = array<i64: 8, 32>}, {pipeline_mode = #tpu.pipeline_mode<synchronous>, transform_indices = @transform_1, window_bounds = array<i64: 1, 32>}, {pipeline_mode = #tpu.pipeline_mode<synchronous>, transform_indices = @transform_2, window_bounds = array<i64: 32, 32>}, {pipeline_mode = #tpu.pipeline_mode<synchronous>, transform_indices = @transform_3, window_bounds = array<i64: 1, 32>}, {pipeline_mode = #tpu.pipeline_mode<synchronous>, transform_indices = @transform_4, window_bounds = array<i64: 1, 32>}, {pipeline_mode = #tpu.pipeline_mode<synchronous>, transform_indices = @transform_5, window_bounds = array<i64: 1, 32>}, {pipeline_mode = #tpu.pipeline_mode<synchronous>, transform_indices = @transform_6, window_bounds = array<i64: 32, 32>}, {pipeline_mode = #tpu.pipeline_mode<synchronous>, transform_indices = @transform_7, window_bounds = array<i64: 1, 96>}, {pipeline_mode = #tpu.pipeline_mode<synchronous>, transform_indices = @transform_8, window_bounds = array<i64: 32, 96>}, {pipeline_mode = #tpu.pipeline_mode<synchronous>, transform_indices = @transform_9, window_bounds = array<i64: 1, 32>}, {pipeline_mode = #tpu.pipeline_mode<synchronous>, transform_indices = @transform_10, window_bounds = array<i64: 5, 32>}, {pipeline_mode = #tpu.pipeline_mode<synchronous>, transform_indices = @transform_11, window_bounds = array<i64: 1, 32>}, {pipeline_mode = #tpu.pipeline_mode<synchronous>, transform_indices = @transform_12, window_bounds = array<i64: 1, 32>}, {pipeline_mode = #tpu.pipeline_mode<synchronous>, transform_indices = @transform_13, window_bounds = array<i64: 1, 32>}, {pipeline_mode = #tpu.pipeline_mode<synchronous>, transform_indices = @transform_14, window_bounds = array<i64: 1, 32>}, {pipeline_mode = #tpu.pipeline_mode<synchronous>, transform_indices = @transform_15, window_bounds = array<i64: 1, 64>}, {pipeline_mode = #tpu.pipeline_mode<synchronous>, transform_indices = @transform_16, window_bounds = array<i64: 32, 64>}, {pipeline_mode = #tpu.pipeline_mode<synchronous>, transform_indices = @transform_17, window_bounds = array<i64: 1, 32>}, {pipeline_mode = #tpu.pipeline_mode<synchronous>, transform_indices = @transform_18, window_bounds = array<i64: 32, 32>}, {pipeline_mode = #tpu.pipeline_mode<synchronous>, transform_indices = @transform_19, window_bounds = array<i64: 1, 64>}, {pipeline_mode = #tpu.pipeline_mode<synchronous>, transform_indices = @transform_20, window_bounds = array<i64: 1, 32>}, {pipeline_mode = #tpu.pipeline_mode<synchronous>, transform_indices = @transform_21, window_bounds = array<i64: 1, 32>}, {pipeline_mode = #tpu.pipeline_mode<synchronous>, transform_indices = @transform_22, window_bounds = array<i64: 1, 32>}, {pipeline_mode = #tpu.pipeline_mode<synchronous>, transform_indices = @transform_23, window_bounds = array<i64: 32, 64>}, {pipeline_mode = #tpu.pipeline_mode<synchronous>, transform_indices = @transform_24, window_bounds = array<i64: 64, 32>}, {pipeline_mode = #tpu.pipeline_mode<synchronous>, transform_indices = @transform_25, window_bounds = array<i64: 1, 64>}, {pipeline_mode = #tpu.pipeline_mode<synchronous>, transform_indices = @transform_26, window_bounds = array<i64: 1, 32>}, {pipeline_mode = #tpu.pipeline_mode<synchronous>, transform_indices = @transform_27, window_bounds = array<i64: 1, 32>}, {pipeline_mode = #tpu.pipeline_mode<synchronous>, transform_indices = @transform_28, window_bounds = array<i64: 1, 32>}, {pipeline_mode = #tpu.pipeline_mode<synchronous>, transform_indices = @transform_29, window_bounds = array<i64: 32, 64>}, {pipeline_mode = #tpu.pipeline_mode<synchronous>, transform_indices = @transform_30, window_bounds = array<i64: 64, 32>}, {pipeline_mode = #tpu.pipeline_mode<synchronous>, transform_indices = @transform_31, window_bounds = array<i64: 1, 32>}, {pipeline_mode = #tpu.pipeline_mode<synchronous>, transform_indices = @transform_32, window_bounds = array<i64: 1, 32>}, {pipeline_mode = #tpu.pipeline_mode<synchronous>, transform_indices = @transform_33, window_bounds = array<i64: 1, 32>}, {pipeline_mode = #tpu.pipeline_mode<synchronous>, transform_indices = @transform_34, window_bounds = array<i64: 1, 32>}, {pipeline_mode = #tpu.pipeline_mode<synchronous>, transform_indices = @transform_35, window_bounds = array<i64: 1, 32>}, {pipeline_mode = #tpu.pipeline_mode<synchronous>, transform_indices = @transform_36, window_bounds = array<i64: 32, 32>}, {pipeline_mode = #tpu.pipeline_mode<synchronous>, transform_indices = @transform_37, window_bounds = array<i64: 1, 96>}, {pipeline_mode = #tpu.pipeline_mode<synchronous>, transform_indices = @transform_38, window_bounds = array<i64: 32, 96>}, {pipeline_mode = #tpu.pipeline_mode<synchronous>, transform_indices = @transform_39, window_bounds = array<i64: 1, 32>}, {pipeline_mode = #tpu.pipeline_mode<synchronous>, transform_indices = @transform_40, window_bounds = array<i64: 5, 32>}, {pipeline_mode = #tpu.pipeline_mode<synchronous>, transform_indices = @transform_41, window_bounds = array<i64: 1, 32>}, {pipeline_mode = #tpu.pipeline_mode<synchronous>, transform_indices = @transform_42, window_bounds = array<i64: 1, 32>}, {pipeline_mode = #tpu.pipeline_mode<synchronous>, transform_indices = @transform_43, window_bounds = array<i64: 1, 32>}, {pipeline_mode = #tpu.pipeline_mode<synchronous>, transform_indices = @transform_44, window_bounds = array<i64: 1, 32>}, {pipeline_mode = #tpu.pipeline_mode<synchronous>, transform_indices = @transform_45, window_bounds = array<i64: 1, 64>}, {pipeline_mode = #tpu.pipeline_mode<synchronous>, transform_indices = @transform_46, window_bounds = array<i64: 32, 64>}, {pipeline_mode = #tpu.pipeline_mode<synchronous>, transform_indices = @transform_47, window_bounds = array<i64: 1, 32>}, {pipeline_mode = #tpu.pipeline_mode<synchronous>, transform_indices = @transform_48, window_bounds = array<i64: 32, 32>}, {pipeline_mode = #tpu.pipeline_mode<synchronous>, transform_indices = @transform_49, window_bounds = array<i64: 1, 64>}, {pipeline_mode = #tpu.pipeline_mode<synchronous>, transform_indices = @transform_50, window_bounds = array<i64: 1, 32>}, {pipeline_mode = #tpu.pipeline_mode<synchronous>, transform_indices = @transform_51, window_bounds = array<i64: 1, 32>}, {pipeline_mode = #tpu.pipeline_mode<synchronous>, transform_indices = @transform_52, window_bounds = array<i64: 1, 32>}, {pipeline_mode = #tpu.pipeline_mode<synchronous>, transform_indices = @transform_53, window_bounds = array<i64: 32, 64>}, {pipeline_mode = #tpu.pipeline_mode<synchronous>, transform_indices = @transform_54, window_bounds = array<i64: 64, 32>}, {pipeline_mode = #tpu.pipeline_mode<synchronous>, transform_indices = @transform_55, window_bounds = array<i64: 1, 64>}, {pipeline_mode = #tpu.pipeline_mode<synchronous>, transform_indices = @transform_56, window_bounds = array<i64: 1, 32>}, {pipeline_mode = #tpu.pipeline_mode<synchronous>, transform_indices = @transform_57, window_bounds = array<i64: 1, 32>}, {pipeline_mode = #tpu.pipeline_mode<synchronous>, transform_indices = @transform_58, window_bounds = array<i64: 1, 32>}, {pipeline_mode = #tpu.pipeline_mode<synchronous>, transform_indices = @transform_59, window_bounds = array<i64: 32, 64>}, {pipeline_mode = #tpu.pipeline_mode<synchronous>, transform_indices = @transform_60, window_bounds = array<i64: 64, 32>}, {pipeline_mode = #tpu.pipeline_mode<synchronous>, transform_indices = @transform_61, window_bounds = array<i64: 1, 32>}, {pipeline_mode = #tpu.pipeline_mode<synchronous>, transform_indices = @transform_62, window_bounds = array<i64: 1, 32>}, {pipeline_mode = #tpu.pipeline_mode<synchronous>, transform_indices = @transform_63, window_bounds = array<i64: 1, 24>}, {pipeline_mode = #tpu.pipeline_mode<synchronous>, transform_indices = @transform_64, window_bounds = array<i64: 1, 24>}, {pipeline_mode = #tpu.pipeline_mode<synchronous>, transform_indices = @transform_65, window_bounds = array<i64: 1, 24>}, {pipeline_mode = #tpu.pipeline_mode<synchronous>, transform_indices = @transform_66, window_bounds = array<i64: 32, 24>}, {transform_indices = @transform_67, window_bounds = array<i64: 8, 24>}]} {
    %0 = arith.index_cast %arg0 : i32 to index
    %1 = memref.load %arg1[%0] : memref<2xi32, #tpu.memory_space<smem>>
    %c0 = arith.constant 0 : index
    %c0_0 = arith.constant 0 : index
    %2 = vector.load %arg2[%c0, %c0_0] : memref<8x32xf32, #tpu.memory_space<vmem>>, vector<8x32xf32>
    %c0_1 = arith.constant 0 : index
    %c0_2 = arith.constant 0 : index
    %3 = vector.load %arg4[%c0_1, %c0_2] : memref<32x32xf32, #tpu.memory_space<vmem>>, vector<32x32xf32>
    %cst = arith.constant dense<0.000000e+00> : vector<8x32xf32>
    %4 = tpu.matmul %2, %3, %cst {dimension_numbers = #tpu.dot_dimension_numbers<[1], [0], [0], [1], [0, 0, 1, 1], [], []>} : vector<8x32xf32>, vector<32x32xf32>, vector<8x32xf32> -> vector<8x32xf32>
    %c0_3 = arith.constant 0 : index
    %c0_4 = arith.constant 0 : index
    %5 = vector.load %arg3[%c0_3, %c0_4] : memref<1x32xf32, #tpu.memory_space<vmem>>, vector<1x32xf32>
    %6 = vector.broadcast %5 : vector<1x32xf32> to vector<8x32xf32>
    %7 = arith.addf %4, %6 : vector<8x32xf32>
    %8 = tpu.iota {dimensions = array<i32: 1>} : vector<1x8xi32>
    %9 = vector.broadcast %1 : i32 to vector<1x8xi32>
    %10 = arith.cmpi slt, %8, %9 : vector<1x8xi32>
    %cst_5 = arith.constant 0.000000e+00 : f32
    %cst_6 = arith.constant -1.000000e+30 : f32
    %11 = vector.broadcast %cst_5 : f32 to vector<1x8xf32>
    %12 = vector.broadcast %cst_6 : f32 to vector<1x8xf32>
    %13 = arith.select %10, %11, %12 : vector<1x8xi1>, vector<1x8xf32>
    %14 = tpu.iota {dimensions = array<i32: 0>} : vector<8x8xi32>
    %15 = tpu.iota {dimensions = array<i32: 1>} : vector<8x8xi32>
    %c-2_i32 = arith.constant -2 : i32
    %16 = vector.broadcast %c-2_i32 : i32 to vector<8x8xi32>
    %17 = arith.addi %14, %16 : vector<8x8xi32>
    %18 = arith.cmpi eq, %15, %17 : vector<8x8xi32>
    %19 = arith.extui %18 : vector<8x8xi1> to vector<8x8xi32>
    %20 = arith.sitofp %19 : vector<8x8xi32> to vector<8x8xf32>
    %c-1_i32 = arith.constant -1 : i32
    %21 = vector.broadcast %c-1_i32 : i32 to vector<8x8xi32>
    %22 = arith.addi %14, %21 : vector<8x8xi32>
    %23 = arith.cmpi eq, %15, %22 : vector<8x8xi32>
    %24 = arith.extui %23 : vector<8x8xi1> to vector<8x8xi32>
    %25 = arith.sitofp %24 : vector<8x8xi32> to vector<8x8xf32>
    %c0_i32 = arith.constant 0 : i32
    %26 = vector.broadcast %c0_i32 : i32 to vector<8x8xi32>
    %27 = arith.addi %14, %26 : vector<8x8xi32>
    %28 = arith.cmpi eq, %15, %27 : vector<8x8xi32>
    %29 = arith.extui %28 : vector<8x8xi1> to vector<8x8xi32>
    %30 = arith.sitofp %29 : vector<8x8xi32> to vector<8x8xf32>
    %c1_i32 = arith.constant 1 : i32
    %31 = vector.broadcast %c1_i32 : i32 to vector<8x8xi32>
    %32 = arith.addi %14, %31 : vector<8x8xi32>
    %33 = arith.cmpi eq, %15, %32 : vector<8x8xi32>
    %34 = arith.extui %33 : vector<8x8xi1> to vector<8x8xi32>
    %35 = arith.sitofp %34 : vector<8x8xi32> to vector<8x8xf32>
    %c2_i32 = arith.constant 2 : i32
    %36 = vector.broadcast %c2_i32 : i32 to vector<8x8xi32>
    %37 = arith.addi %14, %36 : vector<8x8xi32>
    %38 = arith.cmpi eq, %15, %37 : vector<8x8xi32>
    %39 = arith.extui %38 : vector<8x8xi1> to vector<8x8xi32>
    %40 = arith.sitofp %39 : vector<8x8xi32> to vector<8x8xf32>
    %c0_7 = arith.constant 0 : index
    %c0_8 = arith.constant 0 : index
    %41 = vector.load %arg24[%c0_7, %c0_8] : memref<1x32xf32, #tpu.memory_space<vmem>>, vector<1x32xf32>
    %c0_9 = arith.constant 0 : index
    %c0_10 = arith.constant 0 : index
    %42 = vector.load %arg23[%c0_9, %c0_10] : memref<1x32xf32, #tpu.memory_space<vmem>>, vector<1x32xf32>
    %cst_11 = arith.constant dense<0.000000e+00> : vector<8xf32>
    %43 = vector.multi_reduction <add>, %7, %cst_11 [1] : vector<8x32xf32> to vector<8xf32>
    %44 = vector.shape_cast %43 : vector<8xf32> to vector<8x1xf32>
    %cst_12 = arith.constant 3.200000e+01 : f32
    %45 = vector.broadcast %cst_12 : f32 to vector<8x1xf32>
    %46 = arith.divf %44, %45 : vector<8x1xf32>
    %47 = vector.broadcast %46 : vector<8x1xf32> to vector<8x32xf32>
    %48 = arith.subf %7, %47 : vector<8x32xf32>
    %49 = arith.mulf %48, %48 : vector<8x32xf32>
    %cst_13 = arith.constant dense<0.000000e+00> : vector<8xf32>
    %50 = vector.multi_reduction <add>, %49, %cst_13 [1] : vector<8x32xf32> to vector<8xf32>
    %51 = vector.shape_cast %50 : vector<8xf32> to vector<8x1xf32>
    %cst_14 = arith.constant 3.200000e+01 : f32
    %52 = vector.broadcast %cst_14 : f32 to vector<8x1xf32>
    %53 = arith.divf %51, %52 : vector<8x1xf32>
    %54 = vector.broadcast %46 : vector<8x1xf32> to vector<8x32xf32>
    %55 = arith.subf %7, %54 : vector<8x32xf32>
    %cst_15 = arith.constant 9.99999974E-6 : f32
    %56 = vector.broadcast %cst_15 : f32 to vector<8x1xf32>
    %57 = arith.addf %53, %56 : vector<8x1xf32>
    %58 = math.rsqrt %57 : vector<8x1xf32>
    %59 = vector.broadcast %58 : vector<8x1xf32> to vector<8x32xf32>
    %60 = arith.mulf %55, %59 : vector<8x32xf32>
    %61 = vector.broadcast %41 : vector<1x32xf32> to vector<8x32xf32>
    %62 = arith.mulf %60, %61 : vector<8x32xf32>
    %63 = vector.broadcast %42 : vector<1x32xf32> to vector<8x32xf32>
    %64 = arith.addf %62, %63 : vector<8x32xf32>
    %c0_16 = arith.constant 0 : index
    %c0_17 = arith.constant 0 : index
    %65 = vector.load %arg25[%c0_16, %c0_17] : memref<32x64xf32, #tpu.memory_space<vmem>>, vector<32x64xf32>
    %cst_18 = arith.constant dense<0.000000e+00> : vector<8x64xf32>
    %66 = tpu.matmul %64, %65, %cst_18 {dimension_numbers = #tpu.dot_dimension_numbers<[1], [0], [0], [1], [0, 0, 1, 1], [], []>} : vector<8x32xf32>, vector<32x64xf32>, vector<8x64xf32> -> vector<8x64xf32>
    %c0_19 = arith.constant 0 : index
    %c0_20 = arith.constant 0 : index
    %67 = vector.load %arg21[%c0_19, %c0_20] : memref<1x64xf32, #tpu.memory_space<vmem>>, vector<1x64xf32>
    %68 = vector.broadcast %67 : vector<1x64xf32> to vector<8x64xf32>
    %69 = arith.addf %66, %68 : vector<8x64xf32>
    %70 = arith.negf %69 : vector<8x64xf32>
    %71 = math.exp %70 : vector<8x64xf32>
    %cst_21 = arith.constant 1.000000e+00 : f32
    %72 = vector.broadcast %cst_21 : f32 to vector<8x64xf32>
    %73 = arith.addf %72, %71 : vector<8x64xf32>
    %74 = arith.divf %72, %73 : vector<8x64xf32>
    %75 = arith.mulf %69, %74 : vector<8x64xf32>
    %c0_22 = arith.constant 0 : index
    %c0_23 = arith.constant 0 : index
    %76 = vector.load %arg26[%c0_22, %c0_23] : memref<64x32xf32, #tpu.memory_space<vmem>>, vector<64x32xf32>
    %cst_24 = arith.constant dense<0.000000e+00> : vector<8x32xf32>
    %77 = tpu.matmul %75, %76, %cst_24 {dimension_numbers = #tpu.dot_dimension_numbers<[1], [0], [0], [1], [0, 0, 1, 1], [], []>} : vector<8x64xf32>, vector<64x32xf32>, vector<8x32xf32> -> vector<8x32xf32>
    %c0_25 = arith.constant 0 : index
    %c0_26 = arith.constant 0 : index
    %78 = vector.load %arg22[%c0_25, %c0_26] : memref<1x32xf32, #tpu.memory_space<vmem>>, vector<1x32xf32>
    %79 = vector.broadcast %78 : vector<1x32xf32> to vector<8x32xf32>
    %80 = arith.addf %77, %79 : vector<8x32xf32>
    %cst_27 = arith.constant 5.000000e-01 : f32
    %81 = vector.broadcast %cst_27 : f32 to vector<8x32xf32>
    %82 = arith.mulf %81, %80 : vector<8x32xf32>
    %83 = arith.addf %7, %82 : vector<8x32xf32>
    %c0_28 = arith.constant 0 : index
    %c0_29 = arith.constant 0 : index
    %84 = vector.load %arg16[%c0_28, %c0_29] : memref<1x32xf32, #tpu.memory_space<vmem>>, vector<1x32xf32>
    %c0_30 = arith.constant 0 : index
    %c0_31 = arith.constant 0 : index
    %85 = vector.load %arg15[%c0_30, %c0_31] : memref<1x32xf32, #tpu.memory_space<vmem>>, vector<1x32xf32>
    %cst_32 = arith.constant dense<0.000000e+00> : vector<8xf32>
    %86 = vector.multi_reduction <add>, %83, %cst_32 [1] : vector<8x32xf32> to vector<8xf32>
    %87 = vector.shape_cast %86 : vector<8xf32> to vector<8x1xf32>
    %cst_33 = arith.constant 3.200000e+01 : f32
    %88 = vector.broadcast %cst_33 : f32 to vector<8x1xf32>
    %89 = arith.divf %87, %88 : vector<8x1xf32>
    %90 = vector.broadcast %89 : vector<8x1xf32> to vector<8x32xf32>
    %91 = arith.subf %83, %90 : vector<8x32xf32>
    %92 = arith.mulf %91, %91 : vector<8x32xf32>
    %cst_34 = arith.constant dense<0.000000e+00> : vector<8xf32>
    %93 = vector.multi_reduction <add>, %92, %cst_34 [1] : vector<8x32xf32> to vector<8xf32>
    %94 = vector.shape_cast %93 : vector<8xf32> to vector<8x1xf32>
    %cst_35 = arith.constant 3.200000e+01 : f32
    %95 = vector.broadcast %cst_35 : f32 to vector<8x1xf32>
    %96 = arith.divf %94, %95 : vector<8x1xf32>
    %97 = vector.broadcast %89 : vector<8x1xf32> to vector<8x32xf32>
    %98 = arith.subf %83, %97 : vector<8x32xf32>
    %cst_36 = arith.constant 9.99999974E-6 : f32
    %99 = vector.broadcast %cst_36 : f32 to vector<8x1xf32>
    %100 = arith.addf %96, %99 : vector<8x1xf32>
    %101 = math.rsqrt %100 : vector<8x1xf32>
    %102 = vector.broadcast %101 : vector<8x1xf32> to vector<8x32xf32>
    %103 = arith.mulf %98, %102 : vector<8x32xf32>
    %104 = vector.broadcast %84 : vector<1x32xf32> to vector<8x32xf32>
    %105 = arith.mulf %103, %104 : vector<8x32xf32>
    %106 = vector.broadcast %85 : vector<1x32xf32> to vector<8x32xf32>
    %107 = arith.addf %105, %106 : vector<8x32xf32>
    %c0_37 = arith.constant 0 : index
    %c0_38 = arith.constant 0 : index
    %108 = vector.load %arg18[%c0_37, %c0_38] : memref<32x64xf32, #tpu.memory_space<vmem>>, vector<32x64xf32>
    %cst_39 = arith.constant dense<0.000000e+00> : vector<8x64xf32>
    %109 = tpu.matmul %107, %108, %cst_39 {dimension_numbers = #tpu.dot_dimension_numbers<[1], [0], [0], [1], [0, 0, 1, 1], [], []>} : vector<8x32xf32>, vector<32x64xf32>, vector<8x64xf32> -> vector<8x64xf32>
    %c0_40 = arith.constant 0 : index
    %c0_41 = arith.constant 0 : index
    %110 = vector.load %arg17[%c0_40, %c0_41] : memref<1x64xf32, #tpu.memory_space<vmem>>, vector<1x64xf32>
    %111 = vector.broadcast %110 : vector<1x64xf32> to vector<8x64xf32>
    %112 = arith.addf %109, %111 : vector<8x64xf32>
    %113 = vector.extract_strided_slice %112 {offsets = [0, 0], sizes = [8, 32], strides = [1, 1]} : vector<8x64xf32> to vector<8x32xf32>
    %114 = vector.extract_strided_slice %112 {offsets = [0, 32], sizes = [8, 32], strides = [1, 1]} : vector<8x64xf32> to vector<8x32xf32>
    %115 = arith.negf %114 : vector<8x32xf32>
    %116 = math.exp %115 : vector<8x32xf32>
    %cst_42 = arith.constant 1.000000e+00 : f32
    %117 = vector.broadcast %cst_42 : f32 to vector<8x32xf32>
    %118 = arith.addf %117, %116 : vector<8x32xf32>
    %119 = arith.divf %117, %118 : vector<8x32xf32>
    %120 = arith.mulf %113, %119 : vector<8x32xf32>
    %c0_43 = arith.constant 0 : index
    %c0_44 = arith.constant 0 : index
    %121 = vector.load %arg12[%c0_43, %c0_44] : memref<5x32xf32, #tpu.memory_space<vmem>>, vector<5x32xf32>
    %cst_45 = arith.constant 0.000000e+00 : f32
    %122 = vector.broadcast %cst_45 : f32 to vector<8x32xf32>
    %cst_46 = arith.constant dense<0.000000e+00> : vector<8x32xf32>
    %123 = tpu.matmul %20, %120, %cst_46 {dimension_numbers = #tpu.dot_dimension_numbers<[1], [0], [0], [1], [0, 0, 1, 1], [], []>} : vector<8x8xf32>, vector<8x32xf32>, vector<8x32xf32> -> vector<8x32xf32>
    %124 = vector.extract_strided_slice %121 {offsets = [0, 0], sizes = [1, 32], strides = [1, 1]} : vector<5x32xf32> to vector<1x32xf32>
    %125 = vector.broadcast %124 : vector<1x32xf32> to vector<8x32xf32>
    %126 = arith.mulf %123, %125 : vector<8x32xf32>
    %127 = arith.addf %122, %126 : vector<8x32xf32>
    %cst_47 = arith.constant dense<0.000000e+00> : vector<8x32xf32>
    %128 = tpu.matmul %25, %120, %cst_47 {dimension_numbers = #tpu.dot_dimension_numbers<[1], [0], [0], [1], [0, 0, 1, 1], [], []>} : vector<8x8xf32>, vector<8x32xf32>, vector<8x32xf32> -> vector<8x32xf32>
    %129 = vector.extract_strided_slice %121 {offsets = [1, 0], sizes = [1, 32], strides = [1, 1]} : vector<5x32xf32> to vector<1x32xf32>
    %130 = vector.broadcast %129 : vector<1x32xf32> to vector<8x32xf32>
    %131 = arith.mulf %128, %130 : vector<8x32xf32>
    %132 = arith.addf %127, %131 : vector<8x32xf32>
    %cst_48 = arith.constant dense<0.000000e+00> : vector<8x32xf32>
    %133 = tpu.matmul %30, %120, %cst_48 {dimension_numbers = #tpu.dot_dimension_numbers<[1], [0], [0], [1], [0, 0, 1, 1], [], []>} : vector<8x8xf32>, vector<8x32xf32>, vector<8x32xf32> -> vector<8x32xf32>
    %134 = vector.extract_strided_slice %121 {offsets = [2, 0], sizes = [1, 32], strides = [1, 1]} : vector<5x32xf32> to vector<1x32xf32>
    %135 = vector.broadcast %134 : vector<1x32xf32> to vector<8x32xf32>
    %136 = arith.mulf %133, %135 : vector<8x32xf32>
    %137 = arith.addf %132, %136 : vector<8x32xf32>
    %cst_49 = arith.constant dense<0.000000e+00> : vector<8x32xf32>
    %138 = tpu.matmul %35, %120, %cst_49 {dimension_numbers = #tpu.dot_dimension_numbers<[1], [0], [0], [1], [0, 0, 1, 1], [], []>} : vector<8x8xf32>, vector<8x32xf32>, vector<8x32xf32> -> vector<8x32xf32>
    %139 = vector.extract_strided_slice %121 {offsets = [3, 0], sizes = [1, 32], strides = [1, 1]} : vector<5x32xf32> to vector<1x32xf32>
    %140 = vector.broadcast %139 : vector<1x32xf32> to vector<8x32xf32>
    %141 = arith.mulf %138, %140 : vector<8x32xf32>
    %142 = arith.addf %137, %141 : vector<8x32xf32>
    %cst_50 = arith.constant dense<0.000000e+00> : vector<8x32xf32>
    %143 = tpu.matmul %40, %120, %cst_50 {dimension_numbers = #tpu.dot_dimension_numbers<[1], [0], [0], [1], [0, 0, 1, 1], [], []>} : vector<8x8xf32>, vector<8x32xf32>, vector<8x32xf32> -> vector<8x32xf32>
    %144 = vector.extract_strided_slice %121 {offsets = [4, 0], sizes = [1, 32], strides = [1, 1]} : vector<5x32xf32> to vector<1x32xf32>
    %145 = vector.broadcast %144 : vector<1x32xf32> to vector<8x32xf32>
    %146 = arith.mulf %143, %145 : vector<8x32xf32>
    %147 = arith.addf %142, %146 : vector<8x32xf32>
    %c0_51 = arith.constant 0 : index
    %c0_52 = arith.constant 0 : index
    %148 = vector.load %arg11[%c0_51, %c0_52] : memref<1x32xf32, #tpu.memory_space<vmem>>, vector<1x32xf32>
    %149 = vector.broadcast %148 : vector<1x32xf32> to vector<8x32xf32>
    %150 = arith.addf %147, %149 : vector<8x32xf32>
    %cst_53 = arith.constant dense<0.000000e+00> : vector<8xf32>
    %151 = vector.multi_reduction <add>, %150, %cst_53 [1] : vector<8x32xf32> to vector<8xf32>
    %152 = vector.shape_cast %151 : vector<8xf32> to vector<8x1xf32>
    %cst_54 = arith.constant dense<0.000000e+00> : vector<1xf32>
    %153 = vector.multi_reduction <add>, %152, %cst_54 [0] : vector<8x1xf32> to vector<1xf32>
    %154 = vector.shape_cast %153 : vector<1xf32> to vector<1x1xf32>
    %cst_55 = arith.constant 3.906250e-03 : f32
    %155 = vector.broadcast %cst_55 : f32 to vector<1x1xf32>
    %156 = arith.mulf %154, %155 : vector<1x1xf32>
    %157 = vector.broadcast %156 : vector<1x1xf32> to vector<8x32xf32>
    %158 = arith.subf %150, %157 : vector<8x32xf32>
    %159 = arith.mulf %158, %158 : vector<8x32xf32>
    %cst_56 = arith.constant dense<0.000000e+00> : vector<8xf32>
    %160 = vector.multi_reduction <add>, %159, %cst_56 [1] : vector<8x32xf32> to vector<8xf32>
    %161 = vector.shape_cast %160 : vector<8xf32> to vector<8x1xf32>
    %cst_57 = arith.constant dense<0.000000e+00> : vector<1xf32>
    %162 = vector.multi_reduction <add>, %161, %cst_57 [0] : vector<8x1xf32> to vector<1xf32>
    %163 = vector.shape_cast %162 : vector<1xf32> to vector<1x1xf32>
    %cst_58 = arith.constant 3.906250e-03 : f32
    %164 = vector.broadcast %cst_58 : f32 to vector<1x1xf32>
    %165 = arith.mulf %163, %164 : vector<1x1xf32>
    %cst_59 = arith.constant 9.99999974E-6 : f32
    %166 = vector.broadcast %cst_59 : f32 to vector<1x1xf32>
    %167 = arith.addf %165, %166 : vector<1x1xf32>
    %168 = math.rsqrt %167 : vector<1x1xf32>
    %169 = vector.broadcast %168 : vector<1x1xf32> to vector<8x32xf32>
    %170 = arith.mulf %158, %169 : vector<8x32xf32>
    %c0_60 = arith.constant 0 : index
    %c0_61 = arith.constant 0 : index
    %171 = vector.load %arg14[%c0_60, %c0_61] : memref<1x32xf32, #tpu.memory_space<vmem>>, vector<1x32xf32>
    %172 = vector.broadcast %171 : vector<1x32xf32> to vector<8x32xf32>
    %173 = arith.mulf %170, %172 : vector<8x32xf32>
    %c0_62 = arith.constant 0 : index
    %c0_63 = arith.constant 0 : index
    %174 = vector.load %arg13[%c0_62, %c0_63] : memref<1x32xf32, #tpu.memory_space<vmem>>, vector<1x32xf32>
    %175 = vector.broadcast %174 : vector<1x32xf32> to vector<8x32xf32>
    %176 = arith.addf %173, %175 : vector<8x32xf32>
    %177 = arith.negf %176 : vector<8x32xf32>
    %178 = math.exp %177 : vector<8x32xf32>
    %cst_64 = arith.constant 1.000000e+00 : f32
    %179 = vector.broadcast %cst_64 : f32 to vector<8x32xf32>
    %180 = arith.addf %179, %178 : vector<8x32xf32>
    %181 = arith.divf %179, %180 : vector<8x32xf32>
    %182 = arith.mulf %176, %181 : vector<8x32xf32>
    %c0_65 = arith.constant 0 : index
    %c0_66 = arith.constant 0 : index
    %183 = vector.load %arg20[%c0_65, %c0_66] : memref<32x32xf32, #tpu.memory_space<vmem>>, vector<32x32xf32>
    %cst_67 = arith.constant dense<0.000000e+00> : vector<8x32xf32>
    %184 = tpu.matmul %182, %183, %cst_67 {dimension_numbers = #tpu.dot_dimension_numbers<[1], [0], [0], [1], [0, 0, 1, 1], [], []>} : vector<8x32xf32>, vector<32x32xf32>, vector<8x32xf32> -> vector<8x32xf32>
    %c0_68 = arith.constant 0 : index
    %c0_69 = arith.constant 0 : index
    %185 = vector.load %arg19[%c0_68, %c0_69] : memref<1x32xf32, #tpu.memory_space<vmem>>, vector<1x32xf32>
    %186 = vector.broadcast %185 : vector<1x32xf32> to vector<8x32xf32>
    %187 = arith.addf %184, %186 : vector<8x32xf32>
    %188 = arith.addf %83, %187 : vector<8x32xf32>
    %c0_70 = arith.constant 0 : index
    %c0_71 = arith.constant 0 : index
    %189 = vector.load %arg6[%c0_70, %c0_71] : memref<1x32xf32, #tpu.memory_space<vmem>>, vector<1x32xf32>
    %c0_72 = arith.constant 0 : index
    %c0_73 = arith.constant 0 : index
    %190 = vector.load %arg5[%c0_72, %c0_73] : memref<1x32xf32, #tpu.memory_space<vmem>>, vector<1x32xf32>
    %cst_74 = arith.constant dense<0.000000e+00> : vector<8xf32>
    %191 = vector.multi_reduction <add>, %188, %cst_74 [1] : vector<8x32xf32> to vector<8xf32>
    %192 = vector.shape_cast %191 : vector<8xf32> to vector<8x1xf32>
    %cst_75 = arith.constant 3.200000e+01 : f32
    %193 = vector.broadcast %cst_75 : f32 to vector<8x1xf32>
    %194 = arith.divf %192, %193 : vector<8x1xf32>
    %195 = vector.broadcast %194 : vector<8x1xf32> to vector<8x32xf32>
    %196 = arith.subf %188, %195 : vector<8x32xf32>
    %197 = arith.mulf %196, %196 : vector<8x32xf32>
    %cst_76 = arith.constant dense<0.000000e+00> : vector<8xf32>
    %198 = vector.multi_reduction <add>, %197, %cst_76 [1] : vector<8x32xf32> to vector<8xf32>
    %199 = vector.shape_cast %198 : vector<8xf32> to vector<8x1xf32>
    %cst_77 = arith.constant 3.200000e+01 : f32
    %200 = vector.broadcast %cst_77 : f32 to vector<8x1xf32>
    %201 = arith.divf %199, %200 : vector<8x1xf32>
    %202 = vector.broadcast %194 : vector<8x1xf32> to vector<8x32xf32>
    %203 = arith.subf %188, %202 : vector<8x32xf32>
    %cst_78 = arith.constant 9.99999974E-6 : f32
    %204 = vector.broadcast %cst_78 : f32 to vector<8x1xf32>
    %205 = arith.addf %201, %204 : vector<8x1xf32>
    %206 = math.rsqrt %205 : vector<8x1xf32>
    %207 = vector.broadcast %206 : vector<8x1xf32> to vector<8x32xf32>
    %208 = arith.mulf %203, %207 : vector<8x32xf32>
    %209 = vector.broadcast %189 : vector<1x32xf32> to vector<8x32xf32>
    %210 = arith.mulf %208, %209 : vector<8x32xf32>
    %211 = vector.broadcast %190 : vector<1x32xf32> to vector<8x32xf32>
    %212 = arith.addf %210, %211 : vector<8x32xf32>
    %c0_79 = arith.constant 0 : index
    %c0_80 = arith.constant 0 : index
    %213 = vector.load %arg10[%c0_79, %c0_80] : memref<32x96xf32, #tpu.memory_space<vmem>>, vector<32x96xf32>
    %cst_81 = arith.constant dense<0.000000e+00> : vector<8x96xf32>
    %214 = tpu.matmul %212, %213, %cst_81 {dimension_numbers = #tpu.dot_dimension_numbers<[1], [0], [0], [1], [0, 0, 1, 1], [], []>} : vector<8x32xf32>, vector<32x96xf32>, vector<8x96xf32> -> vector<8x96xf32>
    %c0_82 = arith.constant 0 : index
    %c0_83 = arith.constant 0 : index
    %215 = vector.load %arg9[%c0_82, %c0_83] : memref<1x96xf32, #tpu.memory_space<vmem>>, vector<1x96xf32>
    %216 = vector.broadcast %215 : vector<1x96xf32> to vector<8x96xf32>
    %217 = arith.addf %214, %216 : vector<8x96xf32>
    %218 = vector.extract_strided_slice %217 {offsets = [0, 0], sizes = [8, 8], strides = [1, 1]} : vector<8x96xf32> to vector<8x8xf32>
    %219 = vector.extract_strided_slice %217 {offsets = [0, 32], sizes = [8, 8], strides = [1, 1]} : vector<8x96xf32> to vector<8x8xf32>
    %220 = vector.extract_strided_slice %217 {offsets = [0, 64], sizes = [8, 8], strides = [1, 1]} : vector<8x96xf32> to vector<8x8xf32>
    %cst_84 = arith.constant dense<0.000000e+00> : vector<8x8xf32>
    %221 = tpu.matmul %218, %219, %cst_84 {dimension_numbers = #tpu.dot_dimension_numbers<[1], [1], [0], [0], [0, 0, 1, 0], [], []>} : vector<8x8xf32>, vector<8x8xf32>, vector<8x8xf32> -> vector<8x8xf32>
    %cst_85 = arith.constant 0.353553385 : f32
    %222 = vector.broadcast %cst_85 : f32 to vector<8x8xf32>
    %223 = arith.mulf %221, %222 : vector<8x8xf32>
    %224 = vector.broadcast %13 : vector<1x8xf32> to vector<8x8xf32>
    %225 = arith.addf %223, %224 : vector<8x8xf32>
    %cst_86 = arith.constant dense<0xFF800000> : vector<8xf32>
    %226 = vector.multi_reduction <maximumf>, %225, %cst_86 [1] : vector<8x8xf32> to vector<8xf32>
    %227 = vector.shape_cast %226 : vector<8xf32> to vector<8x1xf32>
    %228 = vector.broadcast %227 : vector<8x1xf32> to vector<8x8xf32>
    %229 = arith.subf %225, %228 : vector<8x8xf32>
    %230 = math.exp %229 : vector<8x8xf32>
    %cst_87 = arith.constant dense<0.000000e+00> : vector<8xf32>
    %231 = vector.multi_reduction <add>, %230, %cst_87 [1] : vector<8x8xf32> to vector<8xf32>
    %232 = vector.shape_cast %231 : vector<8xf32> to vector<8x1xf32>
    %233 = tpu.reciprocal %232 {approx = true} : vector<8x1xf32> -> vector<8x1xf32>
    %234 = vector.broadcast %233 : vector<8x1xf32> to vector<8x8xf32>
    %235 = arith.mulf %230, %234 : vector<8x8xf32>
    %cst_88 = arith.constant dense<0.000000e+00> : vector<8x8xf32>
    %236 = tpu.matmul %235, %220, %cst_88 {dimension_numbers = #tpu.dot_dimension_numbers<[1], [0], [0], [1], [0, 0, 1, 1], [], []>} : vector<8x8xf32>, vector<8x8xf32>, vector<8x8xf32> -> vector<8x8xf32>
    %237 = vector.extract_strided_slice %217 {offsets = [0, 8], sizes = [8, 8], strides = [1, 1]} : vector<8x96xf32> to vector<8x8xf32>
    %238 = vector.extract_strided_slice %217 {offsets = [0, 40], sizes = [8, 8], strides = [1, 1]} : vector<8x96xf32> to vector<8x8xf32>
    %239 = vector.extract_strided_slice %217 {offsets = [0, 72], sizes = [8, 8], strides = [1, 1]} : vector<8x96xf32> to vector<8x8xf32>
    %cst_89 = arith.constant dense<0.000000e+00> : vector<8x8xf32>
    %240 = tpu.matmul %237, %238, %cst_89 {dimension_numbers = #tpu.dot_dimension_numbers<[1], [1], [0], [0], [0, 0, 1, 0], [], []>} : vector<8x8xf32>, vector<8x8xf32>, vector<8x8xf32> -> vector<8x8xf32>
    %cst_90 = arith.constant 0.353553385 : f32
    %241 = vector.broadcast %cst_90 : f32 to vector<8x8xf32>
    %242 = arith.mulf %240, %241 : vector<8x8xf32>
    %243 = vector.broadcast %13 : vector<1x8xf32> to vector<8x8xf32>
    %244 = arith.addf %242, %243 : vector<8x8xf32>
    %cst_91 = arith.constant dense<0xFF800000> : vector<8xf32>
    %245 = vector.multi_reduction <maximumf>, %244, %cst_91 [1] : vector<8x8xf32> to vector<8xf32>
    %246 = vector.shape_cast %245 : vector<8xf32> to vector<8x1xf32>
    %247 = vector.broadcast %246 : vector<8x1xf32> to vector<8x8xf32>
    %248 = arith.subf %244, %247 : vector<8x8xf32>
    %249 = math.exp %248 : vector<8x8xf32>
    %cst_92 = arith.constant dense<0.000000e+00> : vector<8xf32>
    %250 = vector.multi_reduction <add>, %249, %cst_92 [1] : vector<8x8xf32> to vector<8xf32>
    %251 = vector.shape_cast %250 : vector<8xf32> to vector<8x1xf32>
    %252 = tpu.reciprocal %251 {approx = true} : vector<8x1xf32> -> vector<8x1xf32>
    %253 = vector.broadcast %252 : vector<8x1xf32> to vector<8x8xf32>
    %254 = arith.mulf %249, %253 : vector<8x8xf32>
    %cst_93 = arith.constant dense<0.000000e+00> : vector<8x8xf32>
    %255 = tpu.matmul %254, %239, %cst_93 {dimension_numbers = #tpu.dot_dimension_numbers<[1], [0], [0], [1], [0, 0, 1, 1], [], []>} : vector<8x8xf32>, vector<8x8xf32>, vector<8x8xf32> -> vector<8x8xf32>
    %256 = vector.extract_strided_slice %217 {offsets = [0, 16], sizes = [8, 8], strides = [1, 1]} : vector<8x96xf32> to vector<8x8xf32>
    %257 = vector.extract_strided_slice %217 {offsets = [0, 48], sizes = [8, 8], strides = [1, 1]} : vector<8x96xf32> to vector<8x8xf32>
    %258 = vector.extract_strided_slice %217 {offsets = [0, 80], sizes = [8, 8], strides = [1, 1]} : vector<8x96xf32> to vector<8x8xf32>
    %cst_94 = arith.constant dense<0.000000e+00> : vector<8x8xf32>
    %259 = tpu.matmul %256, %257, %cst_94 {dimension_numbers = #tpu.dot_dimension_numbers<[1], [1], [0], [0], [0, 0, 1, 0], [], []>} : vector<8x8xf32>, vector<8x8xf32>, vector<8x8xf32> -> vector<8x8xf32>
    %cst_95 = arith.constant 0.353553385 : f32
    %260 = vector.broadcast %cst_95 : f32 to vector<8x8xf32>
    %261 = arith.mulf %259, %260 : vector<8x8xf32>
    %262 = vector.broadcast %13 : vector<1x8xf32> to vector<8x8xf32>
    %263 = arith.addf %261, %262 : vector<8x8xf32>
    %cst_96 = arith.constant dense<0xFF800000> : vector<8xf32>
    %264 = vector.multi_reduction <maximumf>, %263, %cst_96 [1] : vector<8x8xf32> to vector<8xf32>
    %265 = vector.shape_cast %264 : vector<8xf32> to vector<8x1xf32>
    %266 = vector.broadcast %265 : vector<8x1xf32> to vector<8x8xf32>
    %267 = arith.subf %263, %266 : vector<8x8xf32>
    %268 = math.exp %267 : vector<8x8xf32>
    %cst_97 = arith.constant dense<0.000000e+00> : vector<8xf32>
    %269 = vector.multi_reduction <add>, %268, %cst_97 [1] : vector<8x8xf32> to vector<8xf32>
    %270 = vector.shape_cast %269 : vector<8xf32> to vector<8x1xf32>
    %271 = tpu.reciprocal %270 {approx = true} : vector<8x1xf32> -> vector<8x1xf32>
    %272 = vector.broadcast %271 : vector<8x1xf32> to vector<8x8xf32>
    %273 = arith.mulf %268, %272 : vector<8x8xf32>
    %cst_98 = arith.constant dense<0.000000e+00> : vector<8x8xf32>
    %274 = tpu.matmul %273, %258, %cst_98 {dimension_numbers = #tpu.dot_dimension_numbers<[1], [0], [0], [1], [0, 0, 1, 1], [], []>} : vector<8x8xf32>, vector<8x8xf32>, vector<8x8xf32> -> vector<8x8xf32>
    %275 = vector.extract_strided_slice %217 {offsets = [0, 24], sizes = [8, 8], strides = [1, 1]} : vector<8x96xf32> to vector<8x8xf32>
    %276 = vector.extract_strided_slice %217 {offsets = [0, 56], sizes = [8, 8], strides = [1, 1]} : vector<8x96xf32> to vector<8x8xf32>
    %277 = vector.extract_strided_slice %217 {offsets = [0, 88], sizes = [8, 8], strides = [1, 1]} : vector<8x96xf32> to vector<8x8xf32>
    %cst_99 = arith.constant dense<0.000000e+00> : vector<8x8xf32>
    %278 = tpu.matmul %275, %276, %cst_99 {dimension_numbers = #tpu.dot_dimension_numbers<[1], [1], [0], [0], [0, 0, 1, 0], [], []>} : vector<8x8xf32>, vector<8x8xf32>, vector<8x8xf32> -> vector<8x8xf32>
    %cst_100 = arith.constant 0.353553385 : f32
    %279 = vector.broadcast %cst_100 : f32 to vector<8x8xf32>
    %280 = arith.mulf %278, %279 : vector<8x8xf32>
    %281 = vector.broadcast %13 : vector<1x8xf32> to vector<8x8xf32>
    %282 = arith.addf %280, %281 : vector<8x8xf32>
    %cst_101 = arith.constant dense<0xFF800000> : vector<8xf32>
    %283 = vector.multi_reduction <maximumf>, %282, %cst_101 [1] : vector<8x8xf32> to vector<8xf32>
    %284 = vector.shape_cast %283 : vector<8xf32> to vector<8x1xf32>
    %285 = vector.broadcast %284 : vector<8x1xf32> to vector<8x8xf32>
    %286 = arith.subf %282, %285 : vector<8x8xf32>
    %287 = math.exp %286 : vector<8x8xf32>
    %cst_102 = arith.constant dense<0.000000e+00> : vector<8xf32>
    %288 = vector.multi_reduction <add>, %287, %cst_102 [1] : vector<8x8xf32> to vector<8xf32>
    %289 = vector.shape_cast %288 : vector<8xf32> to vector<8x1xf32>
    %290 = tpu.reciprocal %289 {approx = true} : vector<8x1xf32> -> vector<8x1xf32>
    %291 = vector.broadcast %290 : vector<8x1xf32> to vector<8x8xf32>
    %292 = arith.mulf %287, %291 : vector<8x8xf32>
    %cst_103 = arith.constant dense<0.000000e+00> : vector<8x8xf32>
    %293 = tpu.matmul %292, %277, %cst_103 {dimension_numbers = #tpu.dot_dimension_numbers<[1], [0], [0], [1], [0, 0, 1, 1], [], []>} : vector<8x8xf32>, vector<8x8xf32>, vector<8x8xf32> -> vector<8x8xf32>
    %294 = tpu.concatenate %236, %255, %274, %293 in 1 : vector<8x8xf32>, vector<8x8xf32>, vector<8x8xf32>, vector<8x8xf32> -> vector<8x32xf32>
    %c0_104 = arith.constant 0 : index
    %c0_105 = arith.constant 0 : index
    %295 = vector.load %arg8[%c0_104, %c0_105] : memref<32x32xf32, #tpu.memory_space<vmem>>, vector<32x32xf32>
    %cst_106 = arith.constant dense<0.000000e+00> : vector<8x32xf32>
    %296 = tpu.matmul %294, %295, %cst_106 {dimension_numbers = #tpu.dot_dimension_numbers<[1], [0], [0], [1], [0, 0, 1, 1], [], []>} : vector<8x32xf32>, vector<32x32xf32>, vector<8x32xf32> -> vector<8x32xf32>
    %c0_107 = arith.constant 0 : index
    %c0_108 = arith.constant 0 : index
    %297 = vector.load %arg7[%c0_107, %c0_108] : memref<1x32xf32, #tpu.memory_space<vmem>>, vector<1x32xf32>
    %298 = vector.broadcast %297 : vector<1x32xf32> to vector<8x32xf32>
    %299 = arith.addf %296, %298 : vector<8x32xf32>
    %300 = arith.addf %188, %299 : vector<8x32xf32>
    %c0_109 = arith.constant 0 : index
    %c0_110 = arith.constant 0 : index
    %301 = vector.load %arg30[%c0_109, %c0_110] : memref<1x32xf32, #tpu.memory_space<vmem>>, vector<1x32xf32>
    %c0_111 = arith.constant 0 : index
    %c0_112 = arith.constant 0 : index
    %302 = vector.load %arg29[%c0_111, %c0_112] : memref<1x32xf32, #tpu.memory_space<vmem>>, vector<1x32xf32>
    %cst_113 = arith.constant dense<0.000000e+00> : vector<8xf32>
    %303 = vector.multi_reduction <add>, %300, %cst_113 [1] : vector<8x32xf32> to vector<8xf32>
    %304 = vector.shape_cast %303 : vector<8xf32> to vector<8x1xf32>
    %cst_114 = arith.constant 3.200000e+01 : f32
    %305 = vector.broadcast %cst_114 : f32 to vector<8x1xf32>
    %306 = arith.divf %304, %305 : vector<8x1xf32>
    %307 = vector.broadcast %306 : vector<8x1xf32> to vector<8x32xf32>
    %308 = arith.subf %300, %307 : vector<8x32xf32>
    %309 = arith.mulf %308, %308 : vector<8x32xf32>
    %cst_115 = arith.constant dense<0.000000e+00> : vector<8xf32>
    %310 = vector.multi_reduction <add>, %309, %cst_115 [1] : vector<8x32xf32> to vector<8xf32>
    %311 = vector.shape_cast %310 : vector<8xf32> to vector<8x1xf32>
    %cst_116 = arith.constant 3.200000e+01 : f32
    %312 = vector.broadcast %cst_116 : f32 to vector<8x1xf32>
    %313 = arith.divf %311, %312 : vector<8x1xf32>
    %314 = vector.broadcast %306 : vector<8x1xf32> to vector<8x32xf32>
    %315 = arith.subf %300, %314 : vector<8x32xf32>
    %cst_117 = arith.constant 9.99999974E-6 : f32
    %316 = vector.broadcast %cst_117 : f32 to vector<8x1xf32>
    %317 = arith.addf %313, %316 : vector<8x1xf32>
    %318 = math.rsqrt %317 : vector<8x1xf32>
    %319 = vector.broadcast %318 : vector<8x1xf32> to vector<8x32xf32>
    %320 = arith.mulf %315, %319 : vector<8x32xf32>
    %321 = vector.broadcast %301 : vector<1x32xf32> to vector<8x32xf32>
    %322 = arith.mulf %320, %321 : vector<8x32xf32>
    %323 = vector.broadcast %302 : vector<1x32xf32> to vector<8x32xf32>
    %324 = arith.addf %322, %323 : vector<8x32xf32>
    %c0_118 = arith.constant 0 : index
    %c0_119 = arith.constant 0 : index
    %325 = vector.load %arg31[%c0_118, %c0_119] : memref<32x64xf32, #tpu.memory_space<vmem>>, vector<32x64xf32>
    %cst_120 = arith.constant dense<0.000000e+00> : vector<8x64xf32>
    %326 = tpu.matmul %324, %325, %cst_120 {dimension_numbers = #tpu.dot_dimension_numbers<[1], [0], [0], [1], [0, 0, 1, 1], [], []>} : vector<8x32xf32>, vector<32x64xf32>, vector<8x64xf32> -> vector<8x64xf32>
    %c0_121 = arith.constant 0 : index
    %c0_122 = arith.constant 0 : index
    %327 = vector.load %arg27[%c0_121, %c0_122] : memref<1x64xf32, #tpu.memory_space<vmem>>, vector<1x64xf32>
    %328 = vector.broadcast %327 : vector<1x64xf32> to vector<8x64xf32>
    %329 = arith.addf %326, %328 : vector<8x64xf32>
    %330 = arith.negf %329 : vector<8x64xf32>
    %331 = math.exp %330 : vector<8x64xf32>
    %cst_123 = arith.constant 1.000000e+00 : f32
    %332 = vector.broadcast %cst_123 : f32 to vector<8x64xf32>
    %333 = arith.addf %332, %331 : vector<8x64xf32>
    %334 = arith.divf %332, %333 : vector<8x64xf32>
    %335 = arith.mulf %329, %334 : vector<8x64xf32>
    %c0_124 = arith.constant 0 : index
    %c0_125 = arith.constant 0 : index
    %336 = vector.load %arg32[%c0_124, %c0_125] : memref<64x32xf32, #tpu.memory_space<vmem>>, vector<64x32xf32>
    %cst_126 = arith.constant dense<0.000000e+00> : vector<8x32xf32>
    %337 = tpu.matmul %335, %336, %cst_126 {dimension_numbers = #tpu.dot_dimension_numbers<[1], [0], [0], [1], [0, 0, 1, 1], [], []>} : vector<8x64xf32>, vector<64x32xf32>, vector<8x32xf32> -> vector<8x32xf32>
    %c0_127 = arith.constant 0 : index
    %c0_128 = arith.constant 0 : index
    %338 = vector.load %arg28[%c0_127, %c0_128] : memref<1x32xf32, #tpu.memory_space<vmem>>, vector<1x32xf32>
    %339 = vector.broadcast %338 : vector<1x32xf32> to vector<8x32xf32>
    %340 = arith.addf %337, %339 : vector<8x32xf32>
    %cst_129 = arith.constant 5.000000e-01 : f32
    %341 = vector.broadcast %cst_129 : f32 to vector<8x32xf32>
    %342 = arith.mulf %341, %340 : vector<8x32xf32>
    %343 = arith.addf %300, %342 : vector<8x32xf32>
    %c0_130 = arith.constant 0 : index
    %c0_131 = arith.constant 0 : index
    %344 = vector.load %arg34[%c0_130, %c0_131] : memref<1x32xf32, #tpu.memory_space<vmem>>, vector<1x32xf32>
    %c0_132 = arith.constant 0 : index
    %c0_133 = arith.constant 0 : index
    %345 = vector.load %arg33[%c0_132, %c0_133] : memref<1x32xf32, #tpu.memory_space<vmem>>, vector<1x32xf32>
    %cst_134 = arith.constant dense<0.000000e+00> : vector<8xf32>
    %346 = vector.multi_reduction <add>, %343, %cst_134 [1] : vector<8x32xf32> to vector<8xf32>
    %347 = vector.shape_cast %346 : vector<8xf32> to vector<8x1xf32>
    %cst_135 = arith.constant 3.200000e+01 : f32
    %348 = vector.broadcast %cst_135 : f32 to vector<8x1xf32>
    %349 = arith.divf %347, %348 : vector<8x1xf32>
    %350 = vector.broadcast %349 : vector<8x1xf32> to vector<8x32xf32>
    %351 = arith.subf %343, %350 : vector<8x32xf32>
    %352 = arith.mulf %351, %351 : vector<8x32xf32>
    %cst_136 = arith.constant dense<0.000000e+00> : vector<8xf32>
    %353 = vector.multi_reduction <add>, %352, %cst_136 [1] : vector<8x32xf32> to vector<8xf32>
    %354 = vector.shape_cast %353 : vector<8xf32> to vector<8x1xf32>
    %cst_137 = arith.constant 3.200000e+01 : f32
    %355 = vector.broadcast %cst_137 : f32 to vector<8x1xf32>
    %356 = arith.divf %354, %355 : vector<8x1xf32>
    %357 = vector.broadcast %349 : vector<8x1xf32> to vector<8x32xf32>
    %358 = arith.subf %343, %357 : vector<8x32xf32>
    %cst_138 = arith.constant 9.99999974E-6 : f32
    %359 = vector.broadcast %cst_138 : f32 to vector<8x1xf32>
    %360 = arith.addf %356, %359 : vector<8x1xf32>
    %361 = math.rsqrt %360 : vector<8x1xf32>
    %362 = vector.broadcast %361 : vector<8x1xf32> to vector<8x32xf32>
    %363 = arith.mulf %358, %362 : vector<8x32xf32>
    %364 = vector.broadcast %344 : vector<1x32xf32> to vector<8x32xf32>
    %365 = arith.mulf %363, %364 : vector<8x32xf32>
    %366 = vector.broadcast %345 : vector<1x32xf32> to vector<8x32xf32>
    %367 = arith.addf %365, %366 : vector<8x32xf32>
    %c0_139 = arith.constant 0 : index
    %c0_140 = arith.constant 0 : index
    %368 = vector.load %arg54[%c0_139, %c0_140] : memref<1x32xf32, #tpu.memory_space<vmem>>, vector<1x32xf32>
    %c0_141 = arith.constant 0 : index
    %c0_142 = arith.constant 0 : index
    %369 = vector.load %arg53[%c0_141, %c0_142] : memref<1x32xf32, #tpu.memory_space<vmem>>, vector<1x32xf32>
    %cst_143 = arith.constant dense<0.000000e+00> : vector<8xf32>
    %370 = vector.multi_reduction <add>, %367, %cst_143 [1] : vector<8x32xf32> to vector<8xf32>
    %371 = vector.shape_cast %370 : vector<8xf32> to vector<8x1xf32>
    %cst_144 = arith.constant 3.200000e+01 : f32
    %372 = vector.broadcast %cst_144 : f32 to vector<8x1xf32>
    %373 = arith.divf %371, %372 : vector<8x1xf32>
    %374 = vector.broadcast %373 : vector<8x1xf32> to vector<8x32xf32>
    %375 = arith.subf %367, %374 : vector<8x32xf32>
    %376 = arith.mulf %375, %375 : vector<8x32xf32>
    %cst_145 = arith.constant dense<0.000000e+00> : vector<8xf32>
    %377 = vector.multi_reduction <add>, %376, %cst_145 [1] : vector<8x32xf32> to vector<8xf32>
    %378 = vector.shape_cast %377 : vector<8xf32> to vector<8x1xf32>
    %cst_146 = arith.constant 3.200000e+01 : f32
    %379 = vector.broadcast %cst_146 : f32 to vector<8x1xf32>
    %380 = arith.divf %378, %379 : vector<8x1xf32>
    %381 = vector.broadcast %373 : vector<8x1xf32> to vector<8x32xf32>
    %382 = arith.subf %367, %381 : vector<8x32xf32>
    %cst_147 = arith.constant 9.99999974E-6 : f32
    %383 = vector.broadcast %cst_147 : f32 to vector<8x1xf32>
    %384 = arith.addf %380, %383 : vector<8x1xf32>
    %385 = math.rsqrt %384 : vector<8x1xf32>
    %386 = vector.broadcast %385 : vector<8x1xf32> to vector<8x32xf32>
    %387 = arith.mulf %382, %386 : vector<8x32xf32>
    %388 = vector.broadcast %368 : vector<1x32xf32> to vector<8x32xf32>
    %389 = arith.mulf %387, %388 : vector<8x32xf32>
    %390 = vector.broadcast %369 : vector<1x32xf32> to vector<8x32xf32>
    %391 = arith.addf %389, %390 : vector<8x32xf32>
    %c0_148 = arith.constant 0 : index
    %c0_149 = arith.constant 0 : index
    %392 = vector.load %arg55[%c0_148, %c0_149] : memref<32x64xf32, #tpu.memory_space<vmem>>, vector<32x64xf32>
    %cst_150 = arith.constant dense<0.000000e+00> : vector<8x64xf32>
    %393 = tpu.matmul %391, %392, %cst_150 {dimension_numbers = #tpu.dot_dimension_numbers<[1], [0], [0], [1], [0, 0, 1, 1], [], []>} : vector<8x32xf32>, vector<32x64xf32>, vector<8x64xf32> -> vector<8x64xf32>
    %c0_151 = arith.constant 0 : index
    %c0_152 = arith.constant 0 : index
    %394 = vector.load %arg51[%c0_151, %c0_152] : memref<1x64xf32, #tpu.memory_space<vmem>>, vector<1x64xf32>
    %395 = vector.broadcast %394 : vector<1x64xf32> to vector<8x64xf32>
    %396 = arith.addf %393, %395 : vector<8x64xf32>
    %397 = arith.negf %396 : vector<8x64xf32>
    %398 = math.exp %397 : vector<8x64xf32>
    %cst_153 = arith.constant 1.000000e+00 : f32
    %399 = vector.broadcast %cst_153 : f32 to vector<8x64xf32>
    %400 = arith.addf %399, %398 : vector<8x64xf32>
    %401 = arith.divf %399, %400 : vector<8x64xf32>
    %402 = arith.mulf %396, %401 : vector<8x64xf32>
    %c0_154 = arith.constant 0 : index
    %c0_155 = arith.constant 0 : index
    %403 = vector.load %arg56[%c0_154, %c0_155] : memref<64x32xf32, #tpu.memory_space<vmem>>, vector<64x32xf32>
    %cst_156 = arith.constant dense<0.000000e+00> : vector<8x32xf32>
    %404 = tpu.matmul %402, %403, %cst_156 {dimension_numbers = #tpu.dot_dimension_numbers<[1], [0], [0], [1], [0, 0, 1, 1], [], []>} : vector<8x64xf32>, vector<64x32xf32>, vector<8x32xf32> -> vector<8x32xf32>
    %c0_157 = arith.constant 0 : index
    %c0_158 = arith.constant 0 : index
    %405 = vector.load %arg52[%c0_157, %c0_158] : memref<1x32xf32, #tpu.memory_space<vmem>>, vector<1x32xf32>
    %406 = vector.broadcast %405 : vector<1x32xf32> to vector<8x32xf32>
    %407 = arith.addf %404, %406 : vector<8x32xf32>
    %cst_159 = arith.constant 5.000000e-01 : f32
    %408 = vector.broadcast %cst_159 : f32 to vector<8x32xf32>
    %409 = arith.mulf %408, %407 : vector<8x32xf32>
    %410 = arith.addf %367, %409 : vector<8x32xf32>
    %c0_160 = arith.constant 0 : index
    %c0_161 = arith.constant 0 : index
    %411 = vector.load %arg46[%c0_160, %c0_161] : memref<1x32xf32, #tpu.memory_space<vmem>>, vector<1x32xf32>
    %c0_162 = arith.constant 0 : index
    %c0_163 = arith.constant 0 : index
    %412 = vector.load %arg45[%c0_162, %c0_163] : memref<1x32xf32, #tpu.memory_space<vmem>>, vector<1x32xf32>
    %cst_164 = arith.constant dense<0.000000e+00> : vector<8xf32>
    %413 = vector.multi_reduction <add>, %410, %cst_164 [1] : vector<8x32xf32> to vector<8xf32>
    %414 = vector.shape_cast %413 : vector<8xf32> to vector<8x1xf32>
    %cst_165 = arith.constant 3.200000e+01 : f32
    %415 = vector.broadcast %cst_165 : f32 to vector<8x1xf32>
    %416 = arith.divf %414, %415 : vector<8x1xf32>
    %417 = vector.broadcast %416 : vector<8x1xf32> to vector<8x32xf32>
    %418 = arith.subf %410, %417 : vector<8x32xf32>
    %419 = arith.mulf %418, %418 : vector<8x32xf32>
    %cst_166 = arith.constant dense<0.000000e+00> : vector<8xf32>
    %420 = vector.multi_reduction <add>, %419, %cst_166 [1] : vector<8x32xf32> to vector<8xf32>
    %421 = vector.shape_cast %420 : vector<8xf32> to vector<8x1xf32>
    %cst_167 = arith.constant 3.200000e+01 : f32
    %422 = vector.broadcast %cst_167 : f32 to vector<8x1xf32>
    %423 = arith.divf %421, %422 : vector<8x1xf32>
    %424 = vector.broadcast %416 : vector<8x1xf32> to vector<8x32xf32>
    %425 = arith.subf %410, %424 : vector<8x32xf32>
    %cst_168 = arith.constant 9.99999974E-6 : f32
    %426 = vector.broadcast %cst_168 : f32 to vector<8x1xf32>
    %427 = arith.addf %423, %426 : vector<8x1xf32>
    %428 = math.rsqrt %427 : vector<8x1xf32>
    %429 = vector.broadcast %428 : vector<8x1xf32> to vector<8x32xf32>
    %430 = arith.mulf %425, %429 : vector<8x32xf32>
    %431 = vector.broadcast %411 : vector<1x32xf32> to vector<8x32xf32>
    %432 = arith.mulf %430, %431 : vector<8x32xf32>
    %433 = vector.broadcast %412 : vector<1x32xf32> to vector<8x32xf32>
    %434 = arith.addf %432, %433 : vector<8x32xf32>
    %c0_169 = arith.constant 0 : index
    %c0_170 = arith.constant 0 : index
    %435 = vector.load %arg48[%c0_169, %c0_170] : memref<32x64xf32, #tpu.memory_space<vmem>>, vector<32x64xf32>
    %cst_171 = arith.constant dense<0.000000e+00> : vector<8x64xf32>
    %436 = tpu.matmul %434, %435, %cst_171 {dimension_numbers = #tpu.dot_dimension_numbers<[1], [0], [0], [1], [0, 0, 1, 1], [], []>} : vector<8x32xf32>, vector<32x64xf32>, vector<8x64xf32> -> vector<8x64xf32>
    %c0_172 = arith.constant 0 : index
    %c0_173 = arith.constant 0 : index
    %437 = vector.load %arg47[%c0_172, %c0_173] : memref<1x64xf32, #tpu.memory_space<vmem>>, vector<1x64xf32>
    %438 = vector.broadcast %437 : vector<1x64xf32> to vector<8x64xf32>
    %439 = arith.addf %436, %438 : vector<8x64xf32>
    %440 = vector.extract_strided_slice %439 {offsets = [0, 0], sizes = [8, 32], strides = [1, 1]} : vector<8x64xf32> to vector<8x32xf32>
    %441 = vector.extract_strided_slice %439 {offsets = [0, 32], sizes = [8, 32], strides = [1, 1]} : vector<8x64xf32> to vector<8x32xf32>
    %442 = arith.negf %441 : vector<8x32xf32>
    %443 = math.exp %442 : vector<8x32xf32>
    %cst_174 = arith.constant 1.000000e+00 : f32
    %444 = vector.broadcast %cst_174 : f32 to vector<8x32xf32>
    %445 = arith.addf %444, %443 : vector<8x32xf32>
    %446 = arith.divf %444, %445 : vector<8x32xf32>
    %447 = arith.mulf %440, %446 : vector<8x32xf32>
    %c0_175 = arith.constant 0 : index
    %c0_176 = arith.constant 0 : index
    %448 = vector.load %arg42[%c0_175, %c0_176] : memref<5x32xf32, #tpu.memory_space<vmem>>, vector<5x32xf32>
    %cst_177 = arith.constant 0.000000e+00 : f32
    %449 = vector.broadcast %cst_177 : f32 to vector<8x32xf32>
    %cst_178 = arith.constant dense<0.000000e+00> : vector<8x32xf32>
    %450 = tpu.matmul %20, %447, %cst_178 {dimension_numbers = #tpu.dot_dimension_numbers<[1], [0], [0], [1], [0, 0, 1, 1], [], []>} : vector<8x8xf32>, vector<8x32xf32>, vector<8x32xf32> -> vector<8x32xf32>
    %451 = vector.extract_strided_slice %448 {offsets = [0, 0], sizes = [1, 32], strides = [1, 1]} : vector<5x32xf32> to vector<1x32xf32>
    %452 = vector.broadcast %451 : vector<1x32xf32> to vector<8x32xf32>
    %453 = arith.mulf %450, %452 : vector<8x32xf32>
    %454 = arith.addf %449, %453 : vector<8x32xf32>
    %cst_179 = arith.constant dense<0.000000e+00> : vector<8x32xf32>
    %455 = tpu.matmul %25, %447, %cst_179 {dimension_numbers = #tpu.dot_dimension_numbers<[1], [0], [0], [1], [0, 0, 1, 1], [], []>} : vector<8x8xf32>, vector<8x32xf32>, vector<8x32xf32> -> vector<8x32xf32>
    %456 = vector.extract_strided_slice %448 {offsets = [1, 0], sizes = [1, 32], strides = [1, 1]} : vector<5x32xf32> to vector<1x32xf32>
    %457 = vector.broadcast %456 : vector<1x32xf32> to vector<8x32xf32>
    %458 = arith.mulf %455, %457 : vector<8x32xf32>
    %459 = arith.addf %454, %458 : vector<8x32xf32>
    %cst_180 = arith.constant dense<0.000000e+00> : vector<8x32xf32>
    %460 = tpu.matmul %30, %447, %cst_180 {dimension_numbers = #tpu.dot_dimension_numbers<[1], [0], [0], [1], [0, 0, 1, 1], [], []>} : vector<8x8xf32>, vector<8x32xf32>, vector<8x32xf32> -> vector<8x32xf32>
    %461 = vector.extract_strided_slice %448 {offsets = [2, 0], sizes = [1, 32], strides = [1, 1]} : vector<5x32xf32> to vector<1x32xf32>
    %462 = vector.broadcast %461 : vector<1x32xf32> to vector<8x32xf32>
    %463 = arith.mulf %460, %462 : vector<8x32xf32>
    %464 = arith.addf %459, %463 : vector<8x32xf32>
    %cst_181 = arith.constant dense<0.000000e+00> : vector<8x32xf32>
    %465 = tpu.matmul %35, %447, %cst_181 {dimension_numbers = #tpu.dot_dimension_numbers<[1], [0], [0], [1], [0, 0, 1, 1], [], []>} : vector<8x8xf32>, vector<8x32xf32>, vector<8x32xf32> -> vector<8x32xf32>
    %466 = vector.extract_strided_slice %448 {offsets = [3, 0], sizes = [1, 32], strides = [1, 1]} : vector<5x32xf32> to vector<1x32xf32>
    %467 = vector.broadcast %466 : vector<1x32xf32> to vector<8x32xf32>
    %468 = arith.mulf %465, %467 : vector<8x32xf32>
    %469 = arith.addf %464, %468 : vector<8x32xf32>
    %cst_182 = arith.constant dense<0.000000e+00> : vector<8x32xf32>
    %470 = tpu.matmul %40, %447, %cst_182 {dimension_numbers = #tpu.dot_dimension_numbers<[1], [0], [0], [1], [0, 0, 1, 1], [], []>} : vector<8x8xf32>, vector<8x32xf32>, vector<8x32xf32> -> vector<8x32xf32>
    %471 = vector.extract_strided_slice %448 {offsets = [4, 0], sizes = [1, 32], strides = [1, 1]} : vector<5x32xf32> to vector<1x32xf32>
    %472 = vector.broadcast %471 : vector<1x32xf32> to vector<8x32xf32>
    %473 = arith.mulf %470, %472 : vector<8x32xf32>
    %474 = arith.addf %469, %473 : vector<8x32xf32>
    %c0_183 = arith.constant 0 : index
    %c0_184 = arith.constant 0 : index
    %475 = vector.load %arg41[%c0_183, %c0_184] : memref<1x32xf32, #tpu.memory_space<vmem>>, vector<1x32xf32>
    %476 = vector.broadcast %475 : vector<1x32xf32> to vector<8x32xf32>
    %477 = arith.addf %474, %476 : vector<8x32xf32>
    %cst_185 = arith.constant dense<0.000000e+00> : vector<8xf32>
    %478 = vector.multi_reduction <add>, %477, %cst_185 [1] : vector<8x32xf32> to vector<8xf32>
    %479 = vector.shape_cast %478 : vector<8xf32> to vector<8x1xf32>
    %cst_186 = arith.constant dense<0.000000e+00> : vector<1xf32>
    %480 = vector.multi_reduction <add>, %479, %cst_186 [0] : vector<8x1xf32> to vector<1xf32>
    %481 = vector.shape_cast %480 : vector<1xf32> to vector<1x1xf32>
    %cst_187 = arith.constant 3.906250e-03 : f32
    %482 = vector.broadcast %cst_187 : f32 to vector<1x1xf32>
    %483 = arith.mulf %481, %482 : vector<1x1xf32>
    %484 = vector.broadcast %483 : vector<1x1xf32> to vector<8x32xf32>
    %485 = arith.subf %477, %484 : vector<8x32xf32>
    %486 = arith.mulf %485, %485 : vector<8x32xf32>
    %cst_188 = arith.constant dense<0.000000e+00> : vector<8xf32>
    %487 = vector.multi_reduction <add>, %486, %cst_188 [1] : vector<8x32xf32> to vector<8xf32>
    %488 = vector.shape_cast %487 : vector<8xf32> to vector<8x1xf32>
    %cst_189 = arith.constant dense<0.000000e+00> : vector<1xf32>
    %489 = vector.multi_reduction <add>, %488, %cst_189 [0] : vector<8x1xf32> to vector<1xf32>
    %490 = vector.shape_cast %489 : vector<1xf32> to vector<1x1xf32>
    %cst_190 = arith.constant 3.906250e-03 : f32
    %491 = vector.broadcast %cst_190 : f32 to vector<1x1xf32>
    %492 = arith.mulf %490, %491 : vector<1x1xf32>
    %cst_191 = arith.constant 9.99999974E-6 : f32
    %493 = vector.broadcast %cst_191 : f32 to vector<1x1xf32>
    %494 = arith.addf %492, %493 : vector<1x1xf32>
    %495 = math.rsqrt %494 : vector<1x1xf32>
    %496 = vector.broadcast %495 : vector<1x1xf32> to vector<8x32xf32>
    %497 = arith.mulf %485, %496 : vector<8x32xf32>
    %c0_192 = arith.constant 0 : index
    %c0_193 = arith.constant 0 : index
    %498 = vector.load %arg44[%c0_192, %c0_193] : memref<1x32xf32, #tpu.memory_space<vmem>>, vector<1x32xf32>
    %499 = vector.broadcast %498 : vector<1x32xf32> to vector<8x32xf32>
    %500 = arith.mulf %497, %499 : vector<8x32xf32>
    %c0_194 = arith.constant 0 : index
    %c0_195 = arith.constant 0 : index
    %501 = vector.load %arg43[%c0_194, %c0_195] : memref<1x32xf32, #tpu.memory_space<vmem>>, vector<1x32xf32>
    %502 = vector.broadcast %501 : vector<1x32xf32> to vector<8x32xf32>
    %503 = arith.addf %500, %502 : vector<8x32xf32>
    %504 = arith.negf %503 : vector<8x32xf32>
    %505 = math.exp %504 : vector<8x32xf32>
    %cst_196 = arith.constant 1.000000e+00 : f32
    %506 = vector.broadcast %cst_196 : f32 to vector<8x32xf32>
    %507 = arith.addf %506, %505 : vector<8x32xf32>
    %508 = arith.divf %506, %507 : vector<8x32xf32>
    %509 = arith.mulf %503, %508 : vector<8x32xf32>
    %c0_197 = arith.constant 0 : index
    %c0_198 = arith.constant 0 : index
    %510 = vector.load %arg50[%c0_197, %c0_198] : memref<32x32xf32, #tpu.memory_space<vmem>>, vector<32x32xf32>
    %cst_199 = arith.constant dense<0.000000e+00> : vector<8x32xf32>
    %511 = tpu.matmul %509, %510, %cst_199 {dimension_numbers = #tpu.dot_dimension_numbers<[1], [0], [0], [1], [0, 0, 1, 1], [], []>} : vector<8x32xf32>, vector<32x32xf32>, vector<8x32xf32> -> vector<8x32xf32>
    %c0_200 = arith.constant 0 : index
    %c0_201 = arith.constant 0 : index
    %512 = vector.load %arg49[%c0_200, %c0_201] : memref<1x32xf32, #tpu.memory_space<vmem>>, vector<1x32xf32>
    %513 = vector.broadcast %512 : vector<1x32xf32> to vector<8x32xf32>
    %514 = arith.addf %511, %513 : vector<8x32xf32>
    %515 = arith.addf %410, %514 : vector<8x32xf32>
    %c0_202 = arith.constant 0 : index
    %c0_203 = arith.constant 0 : index
    %516 = vector.load %arg36[%c0_202, %c0_203] : memref<1x32xf32, #tpu.memory_space<vmem>>, vector<1x32xf32>
    %c0_204 = arith.constant 0 : index
    %c0_205 = arith.constant 0 : index
    %517 = vector.load %arg35[%c0_204, %c0_205] : memref<1x32xf32, #tpu.memory_space<vmem>>, vector<1x32xf32>
    %cst_206 = arith.constant dense<0.000000e+00> : vector<8xf32>
    %518 = vector.multi_reduction <add>, %515, %cst_206 [1] : vector<8x32xf32> to vector<8xf32>
    %519 = vector.shape_cast %518 : vector<8xf32> to vector<8x1xf32>
    %cst_207 = arith.constant 3.200000e+01 : f32
    %520 = vector.broadcast %cst_207 : f32 to vector<8x1xf32>
    %521 = arith.divf %519, %520 : vector<8x1xf32>
    %522 = vector.broadcast %521 : vector<8x1xf32> to vector<8x32xf32>
    %523 = arith.subf %515, %522 : vector<8x32xf32>
    %524 = arith.mulf %523, %523 : vector<8x32xf32>
    %cst_208 = arith.constant dense<0.000000e+00> : vector<8xf32>
    %525 = vector.multi_reduction <add>, %524, %cst_208 [1] : vector<8x32xf32> to vector<8xf32>
    %526 = vector.shape_cast %525 : vector<8xf32> to vector<8x1xf32>
    %cst_209 = arith.constant 3.200000e+01 : f32
    %527 = vector.broadcast %cst_209 : f32 to vector<8x1xf32>
    %528 = arith.divf %526, %527 : vector<8x1xf32>
    %529 = vector.broadcast %521 : vector<8x1xf32> to vector<8x32xf32>
    %530 = arith.subf %515, %529 : vector<8x32xf32>
    %cst_210 = arith.constant 9.99999974E-6 : f32
    %531 = vector.broadcast %cst_210 : f32 to vector<8x1xf32>
    %532 = arith.addf %528, %531 : vector<8x1xf32>
    %533 = math.rsqrt %532 : vector<8x1xf32>
    %534 = vector.broadcast %533 : vector<8x1xf32> to vector<8x32xf32>
    %535 = arith.mulf %530, %534 : vector<8x32xf32>
    %536 = vector.broadcast %516 : vector<1x32xf32> to vector<8x32xf32>
    %537 = arith.mulf %535, %536 : vector<8x32xf32>
    %538 = vector.broadcast %517 : vector<1x32xf32> to vector<8x32xf32>
    %539 = arith.addf %537, %538 : vector<8x32xf32>
    %c0_211 = arith.constant 0 : index
    %c0_212 = arith.constant 0 : index
    %540 = vector.load %arg40[%c0_211, %c0_212] : memref<32x96xf32, #tpu.memory_space<vmem>>, vector<32x96xf32>
    %cst_213 = arith.constant dense<0.000000e+00> : vector<8x96xf32>
    %541 = tpu.matmul %539, %540, %cst_213 {dimension_numbers = #tpu.dot_dimension_numbers<[1], [0], [0], [1], [0, 0, 1, 1], [], []>} : vector<8x32xf32>, vector<32x96xf32>, vector<8x96xf32> -> vector<8x96xf32>
    %c0_214 = arith.constant 0 : index
    %c0_215 = arith.constant 0 : index
    %542 = vector.load %arg39[%c0_214, %c0_215] : memref<1x96xf32, #tpu.memory_space<vmem>>, vector<1x96xf32>
    %543 = vector.broadcast %542 : vector<1x96xf32> to vector<8x96xf32>
    %544 = arith.addf %541, %543 : vector<8x96xf32>
    %545 = vector.extract_strided_slice %544 {offsets = [0, 0], sizes = [8, 8], strides = [1, 1]} : vector<8x96xf32> to vector<8x8xf32>
    %546 = vector.extract_strided_slice %544 {offsets = [0, 32], sizes = [8, 8], strides = [1, 1]} : vector<8x96xf32> to vector<8x8xf32>
    %547 = vector.extract_strided_slice %544 {offsets = [0, 64], sizes = [8, 8], strides = [1, 1]} : vector<8x96xf32> to vector<8x8xf32>
    %cst_216 = arith.constant dense<0.000000e+00> : vector<8x8xf32>
    %548 = tpu.matmul %545, %546, %cst_216 {dimension_numbers = #tpu.dot_dimension_numbers<[1], [1], [0], [0], [0, 0, 1, 0], [], []>} : vector<8x8xf32>, vector<8x8xf32>, vector<8x8xf32> -> vector<8x8xf32>
    %cst_217 = arith.constant 0.353553385 : f32
    %549 = vector.broadcast %cst_217 : f32 to vector<8x8xf32>
    %550 = arith.mulf %548, %549 : vector<8x8xf32>
    %551 = vector.broadcast %13 : vector<1x8xf32> to vector<8x8xf32>
    %552 = arith.addf %550, %551 : vector<8x8xf32>
    %cst_218 = arith.constant dense<0xFF800000> : vector<8xf32>
    %553 = vector.multi_reduction <maximumf>, %552, %cst_218 [1] : vector<8x8xf32> to vector<8xf32>
    %554 = vector.shape_cast %553 : vector<8xf32> to vector<8x1xf32>
    %555 = vector.broadcast %554 : vector<8x1xf32> to vector<8x8xf32>
    %556 = arith.subf %552, %555 : vector<8x8xf32>
    %557 = math.exp %556 : vector<8x8xf32>
    %cst_219 = arith.constant dense<0.000000e+00> : vector<8xf32>
    %558 = vector.multi_reduction <add>, %557, %cst_219 [1] : vector<8x8xf32> to vector<8xf32>
    %559 = vector.shape_cast %558 : vector<8xf32> to vector<8x1xf32>
    %560 = tpu.reciprocal %559 {approx = true} : vector<8x1xf32> -> vector<8x1xf32>
    %561 = vector.broadcast %560 : vector<8x1xf32> to vector<8x8xf32>
    %562 = arith.mulf %557, %561 : vector<8x8xf32>
    %cst_220 = arith.constant dense<0.000000e+00> : vector<8x8xf32>
    %563 = tpu.matmul %562, %547, %cst_220 {dimension_numbers = #tpu.dot_dimension_numbers<[1], [0], [0], [1], [0, 0, 1, 1], [], []>} : vector<8x8xf32>, vector<8x8xf32>, vector<8x8xf32> -> vector<8x8xf32>
    %564 = vector.extract_strided_slice %544 {offsets = [0, 8], sizes = [8, 8], strides = [1, 1]} : vector<8x96xf32> to vector<8x8xf32>
    %565 = vector.extract_strided_slice %544 {offsets = [0, 40], sizes = [8, 8], strides = [1, 1]} : vector<8x96xf32> to vector<8x8xf32>
    %566 = vector.extract_strided_slice %544 {offsets = [0, 72], sizes = [8, 8], strides = [1, 1]} : vector<8x96xf32> to vector<8x8xf32>
    %cst_221 = arith.constant dense<0.000000e+00> : vector<8x8xf32>
    %567 = tpu.matmul %564, %565, %cst_221 {dimension_numbers = #tpu.dot_dimension_numbers<[1], [1], [0], [0], [0, 0, 1, 0], [], []>} : vector<8x8xf32>, vector<8x8xf32>, vector<8x8xf32> -> vector<8x8xf32>
    %cst_222 = arith.constant 0.353553385 : f32
    %568 = vector.broadcast %cst_222 : f32 to vector<8x8xf32>
    %569 = arith.mulf %567, %568 : vector<8x8xf32>
    %570 = vector.broadcast %13 : vector<1x8xf32> to vector<8x8xf32>
    %571 = arith.addf %569, %570 : vector<8x8xf32>
    %cst_223 = arith.constant dense<0xFF800000> : vector<8xf32>
    %572 = vector.multi_reduction <maximumf>, %571, %cst_223 [1] : vector<8x8xf32> to vector<8xf32>
    %573 = vector.shape_cast %572 : vector<8xf32> to vector<8x1xf32>
    %574 = vector.broadcast %573 : vector<8x1xf32> to vector<8x8xf32>
    %575 = arith.subf %571, %574 : vector<8x8xf32>
    %576 = math.exp %575 : vector<8x8xf32>
    %cst_224 = arith.constant dense<0.000000e+00> : vector<8xf32>
    %577 = vector.multi_reduction <add>, %576, %cst_224 [1] : vector<8x8xf32> to vector<8xf32>
    %578 = vector.shape_cast %577 : vector<8xf32> to vector<8x1xf32>
    %579 = tpu.reciprocal %578 {approx = true} : vector<8x1xf32> -> vector<8x1xf32>
    %580 = vector.broadcast %579 : vector<8x1xf32> to vector<8x8xf32>
    %581 = arith.mulf %576, %580 : vector<8x8xf32>
    %cst_225 = arith.constant dense<0.000000e+00> : vector<8x8xf32>
    %582 = tpu.matmul %581, %566, %cst_225 {dimension_numbers = #tpu.dot_dimension_numbers<[1], [0], [0], [1], [0, 0, 1, 1], [], []>} : vector<8x8xf32>, vector<8x8xf32>, vector<8x8xf32> -> vector<8x8xf32>
    %583 = vector.extract_strided_slice %544 {offsets = [0, 16], sizes = [8, 8], strides = [1, 1]} : vector<8x96xf32> to vector<8x8xf32>
    %584 = vector.extract_strided_slice %544 {offsets = [0, 48], sizes = [8, 8], strides = [1, 1]} : vector<8x96xf32> to vector<8x8xf32>
    %585 = vector.extract_strided_slice %544 {offsets = [0, 80], sizes = [8, 8], strides = [1, 1]} : vector<8x96xf32> to vector<8x8xf32>
    %cst_226 = arith.constant dense<0.000000e+00> : vector<8x8xf32>
    %586 = tpu.matmul %583, %584, %cst_226 {dimension_numbers = #tpu.dot_dimension_numbers<[1], [1], [0], [0], [0, 0, 1, 0], [], []>} : vector<8x8xf32>, vector<8x8xf32>, vector<8x8xf32> -> vector<8x8xf32>
    %cst_227 = arith.constant 0.353553385 : f32
    %587 = vector.broadcast %cst_227 : f32 to vector<8x8xf32>
    %588 = arith.mulf %586, %587 : vector<8x8xf32>
    %589 = vector.broadcast %13 : vector<1x8xf32> to vector<8x8xf32>
    %590 = arith.addf %588, %589 : vector<8x8xf32>
    %cst_228 = arith.constant dense<0xFF800000> : vector<8xf32>
    %591 = vector.multi_reduction <maximumf>, %590, %cst_228 [1] : vector<8x8xf32> to vector<8xf32>
    %592 = vector.shape_cast %591 : vector<8xf32> to vector<8x1xf32>
    %593 = vector.broadcast %592 : vector<8x1xf32> to vector<8x8xf32>
    %594 = arith.subf %590, %593 : vector<8x8xf32>
    %595 = math.exp %594 : vector<8x8xf32>
    %cst_229 = arith.constant dense<0.000000e+00> : vector<8xf32>
    %596 = vector.multi_reduction <add>, %595, %cst_229 [1] : vector<8x8xf32> to vector<8xf32>
    %597 = vector.shape_cast %596 : vector<8xf32> to vector<8x1xf32>
    %598 = tpu.reciprocal %597 {approx = true} : vector<8x1xf32> -> vector<8x1xf32>
    %599 = vector.broadcast %598 : vector<8x1xf32> to vector<8x8xf32>
    %600 = arith.mulf %595, %599 : vector<8x8xf32>
    %cst_230 = arith.constant dense<0.000000e+00> : vector<8x8xf32>
    %601 = tpu.matmul %600, %585, %cst_230 {dimension_numbers = #tpu.dot_dimension_numbers<[1], [0], [0], [1], [0, 0, 1, 1], [], []>} : vector<8x8xf32>, vector<8x8xf32>, vector<8x8xf32> -> vector<8x8xf32>
    %602 = vector.extract_strided_slice %544 {offsets = [0, 24], sizes = [8, 8], strides = [1, 1]} : vector<8x96xf32> to vector<8x8xf32>
    %603 = vector.extract_strided_slice %544 {offsets = [0, 56], sizes = [8, 8], strides = [1, 1]} : vector<8x96xf32> to vector<8x8xf32>
    %604 = vector.extract_strided_slice %544 {offsets = [0, 88], sizes = [8, 8], strides = [1, 1]} : vector<8x96xf32> to vector<8x8xf32>
    %cst_231 = arith.constant dense<0.000000e+00> : vector<8x8xf32>
    %605 = tpu.matmul %602, %603, %cst_231 {dimension_numbers = #tpu.dot_dimension_numbers<[1], [1], [0], [0], [0, 0, 1, 0], [], []>} : vector<8x8xf32>, vector<8x8xf32>, vector<8x8xf32> -> vector<8x8xf32>
    %cst_232 = arith.constant 0.353553385 : f32
    %606 = vector.broadcast %cst_232 : f32 to vector<8x8xf32>
    %607 = arith.mulf %605, %606 : vector<8x8xf32>
    %608 = vector.broadcast %13 : vector<1x8xf32> to vector<8x8xf32>
    %609 = arith.addf %607, %608 : vector<8x8xf32>
    %cst_233 = arith.constant dense<0xFF800000> : vector<8xf32>
    %610 = vector.multi_reduction <maximumf>, %609, %cst_233 [1] : vector<8x8xf32> to vector<8xf32>
    %611 = vector.shape_cast %610 : vector<8xf32> to vector<8x1xf32>
    %612 = vector.broadcast %611 : vector<8x1xf32> to vector<8x8xf32>
    %613 = arith.subf %609, %612 : vector<8x8xf32>
    %614 = math.exp %613 : vector<8x8xf32>
    %cst_234 = arith.constant dense<0.000000e+00> : vector<8xf32>
    %615 = vector.multi_reduction <add>, %614, %cst_234 [1] : vector<8x8xf32> to vector<8xf32>
    %616 = vector.shape_cast %615 : vector<8xf32> to vector<8x1xf32>
    %617 = tpu.reciprocal %616 {approx = true} : vector<8x1xf32> -> vector<8x1xf32>
    %618 = vector.broadcast %617 : vector<8x1xf32> to vector<8x8xf32>
    %619 = arith.mulf %614, %618 : vector<8x8xf32>
    %cst_235 = arith.constant dense<0.000000e+00> : vector<8x8xf32>
    %620 = tpu.matmul %619, %604, %cst_235 {dimension_numbers = #tpu.dot_dimension_numbers<[1], [0], [0], [1], [0, 0, 1, 1], [], []>} : vector<8x8xf32>, vector<8x8xf32>, vector<8x8xf32> -> vector<8x8xf32>
    %621 = tpu.concatenate %563, %582, %601, %620 in 1 : vector<8x8xf32>, vector<8x8xf32>, vector<8x8xf32>, vector<8x8xf32> -> vector<8x32xf32>
    %c0_236 = arith.constant 0 : index
    %c0_237 = arith.constant 0 : index
    %622 = vector.load %arg38[%c0_236, %c0_237] : memref<32x32xf32, #tpu.memory_space<vmem>>, vector<32x32xf32>
    %cst_238 = arith.constant dense<0.000000e+00> : vector<8x32xf32>
    %623 = tpu.matmul %621, %622, %cst_238 {dimension_numbers = #tpu.dot_dimension_numbers<[1], [0], [0], [1], [0, 0, 1, 1], [], []>} : vector<8x32xf32>, vector<32x32xf32>, vector<8x32xf32> -> vector<8x32xf32>
    %c0_239 = arith.constant 0 : index
    %c0_240 = arith.constant 0 : index
    %624 = vector.load %arg37[%c0_239, %c0_240] : memref<1x32xf32, #tpu.memory_space<vmem>>, vector<1x32xf32>
    %625 = vector.broadcast %624 : vector<1x32xf32> to vector<8x32xf32>
    %626 = arith.addf %623, %625 : vector<8x32xf32>
    %627 = arith.addf %515, %626 : vector<8x32xf32>
    %c0_241 = arith.constant 0 : index
    %c0_242 = arith.constant 0 : index
    %628 = vector.load %arg60[%c0_241, %c0_242] : memref<1x32xf32, #tpu.memory_space<vmem>>, vector<1x32xf32>
    %c0_243 = arith.constant 0 : index
    %c0_244 = arith.constant 0 : index
    %629 = vector.load %arg59[%c0_243, %c0_244] : memref<1x32xf32, #tpu.memory_space<vmem>>, vector<1x32xf32>
    %cst_245 = arith.constant dense<0.000000e+00> : vector<8xf32>
    %630 = vector.multi_reduction <add>, %627, %cst_245 [1] : vector<8x32xf32> to vector<8xf32>
    %631 = vector.shape_cast %630 : vector<8xf32> to vector<8x1xf32>
    %cst_246 = arith.constant 3.200000e+01 : f32
    %632 = vector.broadcast %cst_246 : f32 to vector<8x1xf32>
    %633 = arith.divf %631, %632 : vector<8x1xf32>
    %634 = vector.broadcast %633 : vector<8x1xf32> to vector<8x32xf32>
    %635 = arith.subf %627, %634 : vector<8x32xf32>
    %636 = arith.mulf %635, %635 : vector<8x32xf32>
    %cst_247 = arith.constant dense<0.000000e+00> : vector<8xf32>
    %637 = vector.multi_reduction <add>, %636, %cst_247 [1] : vector<8x32xf32> to vector<8xf32>
    %638 = vector.shape_cast %637 : vector<8xf32> to vector<8x1xf32>
    %cst_248 = arith.constant 3.200000e+01 : f32
    %639 = vector.broadcast %cst_248 : f32 to vector<8x1xf32>
    %640 = arith.divf %638, %639 : vector<8x1xf32>
    %641 = vector.broadcast %633 : vector<8x1xf32> to vector<8x32xf32>
    %642 = arith.subf %627, %641 : vector<8x32xf32>
    %cst_249 = arith.constant 9.99999974E-6 : f32
    %643 = vector.broadcast %cst_249 : f32 to vector<8x1xf32>
    %644 = arith.addf %640, %643 : vector<8x1xf32>
    %645 = math.rsqrt %644 : vector<8x1xf32>
    %646 = vector.broadcast %645 : vector<8x1xf32> to vector<8x32xf32>
    %647 = arith.mulf %642, %646 : vector<8x32xf32>
    %648 = vector.broadcast %628 : vector<1x32xf32> to vector<8x32xf32>
    %649 = arith.mulf %647, %648 : vector<8x32xf32>
    %650 = vector.broadcast %629 : vector<1x32xf32> to vector<8x32xf32>
    %651 = arith.addf %649, %650 : vector<8x32xf32>
    %c0_250 = arith.constant 0 : index
    %c0_251 = arith.constant 0 : index
    %652 = vector.load %arg61[%c0_250, %c0_251] : memref<32x64xf32, #tpu.memory_space<vmem>>, vector<32x64xf32>
    %cst_252 = arith.constant dense<0.000000e+00> : vector<8x64xf32>
    %653 = tpu.matmul %651, %652, %cst_252 {dimension_numbers = #tpu.dot_dimension_numbers<[1], [0], [0], [1], [0, 0, 1, 1], [], []>} : vector<8x32xf32>, vector<32x64xf32>, vector<8x64xf32> -> vector<8x64xf32>
    %c0_253 = arith.constant 0 : index
    %c0_254 = arith.constant 0 : index
    %654 = vector.load %arg57[%c0_253, %c0_254] : memref<1x64xf32, #tpu.memory_space<vmem>>, vector<1x64xf32>
    %655 = vector.broadcast %654 : vector<1x64xf32> to vector<8x64xf32>
    %656 = arith.addf %653, %655 : vector<8x64xf32>
    %657 = arith.negf %656 : vector<8x64xf32>
    %658 = math.exp %657 : vector<8x64xf32>
    %cst_255 = arith.constant 1.000000e+00 : f32
    %659 = vector.broadcast %cst_255 : f32 to vector<8x64xf32>
    %660 = arith.addf %659, %658 : vector<8x64xf32>
    %661 = arith.divf %659, %660 : vector<8x64xf32>
    %662 = arith.mulf %656, %661 : vector<8x64xf32>
    %c0_256 = arith.constant 0 : index
    %c0_257 = arith.constant 0 : index
    %663 = vector.load %arg62[%c0_256, %c0_257] : memref<64x32xf32, #tpu.memory_space<vmem>>, vector<64x32xf32>
    %cst_258 = arith.constant dense<0.000000e+00> : vector<8x32xf32>
    %664 = tpu.matmul %662, %663, %cst_258 {dimension_numbers = #tpu.dot_dimension_numbers<[1], [0], [0], [1], [0, 0, 1, 1], [], []>} : vector<8x64xf32>, vector<64x32xf32>, vector<8x32xf32> -> vector<8x32xf32>
    %c0_259 = arith.constant 0 : index
    %c0_260 = arith.constant 0 : index
    %665 = vector.load %arg58[%c0_259, %c0_260] : memref<1x32xf32, #tpu.memory_space<vmem>>, vector<1x32xf32>
    %666 = vector.broadcast %665 : vector<1x32xf32> to vector<8x32xf32>
    %667 = arith.addf %664, %666 : vector<8x32xf32>
    %cst_261 = arith.constant 5.000000e-01 : f32
    %668 = vector.broadcast %cst_261 : f32 to vector<8x32xf32>
    %669 = arith.mulf %668, %667 : vector<8x32xf32>
    %670 = arith.addf %627, %669 : vector<8x32xf32>
    %c0_262 = arith.constant 0 : index
    %c0_263 = arith.constant 0 : index
    %671 = vector.load %arg64[%c0_262, %c0_263] : memref<1x32xf32, #tpu.memory_space<vmem>>, vector<1x32xf32>
    %c0_264 = arith.constant 0 : index
    %c0_265 = arith.constant 0 : index
    %672 = vector.load %arg63[%c0_264, %c0_265] : memref<1x32xf32, #tpu.memory_space<vmem>>, vector<1x32xf32>
    %cst_266 = arith.constant dense<0.000000e+00> : vector<8xf32>
    %673 = vector.multi_reduction <add>, %670, %cst_266 [1] : vector<8x32xf32> to vector<8xf32>
    %674 = vector.shape_cast %673 : vector<8xf32> to vector<8x1xf32>
    %cst_267 = arith.constant 3.200000e+01 : f32
    %675 = vector.broadcast %cst_267 : f32 to vector<8x1xf32>
    %676 = arith.divf %674, %675 : vector<8x1xf32>
    %677 = vector.broadcast %676 : vector<8x1xf32> to vector<8x32xf32>
    %678 = arith.subf %670, %677 : vector<8x32xf32>
    %679 = arith.mulf %678, %678 : vector<8x32xf32>
    %cst_268 = arith.constant dense<0.000000e+00> : vector<8xf32>
    %680 = vector.multi_reduction <add>, %679, %cst_268 [1] : vector<8x32xf32> to vector<8xf32>
    %681 = vector.shape_cast %680 : vector<8xf32> to vector<8x1xf32>
    %cst_269 = arith.constant 3.200000e+01 : f32
    %682 = vector.broadcast %cst_269 : f32 to vector<8x1xf32>
    %683 = arith.divf %681, %682 : vector<8x1xf32>
    %684 = vector.broadcast %676 : vector<8x1xf32> to vector<8x32xf32>
    %685 = arith.subf %670, %684 : vector<8x32xf32>
    %cst_270 = arith.constant 9.99999974E-6 : f32
    %686 = vector.broadcast %cst_270 : f32 to vector<8x1xf32>
    %687 = arith.addf %683, %686 : vector<8x1xf32>
    %688 = math.rsqrt %687 : vector<8x1xf32>
    %689 = vector.broadcast %688 : vector<8x1xf32> to vector<8x32xf32>
    %690 = arith.mulf %685, %689 : vector<8x32xf32>
    %691 = vector.broadcast %671 : vector<1x32xf32> to vector<8x32xf32>
    %692 = arith.mulf %690, %691 : vector<8x32xf32>
    %693 = vector.broadcast %672 : vector<1x32xf32> to vector<8x32xf32>
    %694 = arith.addf %692, %693 : vector<8x32xf32>
    %c0_271 = arith.constant 0 : index
    %c0_272 = arith.constant 0 : index
    %695 = vector.load %arg68[%c0_271, %c0_272] : memref<32x24xf32, #tpu.memory_space<vmem>>, vector<32x24xf32>
    %cst_273 = arith.constant dense<0.000000e+00> : vector<8x24xf32>
    %696 = tpu.matmul %694, %695, %cst_273 {dimension_numbers = #tpu.dot_dimension_numbers<[1], [0], [0], [1], [0, 0, 1, 1], [], []>} : vector<8x32xf32>, vector<32x24xf32>, vector<8x24xf32> -> vector<8x24xf32>
    %c0_274 = arith.constant 0 : index
    %c0_275 = arith.constant 0 : index
    %697 = vector.load %arg67[%c0_274, %c0_275] : memref<1x24xf32, #tpu.memory_space<vmem>>, vector<1x24xf32>
    %698 = vector.broadcast %697 : vector<1x24xf32> to vector<8x24xf32>
    %699 = arith.addf %696, %698 : vector<8x24xf32>
    %c0_276 = arith.constant 0 : index
    %c0_277 = arith.constant 0 : index
    %700 = vector.load %arg66[%c0_276, %c0_277] : memref<1x24xf32, #tpu.memory_space<vmem>>, vector<1x24xf32>
    %c0_278 = arith.constant 0 : index
    %c0_279 = arith.constant 0 : index
    %701 = vector.load %arg65[%c0_278, %c0_279] : memref<1x24xf32, #tpu.memory_space<vmem>>, vector<1x24xf32>
    %cst_280 = arith.constant dense<0.000000e+00> : vector<8xf32>
    %702 = vector.multi_reduction <add>, %699, %cst_280 [1] : vector<8x24xf32> to vector<8xf32>
    %703 = vector.shape_cast %702 : vector<8xf32> to vector<8x1xf32>
    %cst_281 = arith.constant 2.400000e+01 : f32
    %704 = vector.broadcast %cst_281 : f32 to vector<8x1xf32>
    %705 = arith.divf %703, %704 : vector<8x1xf32>
    %706 = vector.broadcast %705 : vector<8x1xf32> to vector<8x24xf32>
    %707 = arith.subf %699, %706 : vector<8x24xf32>
    %708 = arith.mulf %707, %707 : vector<8x24xf32>
    %cst_282 = arith.constant dense<0.000000e+00> : vector<8xf32>
    %709 = vector.multi_reduction <add>, %708, %cst_282 [1] : vector<8x24xf32> to vector<8xf32>
    %710 = vector.shape_cast %709 : vector<8xf32> to vector<8x1xf32>
    %cst_283 = arith.constant 2.400000e+01 : f32
    %711 = vector.broadcast %cst_283 : f32 to vector<8x1xf32>
    %712 = arith.divf %710, %711 : vector<8x1xf32>
    %713 = vector.broadcast %705 : vector<8x1xf32> to vector<8x24xf32>
    %714 = arith.subf %699, %713 : vector<8x24xf32>
    %cst_284 = arith.constant 9.99999974E-6 : f32
    %715 = vector.broadcast %cst_284 : f32 to vector<8x1xf32>
    %716 = arith.addf %712, %715 : vector<8x1xf32>
    %717 = math.rsqrt %716 : vector<8x1xf32>
    %718 = vector.broadcast %717 : vector<8x1xf32> to vector<8x24xf32>
    %719 = arith.mulf %714, %718 : vector<8x24xf32>
    %720 = vector.broadcast %700 : vector<1x24xf32> to vector<8x24xf32>
    %721 = arith.mulf %719, %720 : vector<8x24xf32>
    %722 = vector.broadcast %701 : vector<1x24xf32> to vector<8x24xf32>
    %723 = arith.addf %721, %722 : vector<8x24xf32>
    %c0_285 = arith.constant 0 : index
    %c0_286 = arith.constant 0 : index
    %724 = vector.load %arg69[%c0_285, %c0_286] : memref<8x24xf32, #tpu.memory_space<vmem>>, vector<8x24xf32>
    tpu.vector_store %arg69[%c0_285, %c0_286], %723 {strides = array<i32>} : memref<8x24xf32, #tpu.memory_space<vmem>>, vector<8x24xf32>,
    return
  }
  func.func @transform_0(%arg0: i32, %arg1: memref<2xi32, #tpu.memory_space<smem>>) -> (i32, i32) {
    %c0_i32 = arith.constant 0 : i32
    %c0_i32_0 = arith.constant 0 : i32
    return %arg0, %c0_i32 : i32, i32
  }
  func.func @transform_1(%arg0: i32, %arg1: memref<2xi32, #tpu.memory_space<smem>>) -> (i32, i32) {
    %c0_i32 = arith.constant 0 : i32
    %c0_i32_0 = arith.constant 0 : i32
    %c0_i32_1 = arith.constant 0 : i32
    return %c0_i32, %c0_i32_0 : i32, i32
  }
  func.func @transform_2(%arg0: i32, %arg1: memref<2xi32, #tpu.memory_space<smem>>) -> (i32, i32) {
    %c0_i32 = arith.constant 0 : i32
    %c0_i32_0 = arith.constant 0 : i32
    %c0_i32_1 = arith.constant 0 : i32
    return %c0_i32, %c0_i32_0 : i32, i32
  }
  func.func @transform_3(%arg0: i32, %arg1: memref<2xi32, #tpu.memory_space<smem>>) -> (i32, i32) {
    %c0_i32 = arith.constant 0 : i32
    %c0_i32_0 = arith.constant 0 : i32
    %c0_i32_1 = arith.constant 0 : i32
    return %c0_i32, %c0_i32_0 : i32, i32
  }
  func.func @transform_4(%arg0: i32, %arg1: memref<2xi32, #tpu.memory_space<smem>>) -> (i32, i32) {
    %c0_i32 = arith.constant 0 : i32
    %c0_i32_0 = arith.constant 0 : i32
    %c0_i32_1 = arith.constant 0 : i32
    return %c0_i32, %c0_i32_0 : i32, i32
  }
  func.func @transform_5(%arg0: i32, %arg1: memref<2xi32, #tpu.memory_space<smem>>) -> (i32, i32) {
    %c0_i32 = arith.constant 0 : i32
    %c0_i32_0 = arith.constant 0 : i32
    %c0_i32_1 = arith.constant 0 : i32
    return %c0_i32, %c0_i32_0 : i32, i32
  }
  func.func @transform_6(%arg0: i32, %arg1: memref<2xi32, #tpu.memory_space<smem>>) -> (i32, i32) {
    %c0_i32 = arith.constant 0 : i32
    %c0_i32_0 = arith.constant 0 : i32
    %c0_i32_1 = arith.constant 0 : i32
    return %c0_i32, %c0_i32_0 : i32, i32
  }
  func.func @transform_7(%arg0: i32, %arg1: memref<2xi32, #tpu.memory_space<smem>>) -> (i32, i32) {
    %c0_i32 = arith.constant 0 : i32
    %c0_i32_0 = arith.constant 0 : i32
    %c0_i32_1 = arith.constant 0 : i32
    return %c0_i32, %c0_i32_0 : i32, i32
  }
  func.func @transform_8(%arg0: i32, %arg1: memref<2xi32, #tpu.memory_space<smem>>) -> (i32, i32) {
    %c0_i32 = arith.constant 0 : i32
    %c0_i32_0 = arith.constant 0 : i32
    %c0_i32_1 = arith.constant 0 : i32
    return %c0_i32, %c0_i32_0 : i32, i32
  }
  func.func @transform_9(%arg0: i32, %arg1: memref<2xi32, #tpu.memory_space<smem>>) -> (i32, i32) {
    %c0_i32 = arith.constant 0 : i32
    %c0_i32_0 = arith.constant 0 : i32
    %c0_i32_1 = arith.constant 0 : i32
    return %c0_i32, %c0_i32_0 : i32, i32
  }
  func.func @transform_10(%arg0: i32, %arg1: memref<2xi32, #tpu.memory_space<smem>>) -> (i32, i32) {
    %c0_i32 = arith.constant 0 : i32
    %c0_i32_0 = arith.constant 0 : i32
    %c0_i32_1 = arith.constant 0 : i32
    return %c0_i32, %c0_i32_0 : i32, i32
  }
  func.func @transform_11(%arg0: i32, %arg1: memref<2xi32, #tpu.memory_space<smem>>) -> (i32, i32) {
    %c0_i32 = arith.constant 0 : i32
    %c0_i32_0 = arith.constant 0 : i32
    %c0_i32_1 = arith.constant 0 : i32
    return %c0_i32, %c0_i32_0 : i32, i32
  }
  func.func @transform_12(%arg0: i32, %arg1: memref<2xi32, #tpu.memory_space<smem>>) -> (i32, i32) {
    %c0_i32 = arith.constant 0 : i32
    %c0_i32_0 = arith.constant 0 : i32
    %c0_i32_1 = arith.constant 0 : i32
    return %c0_i32, %c0_i32_0 : i32, i32
  }
  func.func @transform_13(%arg0: i32, %arg1: memref<2xi32, #tpu.memory_space<smem>>) -> (i32, i32) {
    %c0_i32 = arith.constant 0 : i32
    %c0_i32_0 = arith.constant 0 : i32
    %c0_i32_1 = arith.constant 0 : i32
    return %c0_i32, %c0_i32_0 : i32, i32
  }
  func.func @transform_14(%arg0: i32, %arg1: memref<2xi32, #tpu.memory_space<smem>>) -> (i32, i32) {
    %c0_i32 = arith.constant 0 : i32
    %c0_i32_0 = arith.constant 0 : i32
    %c0_i32_1 = arith.constant 0 : i32
    return %c0_i32, %c0_i32_0 : i32, i32
  }
  func.func @transform_15(%arg0: i32, %arg1: memref<2xi32, #tpu.memory_space<smem>>) -> (i32, i32) {
    %c0_i32 = arith.constant 0 : i32
    %c0_i32_0 = arith.constant 0 : i32
    %c0_i32_1 = arith.constant 0 : i32
    return %c0_i32, %c0_i32_0 : i32, i32
  }
  func.func @transform_16(%arg0: i32, %arg1: memref<2xi32, #tpu.memory_space<smem>>) -> (i32, i32) {
    %c0_i32 = arith.constant 0 : i32
    %c0_i32_0 = arith.constant 0 : i32
    %c0_i32_1 = arith.constant 0 : i32
    return %c0_i32, %c0_i32_0 : i32, i32
  }
  func.func @transform_17(%arg0: i32, %arg1: memref<2xi32, #tpu.memory_space<smem>>) -> (i32, i32) {
    %c0_i32 = arith.constant 0 : i32
    %c0_i32_0 = arith.constant 0 : i32
    %c0_i32_1 = arith.constant 0 : i32
    return %c0_i32, %c0_i32_0 : i32, i32
  }
  func.func @transform_18(%arg0: i32, %arg1: memref<2xi32, #tpu.memory_space<smem>>) -> (i32, i32) {
    %c0_i32 = arith.constant 0 : i32
    %c0_i32_0 = arith.constant 0 : i32
    %c0_i32_1 = arith.constant 0 : i32
    return %c0_i32, %c0_i32_0 : i32, i32
  }
  func.func @transform_19(%arg0: i32, %arg1: memref<2xi32, #tpu.memory_space<smem>>) -> (i32, i32) {
    %c0_i32 = arith.constant 0 : i32
    %c0_i32_0 = arith.constant 0 : i32
    %c0_i32_1 = arith.constant 0 : i32
    return %c0_i32, %c0_i32_0 : i32, i32
  }
  func.func @transform_20(%arg0: i32, %arg1: memref<2xi32, #tpu.memory_space<smem>>) -> (i32, i32) {
    %c0_i32 = arith.constant 0 : i32
    %c0_i32_0 = arith.constant 0 : i32
    %c0_i32_1 = arith.constant 0 : i32
    return %c0_i32, %c0_i32_0 : i32, i32
  }
  func.func @transform_21(%arg0: i32, %arg1: memref<2xi32, #tpu.memory_space<smem>>) -> (i32, i32) {
    %c0_i32 = arith.constant 0 : i32
    %c0_i32_0 = arith.constant 0 : i32
    %c0_i32_1 = arith.constant 0 : i32
    return %c0_i32, %c0_i32_0 : i32, i32
  }
  func.func @transform_22(%arg0: i32, %arg1: memref<2xi32, #tpu.memory_space<smem>>) -> (i32, i32) {
    %c0_i32 = arith.constant 0 : i32
    %c0_i32_0 = arith.constant 0 : i32
    %c0_i32_1 = arith.constant 0 : i32
    return %c0_i32, %c0_i32_0 : i32, i32
  }
  func.func @transform_23(%arg0: i32, %arg1: memref<2xi32, #tpu.memory_space<smem>>) -> (i32, i32) {
    %c0_i32 = arith.constant 0 : i32
    %c0_i32_0 = arith.constant 0 : i32
    %c0_i32_1 = arith.constant 0 : i32
    return %c0_i32, %c0_i32_0 : i32, i32
  }
  func.func @transform_24(%arg0: i32, %arg1: memref<2xi32, #tpu.memory_space<smem>>) -> (i32, i32) {
    %c0_i32 = arith.constant 0 : i32
    %c0_i32_0 = arith.constant 0 : i32
    %c0_i32_1 = arith.constant 0 : i32
    return %c0_i32, %c0_i32_0 : i32, i32
  }
  func.func @transform_25(%arg0: i32, %arg1: memref<2xi32, #tpu.memory_space<smem>>) -> (i32, i32) {
    %c0_i32 = arith.constant 0 : i32
    %c0_i32_0 = arith.constant 0 : i32
    %c0_i32_1 = arith.constant 0 : i32
    return %c0_i32, %c0_i32_0 : i32, i32
  }
  func.func @transform_26(%arg0: i32, %arg1: memref<2xi32, #tpu.memory_space<smem>>) -> (i32, i32) {
    %c0_i32 = arith.constant 0 : i32
    %c0_i32_0 = arith.constant 0 : i32
    %c0_i32_1 = arith.constant 0 : i32
    return %c0_i32, %c0_i32_0 : i32, i32
  }
  func.func @transform_27(%arg0: i32, %arg1: memref<2xi32, #tpu.memory_space<smem>>) -> (i32, i32) {
    %c0_i32 = arith.constant 0 : i32
    %c0_i32_0 = arith.constant 0 : i32
    %c0_i32_1 = arith.constant 0 : i32
    return %c0_i32, %c0_i32_0 : i32, i32
  }
  func.func @transform_28(%arg0: i32, %arg1: memref<2xi32, #tpu.memory_space<smem>>) -> (i32, i32) {
    %c0_i32 = arith.constant 0 : i32
    %c0_i32_0 = arith.constant 0 : i32
    %c0_i32_1 = arith.constant 0 : i32
    return %c0_i32, %c0_i32_0 : i32, i32
  }
  func.func @transform_29(%arg0: i32, %arg1: memref<2xi32, #tpu.memory_space<smem>>) -> (i32, i32) {
    %c0_i32 = arith.constant 0 : i32
    %c0_i32_0 = arith.constant 0 : i32
    %c0_i32_1 = arith.constant 0 : i32
    return %c0_i32, %c0_i32_0 : i32, i32
  }
  func.func @transform_30(%arg0: i32, %arg1: memref<2xi32, #tpu.memory_space<smem>>) -> (i32, i32) {
    %c0_i32 = arith.constant 0 : i32
    %c0_i32_0 = arith.constant 0 : i32
    %c0_i32_1 = arith.constant 0 : i32
    return %c0_i32, %c0_i32_0 : i32, i32
  }
  func.func @transform_31(%arg0: i32, %arg1: memref<2xi32, #tpu.memory_space<smem>>) -> (i32, i32) {
    %c0_i32 = arith.constant 0 : i32
    %c0_i32_0 = arith.constant 0 : i32
    %c0_i32_1 = arith.constant 0 : i32
    return %c0_i32, %c0_i32_0 : i32, i32
  }
  func.func @transform_32(%arg0: i32, %arg1: memref<2xi32, #tpu.memory_space<smem>>) -> (i32, i32) {
    %c0_i32 = arith.constant 0 : i32
    %c0_i32_0 = arith.constant 0 : i32
    %c0_i32_1 = arith.constant 0 : i32
    return %c0_i32, %c0_i32_0 : i32, i32
  }
  func.func @transform_33(%arg0: i32, %arg1: memref<2xi32, #tpu.memory_space<smem>>) -> (i32, i32) {
    %c0_i32 = arith.constant 0 : i32
    %c0_i32_0 = arith.constant 0 : i32
    %c0_i32_1 = arith.constant 0 : i32
    return %c0_i32, %c0_i32_0 : i32, i32
  }
  func.func @transform_34(%arg0: i32, %arg1: memref<2xi32, #tpu.memory_space<smem>>) -> (i32, i32) {
    %c0_i32 = arith.constant 0 : i32
    %c0_i32_0 = arith.constant 0 : i32
    %c0_i32_1 = arith.constant 0 : i32
    return %c0_i32, %c0_i32_0 : i32, i32
  }
  func.func @transform_35(%arg0: i32, %arg1: memref<2xi32, #tpu.memory_space<smem>>) -> (i32, i32) {
    %c0_i32 = arith.constant 0 : i32
    %c0_i32_0 = arith.constant 0 : i32
    %c0_i32_1 = arith.constant 0 : i32
    return %c0_i32, %c0_i32_0 : i32, i32
  }
  func.func @transform_36(%arg0: i32, %arg1: memref<2xi32, #tpu.memory_space<smem>>) -> (i32, i32) {
    %c0_i32 = arith.constant 0 : i32
    %c0_i32_0 = arith.constant 0 : i32
    %c0_i32_1 = arith.constant 0 : i32
    return %c0_i32, %c0_i32_0 : i32, i32
  }
  func.func @transform_37(%arg0: i32, %arg1: memref<2xi32, #tpu.memory_space<smem>>) -> (i32, i32) {
    %c0_i32 = arith.constant 0 : i32
    %c0_i32_0 = arith.constant 0 : i32
    %c0_i32_1 = arith.constant 0 : i32
    return %c0_i32, %c0_i32_0 : i32, i32
  }
  func.func @transform_38(%arg0: i32, %arg1: memref<2xi32, #tpu.memory_space<smem>>) -> (i32, i32) {
    %c0_i32 = arith.constant 0 : i32
    %c0_i32_0 = arith.constant 0 : i32
    %c0_i32_1 = arith.constant 0 : i32
    return %c0_i32, %c0_i32_0 : i32, i32
  }
  func.func @transform_39(%arg0: i32, %arg1: memref<2xi32, #tpu.memory_space<smem>>) -> (i32, i32) {
    %c0_i32 = arith.constant 0 : i32
    %c0_i32_0 = arith.constant 0 : i32
    %c0_i32_1 = arith.constant 0 : i32
    return %c0_i32, %c0_i32_0 : i32, i32
  }
  func.func @transform_40(%arg0: i32, %arg1: memref<2xi32, #tpu.memory_space<smem>>) -> (i32, i32) {
    %c0_i32 = arith.constant 0 : i32
    %c0_i32_0 = arith.constant 0 : i32
    %c0_i32_1 = arith.constant 0 : i32
    return %c0_i32, %c0_i32_0 : i32, i32
  }
  func.func @transform_41(%arg0: i32, %arg1: memref<2xi32, #tpu.memory_space<smem>>) -> (i32, i32) {
    %c0_i32 = arith.constant 0 : i32
    %c0_i32_0 = arith.constant 0 : i32
    %c0_i32_1 = arith.constant 0 : i32
    return %c0_i32, %c0_i32_0 : i32, i32
  }
  func.func @transform_42(%arg0: i32, %arg1: memref<2xi32, #tpu.memory_space<smem>>) -> (i32, i32) {
    %c0_i32 = arith.constant 0 : i32
    %c0_i32_0 = arith.constant 0 : i32
    %c0_i32_1 = arith.constant 0 : i32
    return %c0_i32, %c0_i32_0 : i32, i32
  }
  func.func @transform_43(%arg0: i32, %arg1: memref<2xi32, #tpu.memory_space<smem>>) -> (i32, i32) {
    %c0_i32 = arith.constant 0 : i32
    %c0_i32_0 = arith.constant 0 : i32
    %c0_i32_1 = arith.constant 0 : i32
    return %c0_i32, %c0_i32_0 : i32, i32
  }
  func.func @transform_44(%arg0: i32, %arg1: memref<2xi32, #tpu.memory_space<smem>>) -> (i32, i32) {
    %c0_i32 = arith.constant 0 : i32
    %c0_i32_0 = arith.constant 0 : i32
    %c0_i32_1 = arith.constant 0 : i32
    return %c0_i32, %c0_i32_0 : i32, i32
  }
  func.func @transform_45(%arg0: i32, %arg1: memref<2xi32, #tpu.memory_space<smem>>) -> (i32, i32) {
    %c0_i32 = arith.constant 0 : i32
    %c0_i32_0 = arith.constant 0 : i32
    %c0_i32_1 = arith.constant 0 : i32
    return %c0_i32, %c0_i32_0 : i32, i32
  }
  func.func @transform_46(%arg0: i32, %arg1: memref<2xi32, #tpu.memory_space<smem>>) -> (i32, i32) {
    %c0_i32 = arith.constant 0 : i32
    %c0_i32_0 = arith.constant 0 : i32
    %c0_i32_1 = arith.constant 0 : i32
    return %c0_i32, %c0_i32_0 : i32, i32
  }
  func.func @transform_47(%arg0: i32, %arg1: memref<2xi32, #tpu.memory_space<smem>>) -> (i32, i32) {
    %c0_i32 = arith.constant 0 : i32
    %c0_i32_0 = arith.constant 0 : i32
    %c0_i32_1 = arith.constant 0 : i32
    return %c0_i32, %c0_i32_0 : i32, i32
  }
  func.func @transform_48(%arg0: i32, %arg1: memref<2xi32, #tpu.memory_space<smem>>) -> (i32, i32) {
    %c0_i32 = arith.constant 0 : i32
    %c0_i32_0 = arith.constant 0 : i32
    %c0_i32_1 = arith.constant 0 : i32
    return %c0_i32, %c0_i32_0 : i32, i32
  }
  func.func @transform_49(%arg0: i32, %arg1: memref<2xi32, #tpu.memory_space<smem>>) -> (i32, i32) {
    %c0_i32 = arith.constant 0 : i32
    %c0_i32_0 = arith.constant 0 : i32
    %c0_i32_1 = arith.constant 0 : i32
    return %c0_i32, %c0_i32_0 : i32, i32
  }
  func.func @transform_50(%arg0: i32, %arg1: memref<2xi32, #tpu.memory_space<smem>>) -> (i32, i32) {
    %c0_i32 = arith.constant 0 : i32
    %c0_i32_0 = arith.constant 0 : i32
    %c0_i32_1 = arith.constant 0 : i32
    return %c0_i32, %c0_i32_0 : i32, i32
  }
  func.func @transform_51(%arg0: i32, %arg1: memref<2xi32, #tpu.memory_space<smem>>) -> (i32, i32) {
    %c0_i32 = arith.constant 0 : i32
    %c0_i32_0 = arith.constant 0 : i32
    %c0_i32_1 = arith.constant 0 : i32
    return %c0_i32, %c0_i32_0 : i32, i32
  }
  func.func @transform_52(%arg0: i32, %arg1: memref<2xi32, #tpu.memory_space<smem>>) -> (i32, i32) {
    %c0_i32 = arith.constant 0 : i32
    %c0_i32_0 = arith.constant 0 : i32
    %c0_i32_1 = arith.constant 0 : i32
    return %c0_i32, %c0_i32_0 : i32, i32
  }
  func.func @transform_53(%arg0: i32, %arg1: memref<2xi32, #tpu.memory_space<smem>>) -> (i32, i32) {
    %c0_i32 = arith.constant 0 : i32
    %c0_i32_0 = arith.constant 0 : i32
    %c0_i32_1 = arith.constant 0 : i32
    return %c0_i32, %c0_i32_0 : i32, i32
  }
  func.func @transform_54(%arg0: i32, %arg1: memref<2xi32, #tpu.memory_space<smem>>) -> (i32, i32) {
    %c0_i32 = arith.constant 0 : i32
    %c0_i32_0 = arith.constant 0 : i32
    %c0_i32_1 = arith.constant 0 : i32
    return %c0_i32, %c0_i32_0 : i32, i32
  }
  func.func @transform_55(%arg0: i32, %arg1: memref<2xi32, #tpu.memory_space<smem>>) -> (i32, i32) {
    %c0_i32 = arith.constant 0 : i32
    %c0_i32_0 = arith.constant 0 : i32
    %c0_i32_1 = arith.constant 0 : i32
    return %c0_i32, %c0_i32_0 : i32, i32
  }
  func.func @transform_56(%arg0: i32, %arg1: memref<2xi32, #tpu.memory_space<smem>>) -> (i32, i32) {
    %c0_i32 = arith.constant 0 : i32
    %c0_i32_0 = arith.constant 0 : i32
    %c0_i32_1 = arith.constant 0 : i32
    return %c0_i32, %c0_i32_0 : i32, i32
  }
  func.func @transform_57(%arg0: i32, %arg1: memref<2xi32, #tpu.memory_space<smem>>) -> (i32, i32) {
    %c0_i32 = arith.constant 0 : i32
    %c0_i32_0 = arith.constant 0 : i32
    %c0_i32_1 = arith.constant 0 : i32
    return %c0_i32, %c0_i32_0 : i32, i32
  }
  func.func @transform_58(%arg0: i32, %arg1: memref<2xi32, #tpu.memory_space<smem>>) -> (i32, i32) {
    %c0_i32 = arith.constant 0 : i32
    %c0_i32_0 = arith.constant 0 : i32
    %c0_i32_1 = arith.constant 0 : i32
    return %c0_i32, %c0_i32_0 : i32, i32
  }
  func.func @transform_59(%arg0: i32, %arg1: memref<2xi32, #tpu.memory_space<smem>>) -> (i32, i32) {
    %c0_i32 = arith.constant 0 : i32
    %c0_i32_0 = arith.constant 0 : i32
    %c0_i32_1 = arith.constant 0 : i32
    return %c0_i32, %c0_i32_0 : i32, i32
  }
  func.func @transform_60(%arg0: i32, %arg1: memref<2xi32, #tpu.memory_space<smem>>) -> (i32, i32) {
    %c0_i32 = arith.constant 0 : i32
    %c0_i32_0 = arith.constant 0 : i32
    %c0_i32_1 = arith.constant 0 : i32
    return %c0_i32, %c0_i32_0 : i32, i32
  }
  func.func @transform_61(%arg0: i32, %arg1: memref<2xi32, #tpu.memory_space<smem>>) -> (i32, i32) {
    %c0_i32 = arith.constant 0 : i32
    %c0_i32_0 = arith.constant 0 : i32
    %c0_i32_1 = arith.constant 0 : i32
    return %c0_i32, %c0_i32_0 : i32, i32
  }
  func.func @transform_62(%arg0: i32, %arg1: memref<2xi32, #tpu.memory_space<smem>>) -> (i32, i32) {
    %c0_i32 = arith.constant 0 : i32
    %c0_i32_0 = arith.constant 0 : i32
    %c0_i32_1 = arith.constant 0 : i32
    return %c0_i32, %c0_i32_0 : i32, i32
  }
  func.func @transform_63(%arg0: i32, %arg1: memref<2xi32, #tpu.memory_space<smem>>) -> (i32, i32) {
    %c0_i32 = arith.constant 0 : i32
    %c0_i32_0 = arith.constant 0 : i32
    %c0_i32_1 = arith.constant 0 : i32
    return %c0_i32, %c0_i32_0 : i32, i32
  }
  func.func @transform_64(%arg0: i32, %arg1: memref<2xi32, #tpu.memory_space<smem>>) -> (i32, i32) {
    %c0_i32 = arith.constant 0 : i32
    %c0_i32_0 = arith.constant 0 : i32
    %c0_i32_1 = arith.constant 0 : i32
    return %c0_i32, %c0_i32_0 : i32, i32
  }
  func.func @transform_65(%arg0: i32, %arg1: memref<2xi32, #tpu.memory_space<smem>>) -> (i32, i32) {
    %c0_i32 = arith.constant 0 : i32
    %c0_i32_0 = arith.constant 0 : i32
    %c0_i32_1 = arith.constant 0 : i32
    return %c0_i32, %c0_i32_0 : i32, i32
  }
  func.func @transform_66(%arg0: i32, %arg1: memref<2xi32, #tpu.memory_space<smem>>) -> (i32, i32) {
    %c0_i32 = arith.constant 0 : i32
    %c0_i32_0 = arith.constant 0 : i32
    %c0_i32_1 = arith.constant 0 : i32
    return %c0_i32, %c0_i32_0 : i32, i32
  }
  func.func @transform_67(%arg0: i32, %arg1: memref<2xi32, #tpu.memory_space<smem>>) -> (i32, i32) {
    %c0_i32 = arith.constant 0 : i32
    %c0_i32_0 = arith.constant 0 : i32
    return %arg0, %c0_i32 : i32, i32
  }
}

</mosaic_0001>

<bundles_post_ra>
// kernel: conformer_encoder.1
= control target key start
LH: loop header
LB: loop body
LE: loop exit
PB: predicated region body
PF: predicated region fallthrough
CT: control target
= control target key end

     0   :  { %s9047_s6 = smov 1   ;;  %s9048_s10 = smov 2   ;;  %s10500_s0 = inlined_call_operand.smem [shape: u32[69], index: -1, kind: input, shape index: {}] }
   0x1   :  { %s9169_s5 = sld [smem:[%s10500_s0]]   ;;  %s9049_s14 = smov 3  }
   0x2   :  { %s9174_s9 = sld [smem:[%s10500_s0 + %s9047_s6]]   ;;  %s9050_s18 = smov 4  }
   0x3   :  { %s9179_s13 = sld [smem:[%s10500_s0 + %s9048_s10]]   ;;  %s9051_s22 = smov 5  }
   0x4   :  { %s9184_s17 = sld [smem:[%s10500_s0 + %s9049_s14]]   ;;  %s9052_s26 = smov 6  }
   0x5   :  { %s9189_s21 = sld [smem:[%s10500_s0 + %s9050_s18]]   ;;  %s9053_s30 = smov 7  }
   0x6   :  { %s9194_s25 = sld [smem:[%s10500_s0 + %s9051_s22]]   ;;  %s9054_s4 = smov 8  }
   0x7   :  { %s9199_s29 = sld [smem:[%s10500_s0 + %s9052_s26]]   ;;  %s9055_s10 = smov 9  }
   0x8   :  { %10579 = sst [smem:[#allocation62_spill]] %s9174_s9  ;;  %s9056_s15 = smov 10  }
   0x9   :  { %10580 = sst [smem:[#allocation63_spill]] %s9179_s13  ;;  %s9057_s20 = smov 11  }
   0xa   :  { %10581 = sst [smem:[#allocation64_spill]] %s9184_s17  ;;  %s9058_s26 = smov 12  }
   0xb   :  { %10582 = sst [smem:[#allocation65_spill]] %s9189_s21  ;;  %s9059_s1 = smov 13  }
   0xc   :  { %s9204_s3 = sld [smem:[%s10500_s0 + %s9053_s30]]   ;;  %s9060_s7 = smov 14  }
   0xd   :  { %10583 = sst [smem:[#allocation66_spill]] %s9199_s29  ;;  %s9062_s22 = smov 16  }
   0xe   :  { %s9209_s8 = sld [smem:[%s10500_s0 + %s9054_s4]]   ;;  %s9063_s28 = smov 17  }
   0xf   :  { %s9214_s14 = sld [smem:[%s10500_s0 + %s9055_s10]]  }
  0x10   :  { %s9219_s19 = sld [smem:[%s10500_s0 + %s9056_s15]]   ;;  %s9061_s15 = smov 15  }
  0x11   :  { %s9224_s24 = sld [smem:[%s10500_s0 + %s9057_s20]]  }
  0x12   :  { %10584 = sst [smem:[#allocation67_spill]] %s9204_s3 }
  0x13   :  { %s9229_s30 = sld [smem:[%s10500_s0 + %s9058_s26]]  }
  0x14   :  { %10585 = sst [smem:[#allocation68_spill]] %s9209_s8 }
  0x15   :  { %10586 = sst [smem:[#allocation69_spill]] %s9214_s14 }
  0x16   :  { %10587 = sst [smem:[#allocation70_spill]] %s9219_s19 }
  0x17   :  { %10588 = sst [smem:[#allocation71_spill]] %s9224_s24 }
  0x18   :  { %s9234_s6 = sld [smem:[%s10500_s0 + %s9059_s1]]  }
  0x19   :  { %s9239_s12 = sld [smem:[%s10500_s0 + %s9060_s7]]   ;;  %s9064_s7 = smov 18  }
  0x1a   :  { %s9244_s20 = sld [smem:[%s10500_s0 + %s9061_s15]]   ;;  %s9065_s15 = smov 19  }
  0x1b   :  { %s9249_s27 = sld [smem:[%s10500_s0 + %s9062_s22]]   ;;  %s9066_s22 = smov 20  }
  0x1c   :  { %s9254_s4 = sld [smem:[%s10500_s0 + %s9063_s28]]   ;;  %s9067_s28 = smov 21  }
  0x1d   :  { %s9259_s3 = sld [smem:[%s10500_s0 + %s9064_s7]]   ;;  %s9068_s7 = smov 22  }
  0x1e   :  { %10589 = sst [smem:[#allocation72_spill]] %s9234_s6 }
  0x1f   :  { %10590 = sst [smem:[#allocation73_spill]] %s9239_s12 }
  0x20   :  { %10591 = sst [smem:[#allocation74_spill]] %s9244_s20 }
  0x21   :  { %s9264_s21 = sld [smem:[%s10500_s0 + %s9065_s15]]   ;;  %s9069_s15 = smov 23  }
  0x22   :  { %10592 = sst [smem:[#allocation75_spill]] %s9254_s4 }
  0x23   :  { %10593 = sst [smem:[#allocation76_spill]] %s9259_s3 }
  0x24   :  { %s9269_s14 = sld [smem:[%s10500_s0 + %s9066_s22]]   ;;  %s9070_s22 = smov 24  }
  0x25   :  { %s9274_s4 = sld [smem:[%s10500_s0 + %s9067_s28]]   ;;  %s9071_s28 = smov 25  }
  0x26   :  { %s9279_s13 = sld [smem:[%s10500_s0 + %s9068_s7]]   ;;  %s9072_s7 = smov 26  }
  0x27   :  { %10594 = sst [smem:[#allocation77_spill]] %s9264_s21 }
  0x28   :  { %s9284_s21 = sld [smem:[%s10500_s0 + %s9069_s15]]   ;;  %s9073_s15 = smov 27  }
  0x29   :  { %s9289_s9 = sld [smem:[%s10500_s0 + %s9070_s22]]   ;;  %s9074_s22 = smov 28  }
  0x2a   :  { %10595 = sst [smem:[#allocation78_spill]] %s9269_s14 }
  0x2b   :  { %10596 = sst [smem:[#allocation79_spill]] %s9274_s4 }
  0x2c   :  { %10597 = sst [smem:[#allocation80_spill]] %s9279_s13 }
  0x2d   :  { %s9294_s17 = sld [smem:[%s10500_s0 + %s9071_s28]]   ;;  %s9075_s28 = smov 29  }
  0x2e   :  { %10598 = sst [smem:[#allocation81_spill]] %s9284_s21 }
  0x2f   :  { %10599 = sst [smem:[#allocation82_spill]] %s9289_s9 }
  0x30   :  { %s9299_s4 = sld [smem:[%s10500_s0 + %s9072_s7]]   ;;  %s9076_s7 = smov 30  }
  0x31   :  { %s9304_s21 = sld [smem:[%s10500_s0 + %s9073_s15]]   ;;  %s9077_s15 = smov 31  }
  0x32   :  { %s9309_s9 = sld [smem:[%s10500_s0 + %s9074_s22]]   ;;  %s9078_s22 = smov 32  }
  0x33   :  { %10600 = sst [smem:[#allocation83_spill]] %s9294_s17 }
  0x34   :  { %s9314_s17 = sld [smem:[%s10500_s0 + %s9075_s28]]   ;;  %s9079_s28 = smov 33  }
  0x36   :  { %10601 = sst [smem:[#allocation84_spill]] %s9299_s4 }
  0x37   :  { %10602 = sst [smem:[#allocation85_spill]] %s9304_s21 }
  0x38   :  { %10603 = sst [smem:[#allocation86_spill]] %s9309_s9 }
  0x39   :  { %s9319_s4 = sld [smem:[%s10500_s0 + %s9076_s7]]   ;;  %s9080_s7 = smov 34  }
  0x3a   :  { %10604 = sst [smem:[#allocation87_spill]] %s9314_s17 }
  0x3b   :  { %s9324_s21 = sld [smem:[%s10500_s0 + %s9077_s15]]   ;;  %s9081_s15 = smov 35  }
  0x3c   :  { %s9329_s9 = sld [smem:[%s10500_s0 + %s9078_s22]]   ;;  %s9082_s22 = smov 36  }
  0x3d   :  { %s9334_s17 = sld [smem:[%s10500_s0 + %s9079_s28]]   ;;  %s9083_s28 = smov 37  }
  0x3f   :  { %10605 = sst [smem:[#allocation88_spill]] %s9319_s4 }
  0x40   :  { %s9339_s4 = sld [smem:[%s10500_s0 + %s9080_s7]]   ;;  %s9084_s7 = smov 38  }
  0x41   :  { %10606 = sst [smem:[#allocation89_spill]] %s9324_s21 }
  0x42   :  { %10607 = sst [smem:[#allocation90_spill]] %s9329_s9 }
  0x43   :  { %10608 = sst [smem:[#allocation91_spill]] %s9334_s17 }
  0x44   :  { %s9344_s21 = sld [smem:[%s10500_s0 + %s9081_s15]]   ;;  %s9085_s15 = smov 39  }
  0x45   :  { %s9349_s9 = sld [smem:[%s10500_s0 + %s9082_s22]]   ;;  %s9086_s22 = smov 40  }
  0x46   :  { %10609 = sst [smem:[#allocation92_spill]] %s9339_s4 }
  0x47   :  { %s9354_s17 = sld [smem:[%s10500_s0 + %s9083_s28]]   ;;  %s9087_s28 = smov 41  }
  0x48   :  { %s9359_s4 = sld [smem:[%s10500_s0 + %s9084_s7]]   ;;  %s9088_s7 = smov 42  }
  0x4a   :  { %10610 = sst [smem:[#allocation93_spill]] %s9344_s21 }
  0x4b   :  { %10611 = sst [smem:[#allocation94_spill]] %s9349_s9 }
  0x4c   :  { %s9364_s21 = sld [smem:[%s10500_s0 + %s9085_s15]]   ;;  %s9089_s15 = smov 43  }
  0x4d   :  { %10612 = sst [smem:[#allocation95_spill]] %s9354_s17 }
  0x4e   :  { %10613 = sst [smem:[#allocation96_spill]] %s9359_s4 }
  0x4f   :  { %s9369_s9 = sld [smem:[%s10500_s0 + %s9086_s22]]   ;;  %s9090_s22 = smov 44  }
  0x50   :  { %s9374_s17 = sld [smem:[%s10500_s0 + %s9087_s28]]   ;;  %s9091_s28 = smov 45  }
  0x51   :  { %s9379_s4 = sld [smem:[%s10500_s0 + %s9088_s7]]   ;;  %s9092_s7 = smov 46  }
  0x52   :  { %10614 = sst [smem:[#allocation97_spill]] %s9364_s21 }
  0x53   :  { %s9384_s21 = sld [smem:[%s10500_s0 + %s9089_s15]]   ;;  %s9093_s15 = smov 47  }
  0x55   :  { %10615 = sst [smem:[#allocation98_spill]] %s9369_s9 }
  0x56   :  { %10616 = sst [smem:[#allocation99_spill]] %s9374_s17 }
  0x57   :  { %10617 = sst [smem:[#allocation100_spill]] %s9379_s4 }
  0x58   :  { %s9389_s9 = sld [smem:[%s10500_s0 + %s9090_s22]]   ;;  %s9094_s22 = smov 48  }
  0x59   :  { %10618 = sst [smem:[#allocation101_spill]] %s9384_s21 }
  0x5a   :  { %s9394_s17 = sld [smem:[%s10500_s0 + %s9091_s28]]   ;;  %s9095_s28 = smov 49  }
  0x5b   :  { %s9399_s4 = sld [smem:[%s10500_s0 + %s9092_s7]]   ;;  %s9096_s7 = smov 50  }
  0x5c   :  { %s9404_s21 = sld [smem:[%s10500_s0 + %s9093_s15]]   ;;  %s9097_s15 = smov 51  }
  0x5e   :  { %10619 = sst [smem:[#allocation102_spill]] %s9389_s9 }
  0x5f   :  { %s9409_s9 = sld [smem:[%s10500_s0 + %s9094_s22]]   ;;  %s9098_s22 = smov 52  }
  0x60   :  { %10620 = sst [smem:[#allocation103_spill]] %s9394_s17 }
  0x61   :  { %10621 = sst [smem:[#allocation104_spill]] %s9399_s4 }
  0x62   :  { %10622 = sst [smem:[#allocation105_spill]] %s9404_s21 }
  0x63   :  { %s9414_s17 = sld [smem:[%s10500_s0 + %s9095_s28]]   ;;  %s9099_s28 = smov 53  }
  0x64   :  { %s9419_s4 = sld [smem:[%s10500_s0 + %s9096_s7]]   ;;  %s9100_s7 = smov 54  }
  0x65   :  { %10623 = sst [smem:[#allocation106_spill]] %s9409_s9 }
  0x66   :  { %s9424_s21 = sld [smem:[%s10500_s0 + %s9097_s15]]   ;;  %s9101_s15 = smov 55  }
  0x67   :  { %s9429_s9 = sld [smem:[%s10500_s0 + %s9098_s22]]   ;;  %s9102_s22 = smov 56  }
  0x68   :  { %s9449_s3 = sld [smem:[%s10500_s0 + %s9102_s22]]   ;;  %s9106_s22 = smov 60  }
  0x69   :  { %10624 = sst [smem:[#allocation107_spill]] %s9414_s17 }
  0x6a   :  { %10625 = sst [smem:[#allocation108_spill]] %s9419_s4 }
  0x6b   :  { %s9434_s17 = sld [smem:[%s10500_s0 + %s9099_s28]]   ;;  %s9103_s28 = smov 57  }
  0x6c   :  { %10626 = sst [smem:[#allocation109_spill]] %s9424_s21 }
  0x6d   :  { %10627 = sst [smem:[#allocation110_spill]] %s9429_s9 }
  0x6e   :  { %s9439_s4 = sld [smem:[%s10500_s0 + %s9100_s7]]   ;;  %s9104_s7 = smov 58  }
  0x6f   :  { %s9444_s21 = sld [smem:[%s10500_s0 + %s9101_s15]]   ;;  %s9105_s15 = smov 59  }
  0x70   :  { %10631 = sst [smem:[#allocation114_spill]] %s9449_s3 }
  0x71   :  { %10628 = sst [smem:[#allocation111_spill]] %s9434_s17 }
  0x72   :  { %s9454_s17 = sld [smem:[%s10500_s0 + %s9103_s28]]   ;;  %s9107_s28 = smov 61  }
  0x73   :  { %s9469_s20 = sld [smem:[%s10500_s0 + %s9106_s22]]   ;;  %s9110_s22 = smov 64  }
  0x74   :  { %10629 = sst [smem:[#allocation112_spill]] %s9439_s4 }
  0x75   :  { %10630 = sst [smem:[#allocation113_spill]] %s9444_s21 }
  0x76   :  { %s9459_s4 = sld [smem:[%s10500_s0 + %s9104_s7]]   ;;  %s9108_s7 = smov 62  }
  0x77   :  { %s9464_s21 = sld [smem:[%s10500_s0 + %s9105_s15]]   ;;  %s9109_s15 = smov 63  }
  0x78   :  { %10632 = sst [smem:[#allocation115_spill]] %s9454_s17  ;;  %s9112_s17 = smov 66  }
  0x79   :  { %10635 = sst [smem:[#allocation118_spill]] %s9469_s20  ;;  %s9114_s20 = smov 68  }
  0x7a   :  { %s9474_s10 = sld [smem:[%s10500_s0 + %s9107_s28]]   ;;  %s9111_s28 = smov 65  }
  0x7b   :  { %s9479_s16 = sld [smem:[%s10500_s0 + %s9108_s7]]  }
  0x7c   :  { %10633 = sst [smem:[#allocation116_spill]] %s9459_s4 }
  0x7d   :  { %10634 = sst [smem:[#allocation117_spill]] %s9464_s21  ;;  %s9113_s21 = smov 67  }
  0x7e   :  { %s9484_s23 = sld [smem:[%s10500_s0 + %s9109_s15]]  }
  0x7f   :  { %s9489_s1 = sld [smem:[%s10500_s0 + %s9110_s22]]  }
  0x80   :  { %10636 = sst [smem:[#allocation119_spill]] %s9474_s10  ;;  %s142_s10 = sshll.u32 %s9169_s5, 4  ;;  %s143_s10 = int_to_ptr.vmem [resolvable:$true] %s142_s10 }
  0x81   :  { %s9494_s6 = sld [smem:[%s10500_s0 + %s9111_s28]]   ;;  %s8185_s28 = scalar_lea.vmem %s143_s10, 16 }
  0x82   :  { %s9499_s24 = sld [smem:[%s10500_s0 + %s9112_s17]]   ;;  %p8186_p0 = scmp.ne.s32.totalorder %s143_s10, %s8185_s28 }
  0x83   :  { %s9509_s8 = sld [smem:[%s10500_s0 + %s9114_s20]]   ;;  %p8190_p1 = scmp.lt.s32.totalorder %s143_s10, %s143_s10 }
  0x84   :  { %10637 = sst [smem:[#allocation120_spill]] %s9484_s23  ;;  %p8191_p2 = scmp.lt.s32.totalorder %s8185_s28, %s8185_s28 }
  0x85   :  { %10638 = sst [smem:[#allocation121_spill]] %s9489_s1 }
  0x86   :  { %s9504_s23 = sld [smem:[%s10500_s0 + %s9113_s21]]   ;;  %p8192_p3 = por %p8191_p2, %p8190_p1 }
  0x87   :  { %10639 = sst [smem:[#allocation122_spill]] %s9494_s6 }
  0x88   :  { %p8193_p4 = pnand %p8192_p3, %p8186_p0 }
  0x8a   :  { %8196 = shalt.err (!%p8193_p4)  }
  0x8b   :  { %s9115_s2 = smov [#allocation3]  }
  0x8c   :  { %145 = dma.vmem_to_smem %s143_s10, 16, %s9115_s2, [#allocation2] }
  0x8d   :  { %8969 = dma.done.wait [#allocation2], 16 }
  0x8e   :  { %8970 = vsyncadd [#allocation2], 4294967280 }
  0x8f   :  { %147 = sfence }
  0x90   :  { %148 = vsyncpa [#allocation5], 0 }
  0x91   :  { %149 = vsyncpa [#allocation8], 0 }
  0x92   :  { %150 = vsyncpa [#allocation11], 0 }
  0x93   :  { %151 = vsyncpa [#allocation14], 0 }
  0x94   :  { %152 = vsyncpa [#allocation17], 0 }
  0x95   :  { %153 = vsyncpa [#allocation20], 0 }
  0x96   :  { %154 = vsyncpa [#allocation23], 0 }
  0x97   :  { %155 = vsyncpa [#allocation26], 0 }
  0x98   :  { %156 = vsyncpa [#allocation29], 0 }
  0x99   :  { %157 = vsyncpa [#allocation32], 0 }
  0x9a   :  { %158 = vsyncpa [#allocation35], 0 }
  0x9b   :  { %159 = vsyncpa [#allocation38], 0 }
  0x9c   :  { %160 = vsyncpa [#allocation41], 0 }
  0x9d   :  { %161 = vsyncpa [#allocation44], 0 }
  0x9e   :  { %162 = vsyncpa [#allocation6], 0 }
  0x9f   :  { %164 = vsyncpa [#allocation6 + $0x1], 0  ;;  %s9512_s0 = smov 0   ;;  %s9514_s5 = smov 0  }
  0xa0   :  { %s9516_s17 = smov 0   ;;  %s9518_s7 = smov 0  }
  0xa1 LB: > { %s10640_s6 = sld [smem:[#allocation122_spill]]  ;;  %s10641_s14 = sld [smem:[#allocation78_spill]]  ;;  %s9037_s5 = sphi %s9514_s5, %s10764_s5   ;;  %s9033_s0 = sphi %s9512_s0, %s10763_s0   ;;  %s9045_s7 = sphi %s9518_s7, %s10760_s7   ;;  %s9041_s17 = sphi %s9516_s17, %s10762_s17  }
  0xa2   : > { %s10642_s13 = sld [smem:[#allocation80_spill]]  ;;  %s10643_s12 = sld [smem:[#allocation73_spill]] }
  0xa3   : > { %s10644_s9 = sld [smem:[#allocation110_spill]]  ;;  %s10645_s4 = sld [smem:[#allocation116_spill]] }
  0xa4   : > { %s10646_s3 = sld [smem:[#allocation114_spill]]  ;;  %s10647_s1 = sld [smem:[#allocation121_spill]] }
  0xa5   : > { %s10648_s29 = sld [smem:[#allocation66_spill]]  ;;  %s10649_s19 = sld [smem:[#allocation70_spill]] }
  0xa6   : > { %10650 = sst [smem:[#allocation123_spill]] %s9041_s17  ;;  %s9533_s11 = sadd.s32 4294967295, %s9045_s7  }
  0xa7   : > { %s6885_s21 = sadd.s32 4294967294, %s9045_s7   ;;  %s9537_s15 = sadd.s32 1, %s9045_s7  }
  0xa8   : > { %10651 = sst [smem:[#allocation124_spill]] %s9537_s15  ;;  %s1589_s18 = sadd.s32 1, %s9041_s17 }
  0xa9   : > { %s1586_s20 = ssub.s32 %s9045_s7, %s9537_s15  ;;  %p1599_p5 = scmp.ne.s32.totalorder %s9041_s17, %s9037_s5 }
  0xaa   : > { %p1587_p6 = scmp.eq.s32.totalorder %s1586_s20, 0  ;;  %p1600_p7 = scmp.eq.s32.totalorder %s9533_s11, 1 }
  0xab   : > { %p1605_p8 = scmp.ne.s32.totalorder %s9037_s5, %s9033_s0  ;;  %p1606_p9 = scmp.eq.s32.totalorder %s6885_s21, 1 }
  0xac   : > { %s9548_s22 = scalar_select %p1587_p6, %s9041_s17, %s1589_s18  }
  0xad   : > { %p9550_p10 = por %p1600_p7, %p1599_p5  ;;  %p9554_p11 = por %p1606_p9, %p1605_p8 }
  0xae   : > { %10652 = sst [smem:[#allocation125_spill]] %s9548_s22  ;;  %p6886_p12 = scmp.ge.s32.totalorder %s9045_s7, 1 }
  0xaf   : > { %s10653_s26 = scalar_select %p9550_p10, 1, 0 }
  0xb0   : > { %s10654_s10 = scalar_select %p9554_p11, 1, 0 }
  0xb1   : > { %p1613_p13 = scmp.lt.s32.totalorder %s9045_s7, 3  ;;  %p10533_p0 = scmp.eq.s32.totalorder %s9533_s11, 0 }
  0xb2   : > { %10655 = sst [smem:[#allocation126_spill]] %s10654_s10  ;;  %s9116_s2 = smov [#allocation7]  }
  0xb3   : > { %p9561_p1 = pnand %p6886_p12, %p1613_p13  ;;  %s1646_s21 = sshll.u32 %s9116_s2, 4  ;;  %s1647_s21 = int_to_ptr.vmem [resolvable:$true] %s1646_s21 }
  0xb4   : > { %s9117_s18 = smov [#allocation10]   ;;  %s9118_s17 = smov [#allocation13]  }
  0xb5   : > { %s10656_s28 = scalar_select %p9561_p1, 1, 0 }
  0xb6   : > { %p7814_p2 = pneg %p9561_p1  ;;  %s1674_s20 = sshll.u32 %s9117_s18, 4  ;;  %s9573_s20 = int_to_ptr.vmem [resolvable:$true] %s1674_s20 }
  0xb7   : > { %s1696_s15 = sshll.u32 %s9118_s17, 4  ;;  %s8197_s10 = scalar_lea.hbm %s10648_s29, 16  ;;  %s9575_s15 = int_to_ptr.vmem [resolvable:$true] %s1696_s15 }
  0xb8   : > { %p9569_p3 = pnand %p10533_p0, %p7814_p2  ;;  %p8198_p4 = scmp.ne.s32.totalorder %s10648_s29, %s8197_s10 }
  0xb9   : > { %p8204_p8 = scmp.lt.u32.totalorder %s8197_s10, %s10648_s29 }
  0xba   : > { %p9581_p5 = pneg %p9569_p3 }
  0xbc   : > { %p8200_p6 = pnand %p9581_p5, %p8198_p4 }
  0xbe   : > { %p8201_p7 = pneg %p8200_p6 }
  0xc0   : > { %p8206_p9 = pnand %p8204_p8, %p8201_p7 }
  0xc2   : > { %8209 = shalt.err (!%p8206_p9)
}
  0xc3   : > { %s8210_s18 = scalar_lea.vmem %s1647_s21, 16  ;;  %s8217_s17 = scalar_lea.vmem %s1647_s21, 32 }
  0xc4   : > { %p8211_p12 = scmp.ne.s32.totalorder %s1647_s21, %s8210_s18  ;;  %p8218_p0 = scmp.lt.s32.totalorder %s1647_s21, %s1647_s21 }
  0xc5   : > { %p8219_p11 = scmp.lt.s32.totalorder %s8217_s17, %s8210_s18 }
  0xc6   : > { %p8213_p13 = pnand %p8211_p12, %p9581_p5 }
  0xc7   : > { %p8220_p10 = por %p8219_p11, %p8218_p0 }
  0xc8   : > { %p8214_p2 = pneg %p8213_p13 }
  0xca   : > { %p8221_p1 = pnand %p8220_p10, %p8214_p2 }
  0xcc   : > { %8224 = shalt.err (!%p8221_p1)
}
  0xcd   : > { %7820 = dma.hbm_to_vmem [thread:$0]  (!%p9569_p3), %s10648_s29, 16, %s1647_s21, [#allocation8]  }
  0xce   : > { %s8225_s10 = scalar_lea.hbm %s10649_s19, 16 }
  0xcf   : > { %p8226_p4 = scmp.ne.s32.totalorder %s10649_s19, %s8225_s10  ;;  %p8232_p8 = scmp.lt.u32.totalorder %s8225_s10, %s10649_s19 }
  0xd1   : > { %p8228_p6 = pnand %p8226_p4, %p9581_p5 }
  0xd3   : > { %p8229_p7 = pneg %p8228_p6 }
  0xd5   : > { %p8234_p9 = pnand %p8232_p8, %p8229_p7 }
  0xd7   : > { %8237 = shalt.err (!%p8234_p9)
}
  0xd8   : > { %s8238_s18 = scalar_lea.vmem %s9573_s20, 16  ;;  %s8245_s17 = scalar_lea.vmem %s9573_s20, 32 }
  0xd9   : > { %p8239_p10 = scmp.ne.s32.totalorder %s9573_s20, %s8238_s18  ;;  %p8246_p1 = scmp.lt.s32.totalorder %s9573_s20, %s9573_s20 }
  0xda   : > { %p8247_p12 = scmp.lt.s32.totalorder %s8245_s17, %s8238_s18 }
  0xdb   : > { %p8241_p11 = pnand %p8239_p10, %p9581_p5 }
  0xdc   : > { %p8248_p13 = por %p8247_p12, %p8246_p1 }
  0xdd   : > { %p8242_p0 = pneg %p8241_p11 }
  0xdf   : > { %p8249_p2 = pnand %p8248_p13, %p8242_p0 }
  0xe1   : > { %8252 = shalt.err (!%p8249_p2)
}
  0xe2   : > { %7826 = dma.hbm_to_vmem [thread:$0]  (!%p9569_p3), %s10649_s19, 16, %s9573_s20, [#allocation11]  }
  0xe3   : > { %s8253_s21 = scalar_lea.hbm %s9229_s30, 16 }
  0xe4   : > { %p8254_p4 = scmp.ne.s32.totalorder %s9229_s30, %s8253_s21  ;;  %p8260_p8 = scmp.lt.u32.totalorder %s8253_s21, %s9229_s30 }
  0xe6   : > { %p8256_p6 = pnand %p8254_p4, %p9581_p5 }
  0xe8   : > { %p8257_p7 = pneg %p8256_p6 }
  0xea   : > { %p8262_p9 = pnand %p8260_p8, %p8257_p7 }
  0xec   : > { %8265 = shalt.err (!%p8262_p9)
}
  0xed   : > { %s8266_s10 = scalar_lea.vmem %s9575_s15, 16  ;;  %s8273_s18 = scalar_lea.vmem %s9575_s15, 32 }
  0xee   : > { %p8267_p10 = scmp.ne.s32.totalorder %s9575_s15, %s8266_s10  ;;  %p8274_p1 = scmp.lt.s32.totalorder %s9575_s15, %s9575_s15 }
  0xef   : > { %p8275_p12 = scmp.lt.s32.totalorder %s8273_s18, %s8266_s10 }
  0xf0   : > { %p8269_p11 = pnand %p8267_p10, %p9581_p5 }
  0xf1   : > { %p8276_p13 = por %p8275_p12, %p8274_p1 }
  0xf2   : > { %p8270_p0 = pneg %p8269_p11 }
  0xf4   : > { %p8277_p2 = pnand %p8276_p13, %p8270_p0 }
  0xf6   : > { %8280 = shalt.err (!%p8277_p2)
}
  0xf7   : > { %7832 = dma.hbm_to_vmem [thread:$0]  (!%p9569_p3), %s9229_s30, 16, %s9575_s15, [#allocation14]  }
  0xf8   : > { %s9119_s20 = smov [#allocation16]   ;;  %s9120_s21 = smov [#allocation19]  }
  0xf9   : > { %s1718_s17 = sshll.u32 %s9119_s20, 4  ;;  %s1740_s19 = sshll.u32 %s9120_s21, 4  ;;  %s1719_s17 = int_to_ptr.vmem [resolvable:$true] %s1718_s17  ;;  %s1741_s19 = int_to_ptr.vmem [resolvable:$true] %s1740_s19 }
  0xfa   : > { %s8281_s29 = scalar_lea.hbm %s10643_s12, 16 }
  0xfb   : > { %p8282_p4 = scmp.ne.s32.totalorder %s10643_s12, %s8281_s29  ;;  %p8288_p8 = scmp.lt.u32.totalorder %s8281_s29, %s10643_s12 }
  0xfd   : > { %p8284_p6 = pnand %p8282_p4, %p9581_p5 }
  0xff   : > { %p8285_p7 = pneg %p8284_p6 }
 0x101   : > { %p8290_p9 = pnand %p8288_p8, %p8285_p7 }
 0x103   : > { %8293 = shalt.err (!%p8290_p9)
}
 0x104   : > { %s8294_s10 = scalar_lea.vmem %s1719_s17, 16  ;;  %s8301_s15 = scalar_lea.vmem %s1719_s17, 32 }
 0x105   : > { %p8295_p10 = scmp.ne.s32.totalorder %s1719_s17, %s8294_s10  ;;  %p8302_p1 = scmp.lt.s32.totalorder %s1719_s17, %s1719_s17 }
 0x106   : > { %p8303_p12 = scmp.lt.s32.totalorder %s8301_s15, %s8294_s10 }
 0x107   : > { %p8297_p11 = pnand %p8295_p10, %p9581_p5 }
 0x108   : > { %p8304_p13 = por %p8303_p12, %p8302_p1 }
 0x109   : > { %p8298_p0 = pneg %p8297_p11 }
 0x10b   : > { %p8305_p2 = pnand %p8304_p13, %p8298_p0 }
 0x10d   : > { %8308 = shalt.err (!%p8305_p2)
}
 0x10e   : > { %7838 = dma.hbm_to_vmem [thread:$0]  (!%p9569_p3), %s10643_s12, 16, %s1719_s17, [#allocation17]  }
 0x10f   : > { %s8309_s29 = scalar_lea.hbm %s9249_s27, 16 }
 0x110   : > { %p8310_p4 = scmp.ne.s32.totalorder %s9249_s27, %s8309_s29  ;;  %p8316_p8 = scmp.lt.u32.totalorder %s8309_s29, %s9249_s27 }
 0x112   : > { %p8312_p6 = pnand %p8310_p4, %p9581_p5 }
 0x114   : > { %p8313_p7 = pneg %p8312_p6 }
 0x116   : > { %p8318_p9 = pnand %p8316_p8, %p8313_p7 }
 0x118   : > { %8321 = shalt.err (!%p8318_p9)
}
 0x119   : > { %s8322_s18 = scalar_lea.vmem %s1741_s19, 16  ;;  %s8329_s20 = scalar_lea.vmem %s1741_s19, 32 }
 0x11a   : > { %p8323_p10 = scmp.ne.s32.totalorder %s1741_s19, %s8322_s18  ;;  %p8330_p1 = scmp.lt.s32.totalorder %s1741_s19, %s1741_s19 }
 0x11b   : > { %p8331_p12 = scmp.lt.s32.totalorder %s8329_s20, %s8322_s18 }
 0x11c   : > { %p8325_p11 = pnand %p8323_p10, %p9581_p5 }
 0x11d   : > { %p8332_p13 = por %p8331_p12, %p8330_p1 }
 0x11e   : > { %p8326_p0 = pneg %p8325_p11 }
 0x120   : > { %p8333_p2 = pnand %p8332_p13, %p8326_p0 }
 0x122   : > { %8336 = shalt.err (!%p8333_p2)
}
 0x123   : > { %7844 = dma.hbm_to_vmem [thread:$0]  (!%p9569_p3), %s9249_s27, 16, %s1741_s19, [#allocation20]  }
 0x124   : > { %s9121_s17 = smov [#allocation22]   ;;  %s9122_s10 = smov [#allocation25]  }
 0x125   : > { %s1768_s21 = sshll.u32 %s9121_s17, 4  ;;  %s1790_s15 = sshll.u32 %s9122_s10, 4  ;;  %s1769_s21 = int_to_ptr.vmem [resolvable:$true] %s1768_s21  ;;  %s1791_s15 = int_to_ptr.vmem [resolvable:$true] %s1790_s15 }
 0x126   : > { %s8337_s29 = scalar_lea.hbm %s10641_s14, 16 }
 0x127   : > { %p8338_p4 = scmp.ne.s32.totalorder %s10641_s14, %s8337_s29  ;;  %p8344_p8 = scmp.lt.u32.totalorder %s8337_s29, %s10641_s14 }
 0x129   : > { %p8340_p6 = pnand %p8338_p4, %p9581_p5 }
 0x12b   : > { %p8341_p7 = pneg %p8340_p6 }
 0x12d   : > { %p8346_p9 = pnand %p8344_p8, %p8341_p7 }
 0x12f   : > { %8349 = shalt.err (!%p8346_p9)
}
 0x130   : > { %s8350_s18 = scalar_lea.vmem %s1769_s21, 16  ;;  %s8357_s19 = scalar_lea.vmem %s1769_s21, 32 }
 0x131   : > { %p8351_p10 = scmp.ne.s32.totalorder %s1769_s21, %s8350_s18  ;;  %p8358_p1 = scmp.lt.s32.totalorder %s1769_s21, %s1769_s21 }
 0x132   : > { %p8359_p12 = scmp.lt.s32.totalorder %s8357_s19, %s8350_s18 }
 0x133   : > { %p8353_p11 = pnand %p8351_p10, %p9581_p5 }
 0x134   : > { %p8360_p13 = por %p8359_p12, %p8358_p1 }
 0x135   : > { %p8354_p0 = pneg %p8353_p11 }
 0x137   : > { %p8361_p2 = pnand %p8360_p13, %p8354_p0 }
 0x139   : > { %8364 = shalt.err (!%p8361_p2)
}
 0x13a   : > { %7850 = dma.hbm_to_vmem [thread:$0]  (!%p9569_p3), %s10641_s14, 16, %s1769_s21, [#allocation23]  }
 0x13b   : > { %s8365_s20 = scalar_lea.hbm %s10642_s13, 16 }
 0x13c   : > { %p8366_p4 = scmp.ne.s32.totalorder %s10642_s13, %s8365_s20  ;;  %p8372_p8 = scmp.lt.u32.totalorder %s8365_s20, %s10642_s13 }
 0x13e   : > { %p8368_p6 = pnand %p8366_p4, %p9581_p5 }
 0x140   : > { %p8369_p7 = pneg %p8368_p6 }
 0x142   : > { %p8374_p9 = pnand %p8372_p8, %p8369_p7 }
 0x144   : > { %8377 = shalt.err (!%p8374_p9)
}
 0x145   : > { %s8378_s17 = scalar_lea.vmem %s1791_s15, 16  ;;  %s8385_s10 = scalar_lea.vmem %s1791_s15, 32 }
 0x146   : > { %p8379_p10 = scmp.ne.s32.totalorder %s1791_s15, %s8378_s17  ;;  %p8386_p1 = scmp.lt.s32.totalorder %s1791_s15, %s1791_s15 }
 0x147   : > { %p8387_p12 = scmp.lt.s32.totalorder %s8385_s10, %s8378_s17 }
 0x148   : > { %p8381_p11 = pnand %p8379_p10, %p9581_p5 }
 0x149   : > { %p8388_p13 = por %p8387_p12, %p8386_p1 }
 0x14a   : > { %p8382_p0 = pneg %p8381_p11 }
 0x14c   : > { %p8389_p2 = pnand %p8388_p13, %p8382_p0 }
 0x14e   : > { %8392 = shalt.err (!%p8389_p2)
}
 0x14f   : > { %7856 = dma.hbm_to_vmem [thread:$0]  (!%p9569_p3), %s10642_s13, 16, %s1791_s15, [#allocation26]  }
 0x150   : > { %s9123_s21 = smov [#allocation28]   ;;  %s9124_s18 = smov [#allocation31]  }
 0x151   : > { %s1896_s29 = sshll.u32 %s9123_s21, 4  ;;  %s1924_s19 = sshll.u32 %s9124_s18, 4  ;;  %s1897_s29 = int_to_ptr.vmem [resolvable:$true] %s1896_s29  ;;  %s1925_s19 = int_to_ptr.vmem [resolvable:$true] %s1924_s19 }
 0x152   : > { %s8393_s20 = scalar_lea.hbm %s10644_s9, 16 }
 0x153   : > { %p8394_p4 = scmp.ne.s32.totalorder %s10644_s9, %s8393_s20  ;;  %p8400_p8 = scmp.lt.u32.totalorder %s8393_s20, %s10644_s9 }
 0x155   : > { %p8396_p6 = pnand %p8394_p4, %p9581_p5 }
 0x157   : > { %p8397_p7 = pneg %p8396_p6 }
 0x159   : > { %p8402_p9 = pnand %p8400_p8, %p8397_p7 }
 0x15b   : > { %8405 = shalt.err (!%p8402_p9)
}
 0x15c   : > { %s8406_s17 = scalar_lea.vmem %s1897_s29, 16  ;;  %s8413_s15 = scalar_lea.vmem %s1897_s29, 32 }
 0x15d   : > { %p8407_p10 = scmp.ne.s32.totalorder %s1897_s29, %s8406_s17  ;;  %p8414_p1 = scmp.lt.s32.totalorder %s1897_s29, %s1897_s29 }
 0x15e   : > { %p8415_p12 = scmp.lt.s32.totalorder %s8413_s15, %s8406_s17 }
 0x15f   : > { %p8409_p11 = pnand %p8407_p10, %p9581_p5 }
 0x160   : > { %p8416_p13 = por %p8415_p12, %p8414_p1 }
 0x161   : > { %p8410_p0 = pneg %p8409_p11 }
 0x163   : > { %p8417_p2 = pnand %p8416_p13, %p8410_p0 }
 0x165   : > { %8420 = shalt.err (!%p8417_p2)
}
 0x166   : > { %7862 = dma.hbm_to_vmem [thread:$0]  (!%p9569_p3), %s10644_s9, 16, %s1897_s29, [#allocation29]  }
 0x167   : > { %s8421_s10 = scalar_lea.hbm %s10646_s3, 16 }
 0x168   : > { %p8422_p4 = scmp.ne.s32.totalorder %s10646_s3, %s8421_s10  ;;  %p8428_p8 = scmp.lt.u32.totalorder %s8421_s10, %s10646_s3 }
 0x16a   : > { %p8424_p6 = pnand %p8422_p4, %p9581_p5 }
 0x16c   : > { %p8425_p7 = pneg %p8424_p6 }
 0x16e   : > { %p8430_p9 = pnand %p8428_p8, %p8425_p7 }
 0x170   : > { %8433 = shalt.err (!%p8430_p9)
}
 0x171   : > { %s8434_s21 = scalar_lea.vmem %s1925_s19, 16  ;;  %s8441_s18 = scalar_lea.vmem %s1925_s19, 32 }
 0x172   : > { %p8435_p10 = scmp.ne.s32.totalorder %s1925_s19, %s8434_s21  ;;  %p8442_p1 = scmp.lt.s32.totalorder %s1925_s19, %s1925_s19 }
 0x173   : > { %p8443_p12 = scmp.lt.s32.totalorder %s8441_s18, %s8434_s21 }
 0x174   : > { %p8437_p11 = pnand %p8435_p10, %p9581_p5 }
 0x175   : > { %p8444_p13 = por %p8443_p12, %p8442_p1 }
 0x176   : > { %p8438_p0 = pneg %p8437_p11 }
 0x178   : > { %p8445_p2 = pnand %p8444_p13, %p8438_p0 }
 0x17a   : > { %8448 = shalt.err (!%p8445_p2)
}
 0x17b   : > { %7868 = dma.hbm_to_vmem [thread:$0]  (!%p9569_p3), %s10646_s3, 16, %s1925_s19, [#allocation32]  }
 0x17c   : > { %s9125_s29 = smov [#allocation34]   ;;  %s9126_s17 = smov [#allocation37]  }
 0x17d   : > { %s1946_s20 = sshll.u32 %s9125_s29, 4  ;;  %s1974_s15 = sshll.u32 %s9126_s17, 4  ;;  %s1947_s20 = int_to_ptr.vmem [resolvable:$true] %s1946_s20  ;;  %s1975_s15 = int_to_ptr.vmem [resolvable:$true] %s1974_s15 }
 0x17e   : > { %s8449_s10 = scalar_lea.hbm %s10645_s4, 16 }
 0x17f   : > { %p8450_p4 = scmp.ne.s32.totalorder %s10645_s4, %s8449_s10  ;;  %p8456_p8 = scmp.lt.u32.totalorder %s8449_s10, %s10645_s4 }
 0x181   : > { %p8452_p6 = pnand %p8450_p4, %p9581_p5 }
 0x183   : > { %p8453_p7 = pneg %p8452_p6 }
 0x185   : > { %p8458_p9 = pnand %p8456_p8, %p8453_p7 }
 0x187   : > { %8461 = shalt.err (!%p8458_p9)
}
 0x188   : > { %s8462_s21 = scalar_lea.vmem %s1947_s20, 16  ;;  %s8469_s19 = scalar_lea.vmem %s1947_s20, 32 }
 0x189   : > { %p8463_p10 = scmp.ne.s32.totalorder %s1947_s20, %s8462_s21  ;;  %p8470_p1 = scmp.lt.s32.totalorder %s1947_s20, %s1947_s20 }
 0x18a   : > { %p8471_p12 = scmp.lt.s32.totalorder %s8469_s19, %s8462_s21 }
 0x18b   : > { %p8465_p11 = pnand %p8463_p10, %p9581_p5 }
 0x18c   : > { %p8472_p13 = por %p8471_p12, %p8470_p1 }
 0x18d   : > { %p8466_p0 = pneg %p8465_p11 }
 0x18f   : > { %p8473_p2 = pnand %p8472_p13, %p8466_p0 }
 0x191   : > { %8476 = shalt.err (!%p8473_p2)
}
 0x192   : > { %7874 = dma.hbm_to_vmem [thread:$0]  (!%p9569_p3), %s10645_s4, 16, %s1947_s20, [#allocation35]  }
 0x193   : > { %s8477_s18 = scalar_lea.hbm %s9479_s16, 16 }
 0x194   : > { %p8478_p4 = scmp.ne.s32.totalorder %s9479_s16, %s8477_s18  ;;  %p8484_p8 = scmp.lt.u32.totalorder %s8477_s18, %s9479_s16 }
 0x196   : > { %p8480_p6 = pnand %p8478_p4, %p9581_p5 }
 0x198   : > { %p8481_p7 = pneg %p8480_p6 }
 0x19a   : > { %p8486_p9 = pnand %p8484_p8, %p8481_p7 }
 0x19c   : > { %8489 = shalt.err (!%p8486_p9)
}
 0x19d   : > { %s8490_s29 = scalar_lea.vmem %s1975_s15, 16  ;;  %s8497_s17 = scalar_lea.vmem %s1975_s15, 32 }
 0x19e   : > { %p8491_p10 = scmp.ne.s32.totalorder %s1975_s15, %s8490_s29  ;;  %p8498_p1 = scmp.lt.s32.totalorder %s1975_s15, %s1975_s15 }
 0x19f   : > { %p8499_p12 = scmp.lt.s32.totalorder %s8497_s17, %s8490_s29 }
 0x1a0   : > { %p8493_p11 = pnand %p8491_p10, %p9581_p5 }
 0x1a1   : > { %p8500_p13 = por %p8499_p12, %p8498_p1 }
 0x1a2   : > { %p8494_p0 = pneg %p8493_p11 }
 0x1a4   : > { %p8501_p2 = pnand %p8500_p13, %p8494_p0 }
 0x1a6   : > { %8504 = shalt.err (!%p8501_p2)
}
 0x1a7   : > { %7880 = dma.hbm_to_vmem [thread:$0]  (!%p9569_p3), %s9479_s16, 16, %s1975_s15, [#allocation38]  }
 0x1a8   : > { %s9127_s20 = smov [#allocation40]   ;;  %s9128_s21 = smov [#allocation4]  }
 0x1a9   : > { %s1996_s10 = sshll.u32 %s9127_s20, 4  ;;  %s1635_s19 = sshll.u32 %s9128_s21, 4  ;;  %s1997_s10 = int_to_ptr.vmem [resolvable:$true] %s1996_s10  ;;  %s1636_s19 = int_to_ptr.vmem [resolvable:$true] %s1635_s19 }
 0x1aa   : > { %s8505_s18 = scalar_lea.hbm %s10647_s1, 16 }
 0x1ab   : > { %p8506_p4 = scmp.ne.s32.totalorder %s10647_s1, %s8505_s18  ;;  %p8512_p8 = scmp.lt.u32.totalorder %s8505_s18, %s10647_s1 }
 0x1ad   : > { %p8508_p6 = pnand %p8506_p4, %p9581_p5 }
 0x1af   : > { %p8509_p7 = pneg %p8508_p6 }
 0x1b1   : > { %p8514_p9 = pnand %p8512_p8, %p8509_p7 }
 0x1b3   : > { %8517 = shalt.err (!%p8514_p9)
}
 0x1b4   : > { %s8518_s29 = scalar_lea.vmem %s1997_s10, 16  ;;  %s8525_s15 = scalar_lea.vmem %s1997_s10, 32 }
 0x1b5   : > { %p8519_p10 = scmp.ne.s32.totalorder %s1997_s10, %s8518_s29  ;;  %p8526_p1 = scmp.lt.s32.totalorder %s1997_s10, %s1997_s10 }
 0x1b6   : > { %p8527_p12 = scmp.lt.s32.totalorder %s8525_s15, %s8518_s29 }
 0x1b7   : > { %p8521_p11 = pnand %p8519_p10, %p9581_p5 }
 0x1b8   : > { %p8528_p13 = por %p8527_p12, %p8526_p1 }
 0x1b9   : > { %p8522_p0 = pneg %p8521_p11 }
 0x1bb   : > { %p8529_p2 = pnand %p8528_p13, %p8522_p0 }
 0x1bd   : > { %8532 = shalt.err (!%p8529_p2)
}
 0x1be   : > { %7886 = dma.hbm_to_vmem [thread:$0]  (!%p9569_p3), %s10647_s1, 16, %s1997_s10, [#allocation41]  }
 0x1bf   : > { %s8533_s17 = scalar_lea.hbm %s9194_s25, 16 }
 0x1c0   : > { %p8534_p4 = scmp.ne.s32.totalorder %s9194_s25, %s8533_s17  ;;  %p8540_p8 = scmp.lt.u32.totalorder %s8533_s17, %s9194_s25 }
 0x1c2   : > { %p8536_p6 = pnand %p8534_p4, %p9581_p5 }
 0x1c4   : > { %p8537_p7 = pneg %p8536_p6 }
 0x1c6   : > { %p8542_p9 = pnand %p8540_p8, %p8537_p7 }
 0x1c8   : > { %8545 = shalt.err (!%p8542_p9)
}
 0x1c9   : > { %s8546_s20 = scalar_lea.vmem %s1636_s19, 16  ;;  %s8553_s21 = scalar_lea.vmem %s1636_s19, 32 }
 0x1ca   : > { %p8547_p10 = scmp.ne.s32.totalorder %s1636_s19, %s8546_s20  ;;  %p8554_p1 = scmp.lt.s32.totalorder %s1636_s19, %s1636_s19 }
 0x1cb   : > { %p8555_p12 = scmp.lt.s32.totalorder %s8553_s21, %s8546_s20 }
 0x1cc   : > { %p8549_p11 = pnand %p8547_p10, %p9581_p5 }
 0x1cd   : > { %p8556_p13 = por %p8555_p12, %p8554_p1 }
 0x1ce   : > { %p8550_p0 = pneg %p8549_p11 }
 0x1d0   : > { %p8557_p2 = pnand %p8556_p13, %p8550_p0 }
 0x1d2   : > { %8560 = shalt.err (!%p8557_p2)
}
 0x1d3   : > { %s10659_s10 = sld [smem:[#allocation68_spill]]  ;;  %s9129_s18 = smov [#allocation9]  }
 0x1d4   : > { %7817 = dma.hbm_to_vmem [thread:$0]  (!%p9569_p3), %s9194_s25, 16, %s1636_s19, [#allocation5]  }
 0x1d5   : > { %s1660_s29 = sshll.u32 %s9129_s18, 4  ;;  %s9130_s15 = smov [#allocation12]   ;;  %s1661_s29 = int_to_ptr.vmem [resolvable:$true] %s1660_s29 }
 0x1d6   : > { %s1685_s17 = sshll.u32 %s9130_s15, 4  ;;  %s1686_s17 = int_to_ptr.vmem [resolvable:$true] %s1685_s17 }
 0x1d9   : > { %s8561_s1 = scalar_lea.hbm %s10659_s10, 16 }
 0x1da   : > { %p8562_p4 = scmp.ne.s32.totalorder %s10659_s10, %s8561_s1  ;;  %p8568_p8 = scmp.lt.u32.totalorder %s8561_s1, %s10659_s10 }
 0x1dc   : > { %p8564_p6 = pnand %p8562_p4, %p9581_p5 }
 0x1de   : > { %p8565_p7 = pneg %p8564_p6 }
 0x1e0   : > { %p8570_p9 = pnand %p8568_p8, %p8565_p7 }
 0x1e2   : > { %8573 = shalt.err (!%p8570_p9)
}
 0x1e3   : > { %s8574_s20 = scalar_lea.vmem %s1661_s29, 16  ;;  %s8581_s19 = scalar_lea.vmem %s1661_s29, 32 }
 0x1e4   : > { %p8575_p10 = scmp.ne.s32.totalorder %s1661_s29, %s8574_s20  ;;  %p8582_p1 = scmp.lt.s32.totalorder %s1661_s29, %s1661_s29 }
 0x1e5   : > { %p8583_p12 = scmp.lt.s32.totalorder %s8581_s19, %s8574_s20 }
 0x1e6   : > { %p8577_p11 = pnand %p8575_p10, %p9581_p5 }
 0x1e7   : > { %p8584_p13 = por %p8583_p12, %p8582_p1 }
 0x1e8   : > { %p8578_p0 = pneg %p8577_p11 }
 0x1ea   : > { %p8585_p2 = pnand %p8584_p13, %p8578_p0 }
 0x1ec   : > { %8588 = shalt.err (!%p8585_p2)
}
 0x1ed   : > { %s10660_s21 = sld [smem:[#allocation71_spill]] }
 0x1ee   : > { %7823 = dma.hbm_to_vmem [thread:$0]  (!%p9569_p3), %s10659_s10, 16, %s1661_s29, [#allocation8]  }
 0x1f3   : > { %s8589_s1 = scalar_lea.hbm %s10660_s21, 128 }
 0x1f4   : > { %p8590_p4 = scmp.ne.s32.totalorder %s10660_s21, %s8589_s1  ;;  %p8596_p8 = scmp.lt.u32.totalorder %s8589_s1, %s10660_s21 }
 0x1f6   : > { %p8592_p6 = pnand %p8590_p4, %p9581_p5 }
 0x1f8   : > { %p8593_p7 = pneg %p8592_p6 }
 0x1fa   : > { %p8598_p9 = pnand %p8596_p8, %p8593_p7 }
 0x1fc   : > { %8601 = shalt.err (!%p8598_p9)
}
 0x1fd   : > { %s8602_s18 = scalar_lea.vmem %s1686_s17, 128  ;;  %p8610_p1 = scmp.lt.s32.totalorder %s1686_s17, %s1686_s17 }
 0x1fe   : > { %p8603_p10 = scmp.ne.s32.totalorder %s1686_s17, %s8602_s18  ;;  %p8611_p12 = scmp.lt.s32.totalorder %s8602_s18, %s8602_s18 }
 0x200   : > { %p8605_p11 = pnand %p8603_p10, %p9581_p5  ;;  %p8612_p13 = por %p8611_p12, %p8610_p1 }
 0x202   : > { %p8606_p0 = pneg %p8605_p11 }
 0x204   : > { %p8613_p2 = pnand %p8612_p13, %p8606_p0 }
 0x206   : > { %8616 = shalt.err (!%p8613_p2)
}
 0x207   : > { %s10661_s29 = sld [smem:[#allocation72_spill]]  ;;  %s9131_s15 = smov [#allocation15]  }
 0x208   : > { %7829 = dma.hbm_to_vmem [thread:$0]  (!%p9569_p3), %s10660_s21, 128, %s1686_s17, [#allocation11]  }
 0x209   : > { %s1707_s20 = sshll.u32 %s9131_s15, 4  ;;  %s9132_s19 = smov [#allocation18]   ;;  %s1708_s20 = int_to_ptr.vmem [resolvable:$true] %s1707_s20 }
 0x20a   : > { %s1729_s1 = sshll.u32 %s9132_s19, 4  ;;  %s1730_s1 = int_to_ptr.vmem [resolvable:$true] %s1729_s1 }
 0x20d   : > { %s8617_s3 = scalar_lea.hbm %s10661_s29, 16 }
 0x20e   : > { %p8618_p4 = scmp.ne.s32.totalorder %s10661_s29, %s8617_s3  ;;  %p8624_p8 = scmp.lt.u32.totalorder %s8617_s3, %s10661_s29 }
 0x210   : > { %p8620_p6 = pnand %p8618_p4, %p9581_p5 }
 0x212   : > { %p8621_p7 = pneg %p8620_p6 }
 0x214   : > { %p8626_p9 = pnand %p8624_p8, %p8621_p7 }
 0x216   : > { %8629 = shalt.err (!%p8626_p9)
}
 0x217   : > { %s8630_s18 = scalar_lea.vmem %s1708_s20, 16  ;;  %s8637_s17 = scalar_lea.vmem %s1708_s20, 32 }
 0x218   : > { %p8631_p10 = scmp.ne.s32.totalorder %s1708_s20, %s8630_s18  ;;  %p8638_p1 = scmp.lt.s32.totalorder %s1708_s20, %s1708_s20 }
 0x219   : > { %p8639_p12 = scmp.lt.s32.totalorder %s8637_s17, %s8630_s18 }
 0x21a   : > { %p8633_p11 = pnand %p8631_p10, %p9581_p5 }
 0x21b   : > { %p8640_p13 = por %p8639_p12, %p8638_p1 }
 0x21c   : > { %p8634_p0 = pneg %p8633_p11 }
 0x21e   : > { %p8641_p2 = pnand %p8640_p13, %p8634_p0 }
 0x220   : > { %8644 = shalt.err (!%p8641_p2)
}
 0x221   : > { %s10662_s15 = sld [smem:[#allocation74_spill]] }
 0x222   : > { %7835 = dma.hbm_to_vmem [thread:$0]  (!%p9569_p3), %s10661_s29, 16, %s1708_s20, [#allocation14]  }
 0x227   : > { %s8645_s3 = scalar_lea.hbm %s10662_s15, 16 }
 0x228   : > { %p8646_p4 = scmp.ne.s32.totalorder %s10662_s15, %s8645_s3  ;;  %p8652_p8 = scmp.lt.u32.totalorder %s8645_s3, %s10662_s15 }
 0x22a   : > { %p8648_p6 = pnand %p8646_p4, %p9581_p5 }
 0x22c   : > { %p8649_p7 = pneg %p8648_p6 }
 0x22e   : > { %p8654_p9 = pnand %p8652_p8, %p8649_p7 }
 0x230   : > { %8657 = shalt.err (!%p8654_p9)
}
 0x231   : > { %s8658_s19 = scalar_lea.vmem %s1730_s1, 16  ;;  %s8665_s18 = scalar_lea.vmem %s1730_s1, 32 }
 0x232   : > { %p8659_p10 = scmp.ne.s32.totalorder %s1730_s1, %s8658_s19  ;;  %p8666_p1 = scmp.lt.s32.totalorder %s1730_s1, %s1730_s1 }
 0x233   : > { %p8667_p12 = scmp.lt.s32.totalorder %s8665_s18, %s8658_s19 }
 0x234   : > { %p8661_p11 = pnand %p8659_p10, %p9581_p5 }
 0x235   : > { %p8668_p13 = por %p8667_p12, %p8666_p1 }
 0x236   : > { %p8662_p0 = pneg %p8661_p11 }
 0x238   : > { %p8669_p2 = pnand %p8668_p13, %p8662_p0 }
 0x23a   : > { %8672 = shalt.err (!%p8669_p2)
}
 0x23b   : > { %s10663_s20 = sld [smem:[#allocation76_spill]]  ;;  %s9133_s17 = smov [#allocation21]  }
 0x23c   : > { %7841 = dma.hbm_to_vmem [thread:$0]  (!%p9569_p3), %s10662_s15, 16, %s1730_s1, [#allocation17]  }
 0x23d   : > { %s1754_s3 = sshll.u32 %s9133_s17, 4  ;;  %s9134_s4 = smov [#allocation24]   ;;  %s1755_s3 = int_to_ptr.vmem [resolvable:$true] %s1754_s3 }
 0x23e   : > { %s1779_s9 = sshll.u32 %s9134_s4, 4  ;;  %s1780_s9 = int_to_ptr.vmem [resolvable:$true] %s1779_s9 }
 0x241   : > { %s8673_s10 = scalar_lea.hbm %s10663_s20, 16 }
 0x242   : > { %p8674_p4 = scmp.ne.s32.totalorder %s10663_s20, %s8673_s10  ;;  %p8680_p8 = scmp.lt.u32.totalorder %s8673_s10, %s10663_s20 }
 0x244   : > { %p8676_p6 = pnand %p8674_p4, %p9581_p5 }
 0x246   : > { %p8677_p7 = pneg %p8676_p6 }
 0x248   : > { %p8682_p9 = pnand %p8680_p8, %p8677_p7 }
 0x24a   : > { %8685 = shalt.err (!%p8682_p9)
}
 0x24b   : > { %s8686_s19 = scalar_lea.vmem %s1755_s3, 16  ;;  %s8693_s1 = scalar_lea.vmem %s1755_s3, 32 }
 0x24c   : > { %p8687_p10 = scmp.ne.s32.totalorder %s1755_s3, %s8686_s19  ;;  %p8694_p1 = scmp.lt.s32.totalorder %s1755_s3, %s1755_s3 }
 0x24d   : > { %p8695_p12 = scmp.lt.s32.totalorder %s8693_s1, %s8686_s19 }
 0x24e   : > { %p8689_p11 = pnand %p8687_p10, %p9581_p5 }
 0x24f   : > { %p8696_p13 = por %p8695_p12, %p8694_p1 }
 0x250   : > { %p8690_p0 = pneg %p8689_p11 }
 0x252   : > { %p8697_p2 = pnand %p8696_p13, %p8690_p0 }
 0x254   : > { %8700 = shalt.err (!%p8697_p2)
}
 0x255   : > { %s10664_s4 = sld [smem:[#allocation79_spill]] }
 0x256   : > { %7847 = dma.hbm_to_vmem [thread:$0]  (!%p9569_p3), %s10663_s20, 16, %s1755_s3, [#allocation20]  }
 0x25b   : > { %s8701_s10 = scalar_lea.hbm %s10664_s4, 16 }
 0x25c   : > { %p8702_p4 = scmp.ne.s32.totalorder %s10664_s4, %s8701_s10  ;;  %p8708_p8 = scmp.lt.u32.totalorder %s8701_s10, %s10664_s4 }
 0x25e   : > { %p8704_p6 = pnand %p8702_p4, %p9581_p5 }
 0x260   : > { %p8705_p7 = pneg %p8704_p6 }
 0x262   : > { %p8710_p9 = pnand %p8708_p8, %p8705_p7 }
 0x264   : > { %8713 = shalt.err (!%p8710_p9)
}
 0x265   : > { %s8714_s18 = scalar_lea.vmem %s1780_s9, 16  ;;  %s8721_s17 = scalar_lea.vmem %s1780_s9, 32 }
 0x266   : > { %p8715_p10 = scmp.ne.s32.totalorder %s1780_s9, %s8714_s18  ;;  %p8722_p1 = scmp.lt.s32.totalorder %s1780_s9, %s1780_s9 }
 0x267   : > { %p8723_p12 = scmp.lt.s32.totalorder %s8721_s17, %s8714_s18 }
 0x268   : > { %p8717_p11 = pnand %p8715_p10, %p9581_p5 }
 0x269   : > { %p8724_p13 = por %p8723_p12, %p8722_p1 }
 0x26a   : > { %p8718_p0 = pneg %p8717_p11 }
 0x26c   : > { %p8725_p2 = pnand %p8724_p13, %p8718_p0 }
 0x26e   : > { %8728 = shalt.err (!%p8725_p2)
}
 0x26f   : > { %s10665_s3 = sld [smem:[#allocation81_spill]]  ;;  %s9135_s19 = smov [#allocation27]  }
 0x270   : > { %7853 = dma.hbm_to_vmem [thread:$0]  (!%p9569_p3), %s10664_s4, 16, %s1780_s9, [#allocation23]  }
 0x271   : > { %s1801_s1 = sshll.u32 %s9135_s19, 4  ;;  %s9136_s10 = smov [#allocation30]   ;;  %s1802_s1 = int_to_ptr.vmem [resolvable:$true] %s1801_s1 }
 0x272   : > { %s1907_s12 = sshll.u32 %s9136_s10, 4  ;;  %s1908_s12 = int_to_ptr.vmem [resolvable:$true] %s1907_s12 }
 0x275   : > { %s8729_s13 = scalar_lea.hbm %s10665_s3, 16 }
 0x276   : > { %p8730_p4 = scmp.ne.s32.totalorder %s10665_s3, %s8729_s13  ;;  %p8736_p8 = scmp.lt.u32.totalorder %s8729_s13, %s10665_s3 }
 0x278   : > { %p8732_p6 = pnand %p8730_p4, %p9581_p5 }
 0x27a   : > { %p8733_p7 = pneg %p8732_p6 }
 0x27c   : > { %p8738_p9 = pnand %p8736_p8, %p8733_p7 }
 0x27e   : > { %8741 = shalt.err (!%p8738_p9)
}
 0x27f   : > { %s8742_s18 = scalar_lea.vmem %s1802_s1, 16  ;;  %s8749_s9 = scalar_lea.vmem %s1802_s1, 32 }
 0x280   : > { %p8743_p10 = scmp.ne.s32.totalorder %s1802_s1, %s8742_s18  ;;  %p8750_p1 = scmp.lt.s32.totalorder %s1802_s1, %s1802_s1 }
 0x281   : > { %p8751_p12 = scmp.lt.s32.totalorder %s8749_s9, %s8742_s18 }
 0x282   : > { %p8745_p11 = pnand %p8743_p10, %p9581_p5 }
 0x283   : > { %p8752_p13 = por %p8751_p12, %p8750_p1 }
 0x284   : > { %p8746_p0 = pneg %p8745_p11 }
 0x286   : > { %p8753_p2 = pnand %p8752_p13, %p8746_p0 }
 0x288   : > { %8756 = shalt.err (!%p8753_p2)
}
 0x289   : > { %s10666_s17 = sld [smem:[#allocation111_spill]] }
 0x28a   : > { %7859 = dma.hbm_to_vmem [thread:$0]  (!%p9569_p3), %s10665_s3, 16, %s1802_s1, [#allocation26]  }
 0x28f   : > { %s10667_s19 = smov %s10666_s17  ;;  %s8757_s13 = scalar_lea.hbm %s10666_s17, 16 }
 0x290   : > { %p8758_p4 = scmp.ne.s32.totalorder %s10667_s19, %s8757_s13  ;;  %p8764_p8 = scmp.lt.u32.totalorder %s8757_s13, %s10667_s19 }
 0x292   : > { %p8760_p6 = pnand %p8758_p4, %p9581_p5 }
 0x294   : > { %p8761_p7 = pneg %p8760_p6 }
 0x296   : > { %p8766_p9 = pnand %p8764_p8, %p8761_p7 }
 0x298   : > { %8769 = shalt.err (!%p8766_p9)
}
 0x299   : > { %s8770_s10 = scalar_lea.vmem %s1908_s12, 16  ;;  %s8777_s18 = scalar_lea.vmem %s1908_s12, 32 }
 0x29a   : > { %p8771_p10 = scmp.ne.s32.totalorder %s1908_s12, %s8770_s10  ;;  %p8778_p1 = scmp.lt.s32.totalorder %s1908_s12, %s1908_s12 }
 0x29b   : > { %p8779_p12 = scmp.lt.s32.totalorder %s8777_s18, %s8770_s10 }
 0x29c   : > { %p8773_p11 = pnand %p8771_p10, %p9581_p5 }
 0x29d   : > { %p8780_p13 = por %p8779_p12, %p8778_p1 }
 0x29e   : > { %p8774_p0 = pneg %p8773_p11 }
 0x2a0   : > { %p8781_p2 = pnand %p8780_p13, %p8774_p0 }
 0x2a2   : > { %8784 = shalt.err (!%p8781_p2)
}
 0x2a3   : > { %s10668_s1 = sld [smem:[#allocation115_spill]]  ;;  %s9137_s9 = smov [#allocation33]  }
 0x2a4   : > { %7865 = dma.hbm_to_vmem [thread:$0]  (!%p9569_p3), %s10667_s19, 16, %s1908_s12, [#allocation29]  }
 0x2a5   : > { %s1935_s17 = sshll.u32 %s9137_s9, 4  ;;  %s9138_s13 = smov [#allocation36]   ;;  %s1936_s17 = int_to_ptr.vmem [resolvable:$true] %s1935_s17 }
 0x2a6   : > { %s1957_s3 = sshll.u32 %s9138_s13, 4  ;;  %s1958_s3 = int_to_ptr.vmem [resolvable:$true] %s1957_s3 }
 0x2a9   : > { %s8785_s4 = scalar_lea.hbm %s10668_s1, 16 }
 0x2aa   : > { %p8786_p4 = scmp.ne.s32.totalorder %s10668_s1, %s8785_s4  ;;  %p8792_p8 = scmp.lt.u32.totalorder %s8785_s4, %s10668_s1 }
 0x2ac   : > { %p8788_p6 = pnand %p8786_p4, %p9581_p5 }
 0x2ae   : > { %p8789_p7 = pneg %p8788_p6 }
 0x2b0   : > { %p8794_p9 = pnand %p8792_p8, %p8789_p7 }
 0x2b2   : > { %8797 = shalt.err (!%p8794_p9)
}
 0x2b3   : > { %s8798_s10 = scalar_lea.vmem %s1936_s17, 16  ;;  %s8805_s12 = scalar_lea.vmem %s1936_s17, 32 }
 0x2b4   : > { %p8799_p10 = scmp.ne.s32.totalorder %s1936_s17, %s8798_s10  ;;  %p8806_p1 = scmp.lt.s32.totalorder %s1936_s17, %s1936_s17 }
 0x2b5   : > { %p8807_p12 = scmp.lt.s32.totalorder %s8805_s12, %s8798_s10 }
 0x2b6   : > { %p8801_p11 = pnand %p8799_p10, %p9581_p5 }
 0x2b7   : > { %p8808_p13 = por %p8807_p12, %p8806_p1 }
 0x2b8   : > { %p8802_p0 = pneg %p8801_p11 }
 0x2ba   : > { %p8809_p2 = pnand %p8808_p13, %p8802_p0 }
 0x2bc   : > { %8812 = shalt.err (!%p8809_p2)
}
 0x2bd   : > { %s10669_s18 = sld [smem:[#allocation117_spill]] }
 0x2be   : > { %7871 = dma.hbm_to_vmem [thread:$0]  (!%p9569_p3), %s10668_s1, 16, %s1936_s17, [#allocation32]  }
 0x2c3   : > { %s8813_s4 = scalar_lea.hbm %s10669_s18, 16 }
 0x2c4   : > { %p8814_p4 = scmp.ne.s32.totalorder %s10669_s18, %s8813_s4  ;;  %p8820_p8 = scmp.lt.u32.totalorder %s8813_s4, %s10669_s18 }
 0x2c6   : > { %p8816_p6 = pnand %p8814_p4, %p9581_p5 }
 0x2c8   : > { %p8817_p7 = pneg %p8816_p6 }
 0x2ca   : > { %p8822_p9 = pnand %p8820_p8, %p8817_p7 }
 0x2cc   : > { %8825 = shalt.err (!%p8822_p9)
}
 0x2cd   : > { %s8826_s9 = scalar_lea.vmem %s1958_s3, 16  ;;  %s8833_s13 = scalar_lea.vmem %s1958_s3, 32 }
 0x2ce   : > { %p8827_p10 = scmp.ne.s32.totalorder %s1958_s3, %s8826_s9  ;;  %p8834_p1 = scmp.lt.s32.totalorder %s1958_s3, %s1958_s3 }
 0x2cf   : > { %p8835_p12 = scmp.lt.s32.totalorder %s8833_s13, %s8826_s9 }
 0x2d0   : > { %p8829_p11 = pnand %p8827_p10, %p9581_p5 }
 0x2d1   : > { %p8836_p13 = por %p8835_p12, %p8834_p1 }
 0x2d2   : > { %p8830_p0 = pneg %p8829_p11 }
 0x2d4   : > { %p8837_p2 = pnand %p8836_p13, %p8830_p0 }
 0x2d6   : > { %8840 = shalt.err (!%p8837_p2)
}
 0x2d7   : > { %s10670_s17 = sld [smem:[#allocation120_spill]]  ;;  %s9139_s12 = smov [#allocation39]  }
 0x2d8   : > { %7877 = dma.hbm_to_vmem [thread:$0]  (!%p9569_p3), %s10669_s18, 16, %s1958_s3, [#allocation35]  }
 0x2d9   : > { %s1985_s4 = sshll.u32 %s9139_s12, 4  ;;  %s9140_s1 = smov [#allocation42]   ;;  %s1986_s4 = int_to_ptr.vmem [resolvable:$true] %s1985_s4 }
 0x2da   : > { %s2007_s14 = sshll.u32 %s9140_s1, 4  ;;  %s2008_s14 = int_to_ptr.vmem [resolvable:$true] %s2007_s14 }
 0x2dd   : > { %s10671_s10 = smov %s10670_s17  ;;  %s8841_s15 = scalar_lea.hbm %s10670_s17, 16 }
 0x2de   : > { %p8842_p4 = scmp.ne.s32.totalorder %s10671_s10, %s8841_s15  ;;  %p8848_p8 = scmp.lt.u32.totalorder %s8841_s15, %s10671_s10 }
 0x2e0   : > { %p8844_p6 = pnand %p8842_p4, %p9581_p5 }
 0x2e2   : > { %p8845_p7 = pneg %p8844_p6 }
 0x2e4   : > { %p8850_p9 = pnand %p8848_p8, %p8845_p7 }
 0x2e6   : > { %8853 = shalt.err (!%p8850_p9)
}
 0x2e7   : > { %s8854_s9 = scalar_lea.vmem %s1986_s4, 16  ;;  %s8861_s3 = scalar_lea.vmem %s1986_s4, 32 }
 0x2e8   : > { %p8855_p10 = scmp.ne.s32.totalorder %s1986_s4, %s8854_s9  ;;  %p8862_p1 = scmp.lt.s32.totalorder %s1986_s4, %s1986_s4 }
 0x2e9   : > { %p8863_p12 = scmp.lt.s32.totalorder %s8861_s3, %s8854_s9 }
 0x2ea   : > { %p8857_p11 = pnand %p8855_p10, %p9581_p5 }
 0x2eb   : > { %p8864_p13 = por %p8863_p12, %p8862_p1 }
 0x2ec   : > { %p8858_p0 = pneg %p8857_p11 }
 0x2ee   : > { %p8865_p2 = pnand %p8864_p13, %p8858_p0 }
 0x2f0   : > { %8868 = shalt.err (!%p8865_p2)
}
 0x2f1   : > { %7883 = dma.hbm_to_vmem [thread:$0]  (!%p9569_p3), %s10671_s10, 16, %s1986_s4, [#allocation38]  }
 0x2f2   : > { %s8869_s15 = scalar_lea.hbm %s10640_s6, 16 }
 0x2f3   : > { %p8870_p4 = scmp.ne.s32.totalorder %s10640_s6, %s8869_s15  ;;  %p8876_p8 = scmp.lt.u32.totalorder %s8869_s15, %s10640_s6 }
 0x2f5   : > { %p8872_p6 = pnand %p8870_p4, %p9581_p5 }
 0x2f7   : > { %p8873_p7 = pneg %p8872_p6 }
 0x2f9   : > { %p8878_p9 = pnand %p8876_p8, %p8873_p7 }
 0x2fb   : > { %8881 = shalt.err (!%p8878_p9)
}
 0x2fc   : > { %s8882_s1 = scalar_lea.vmem %s2008_s14, 16  ;;  %s8889_s13 = scalar_lea.vmem %s2008_s14, 32 }
 0x2fd   : > { %p8883_p10 = scmp.ne.s32.totalorder %s2008_s14, %s8882_s1  ;;  %p8890_p1 = scmp.lt.s32.totalorder %s2008_s14, %s2008_s14 }
 0x2fe   : > { %p8891_p12 = scmp.lt.s32.totalorder %s8889_s13, %s8882_s1 }
 0x2ff   : > { %p8885_p11 = pnand %p8883_p10, %p9581_p5 }
 0x300   : > { %p8892_p13 = por %p8891_p12, %p8890_p1 }
 0x301   : > { %p8886_p0 = pneg %p8885_p11 }
 0x303   : > { %p8893_p2 = pnand %p8892_p13, %p8886_p0 }
 0x305   : > { %8896 = shalt.err (!%p8893_p2)
}
 0x306   : > { %7889 = dma.hbm_to_vmem [thread:$0]  (!%p9569_p3), %s10640_s6, 16, %s2008_s14, [#allocation41]  }
 0x307   : > { %s9141_s17 = smov [#allocation43]   ;;  %s8897_s4 = scalar_lea.hbm %s9499_s24, 16 }
 0x308   : > { %s2018_s12 = sshll.u32 %s9141_s17, 4  ;;  %p8898_p4 = scmp.ne.s32.totalorder %s9499_s24, %s8897_s4  ;;  %s2019_s12 = int_to_ptr.vmem [resolvable:$true] %s2018_s12 }
 0x309   : > { %p8904_p8 = scmp.lt.u32.totalorder %s8897_s4, %s9499_s24 }
 0x30a   : > { %p8900_p6 = pnand %p8898_p4, %p9581_p5 }
 0x30c   : > { %p8901_p7 = pneg %p8900_p6 }
 0x30e   : > { %p8906_p9 = pnand %p8904_p8, %p8901_p7 }
 0x310   : > { %8909 = shalt.err (!%p8906_p9)
}
 0x311   : > { %s8910_s9 = scalar_lea.vmem %s2019_s12, 16  ;;  %s8917_s3 = scalar_lea.vmem %s2019_s12, 32 }
 0x312   : > { %p8911_p10 = scmp.ne.s32.totalorder %s2019_s12, %s8910_s9  ;;  %p8918_p1 = scmp.lt.s32.totalorder %s2019_s12, %s2019_s12 }
 0x313   : > { %p8919_p12 = scmp.lt.s32.totalorder %s8917_s3, %s8910_s9 }
 0x314   : > { %p8913_p11 = pnand %p8911_p10, %p9581_p5 }
 0x315   : > { %p8920_p13 = por %p8919_p12, %p8918_p1 }
 0x316   : > { %p8914_p0 = pneg %p8913_p11 }
 0x318   : > { %p8921_p2 = pnand %p8920_p13, %p8914_p0 }
 0x31a   : > { %8924 = shalt.err (!%p8921_p2)
}
 0x31b   : > { %7892 = dma.hbm_to_vmem [thread:$0]  (!%p9569_p3), %s9499_s24, 16, %s2019_s12, [#allocation44]  }
 0x31c   : > { %p10672_p4 = scmp.ne.s32.totalorder %s10656_s28, 0 }
 0x31d   : > { %p10673_p6 = scmp.eq.s32.totalorder (!%p10672_p4), %s9533_s11, 0 }
 0x31e   : > { %2041 = sbr.rel (%p10672_p4) target bundleno = 11813 (0x2e25), region = 288 }
 0x325   : > { %8972 = dma.done.wait (%p10673_p6), [#allocation5], 16   ;;  %p10674_p7 = pmov %p10673_p6 }
 0x326   : > { %p10675_p5 = pmov %p10673_p6 }
 0x327   : > { %8974 = vsyncadd (%p10674_p7), [#allocation5], 4294967280 }
 0x328   : > { %8976 = dma.done.wait (%p10675_p5), [#allocation8], 32   ;;  %p10676_p8 = pmov %p10675_p5 }
 0x329   : > { %p10677_p9 = pmov %p10675_p5 }
 0x32a   : > { %8978 = vsyncadd (%p10676_p8), [#allocation8], 4294967264 }
 0x32b   : > { %8980 = dma.done.wait (%p10677_p9), [#allocation11], 144   ;;  %p10678_p3 = pmov %p10675_p5 }
 0x32d   : > { %8982 = vsyncadd (%p10678_p3), [#allocation11], 4294967152  ;;  %p10679_p10 = pmov %p10678_p3 }
 0x32e   : > { %p10680_p11 = pmov %p10678_p3 }
 0x32f   : > { %8984 = dma.done.wait (%p10679_p10), [#allocation14], 32  }
 0x330   : > { %8986 = vsyncadd (%p10680_p11), [#allocation14], 4294967264  ;;  %p10681_p0 = pmov %p10678_p3 }
 0x332   : > { %8988 = dma.done.wait (%p10681_p0), [#allocation17], 32   ;;  %p10682_p1 = pmov %p10681_p0 }
 0x333   : > { %p10683_p12 = pmov %p10681_p0 }
 0x334   : > { %8990 = vsyncadd (%p10682_p1), [#allocation17], 4294967264 }
 0x335   : > { %8992 = dma.done.wait (%p10683_p12), [#allocation20], 32   ;;  %p10684_p13 = pmov %p10681_p0 }
 0x336   : > { %p10685_p2 = pmov %p10681_p0 }
 0x337   : > { %8994 = vsyncadd (%p10684_p13), [#allocation20], 4294967264 }
 0x338   : > { %8996 = dma.done.wait (%p10685_p2), [#allocation23], 32   ;;  %p10686_p4 = pmov %p10681_p0 }
 0x339   : > { %p10687_p6 = pmov %p10681_p0 }
 0x33a   : > { %8998 = vsyncadd (%p10686_p4), [#allocation23], 4294967264 }
 0x33b   : > { %9000 = dma.done.wait (%p10687_p6), [#allocation26], 32   ;;  %p10688_p7 = pmov %p10681_p0 }
 0x33c   : > { %p10689_p5 = pmov %p10681_p0 }
 0x33d   : > { %9002 = vsyncadd (%p10688_p7), [#allocation26], 4294967264 }
 0x33e   : > { %9004 = dma.done.wait (%p10689_p5), [#allocation29], 32   ;;  %p10690_p8 = pmov %p10681_p0 }
 0x33f   : > { %p10691_p9 = pmov %p10681_p0 }
 0x340   : > { %9006 = vsyncadd (%p10690_p8), [#allocation29], 4294967264 }
 0x341   : > { %9008 = dma.done.wait (%p10691_p9), [#allocation32], 32   ;;  %p10692_p3 = pmov %p10681_p0 }
 0x342   : > { %p10693_p10 = pmov %p10681_p0 }
 0x343   : > { %9010 = vsyncadd (%p10692_p3), [#allocation32], 4294967264 }
 0x344   : > { %9012 = dma.done.wait (%p10693_p10), [#allocation35], 32   ;;  %p10694_p11 = pmov %p10681_p0 }
 0x346   : > { %9014 = vsyncadd (%p10694_p11), [#allocation35], 4294967264 }
 0x347   : > { %9016 = dma.done.wait (%p10681_p0), [#allocation38], 32   ;;  %p10695_p1 = pmov %p10681_p0 }
 0x348   : > { %p10696_p12 = pmov %p10681_p0 }
 0x349   : > { %9018 = vsyncadd (%p10695_p1), [#allocation38], 4294967264 }
 0x34a   : > { %9020 = dma.done.wait (%p10696_p12), [#allocation41], 32   ;;  %p10697_p13 = pmov %p10681_p0 }
 0x34b   : > { %p10698_p2 = pmov %p10681_p0 }
 0x34c   : > { %9022 = vsyncadd (%p10697_p13), [#allocation41], 4294967264 }
 0x34d   : > { %9024 = dma.done.wait (%p10698_p2), [#allocation44], 16   ;;  %p10699_p4 = pmov %p10681_p0 }
 0x34e   : > { %s10700_s14 = sld [smem:[#allocation64_spill]]  ;;  %p2292_p6 = scmp.lt.s32.totalorder %s9533_s11, 1  ;;  %v9142_v0 = vmov 0.0|0.0   ;;  %vm9143_vm0 = vmmov 0   ;;  %v9144_v1 = vmov 0.0   ;;  %vm2309_vm1 = vcmask 261120  }
 0x34f   : > { %9026 = vsyncadd (%p10699_p4), [#allocation44], 4294967280  ;;  %7576 = vmatprep.subr.bf16.mxu0 %v9142_v0  ;;  %s10701_s22 = sld [smem:[#allocation62_spill]]  ;;  %7224 = vmatprep.mubr.msk.f32.mxu0 %vm9143_vm0, %v9144_v1  ;;  %s10702_s2 = sld [smem:[#allocation63_spill]]  ;;  %v6950_v29 = vld [vmem:[#allocation27] ss:$0 sm:$0xff] }
 0x350   : > { %7582 = vmatprep.subr.bf16.mxu1 %v9142_v0  ;;  %7235 = vmatprep.mubr.msk.f32.mxu1 %vm9143_vm0, %v9144_v1  ;;  %s2293_s28 = scalar_select %p2292_p6, %s9533_s11, 1  ;;  %v6951_v31 = vld [vmem:[#allocation25] ss:$0 sm:$0xff]  ;;  %v6952_v46 = vld [vmem:[#allocation22] ss:$0 sm:$0xff]  ;;  %vm2545_vm2 = vcmask 523264  }
 0x351   : > { %s10703_s13 = sld [smem:[#allocation82_spill]]  ;;  %s10704_s17 = sld [smem:[#allocation83_spill]]  ;;  %v6955_v55 = vld [vmem:[#allocation24] ss:$0 sm:$0xff]  ;;  %vm2746_vm5 = vcmask 64512   ;;  %vm4076_vm10 = vcmask 130048  }
 0x352   : > { %s6942_s15 = sshll.u32 %s2293_s28, 3  ;;  %s10706_s4 = sld [smem:[#allocation75_spill]]  ;;  %vm4078_vm11 = vcmask 195584  }
 0x353   : > { %s10563_s9 = smov 96   ;;  %s10707_s3 = sld [smem:[#allocation77_spill]] }
 0x354   : > { %v2298_v2 = vld [vmem:[%s10700_s14] sm:$0xff]  ;;  %v2299_v3 = vld [vmem:[%s10700_s14 + $0x8] sm:$0xff]  ;;  %v2300_v4 = vld [vmem:[%s10700_s14 + $0x10] sm:$0xff]  ;;  %s10709_s28 = sld [smem:[#allocation65_spill]]  ;;  %s10743_s6 = smov 112  }
 0x355   : > { %v7577_v5 = vpack.c.bf16 %v2299_v3, %v2298_v2  ;;  %v2301_v6 = vld [vmem:[%s10700_s14 + $0x18] sm:$0xff]  ;;  %s2295_s1 = scalar_lea.vmem %s10701_s22, %s6942_s15  ;;  %v6943_v9 = vld [vmem:[%s10702_s2] ss:$0 sm:$0xff]  ;;  %s10708_s22 = sld [smem:[#allocation69_spill]] }
 0x356   : > { %v7580_v7 = vpack.c.bf16 %v2301_v6, %v2300_v4  ;;  %v2297_v8 = vld [vmem:[%s2295_s1] sm:$0xff]  ;;  %s10550_s2 = smov 88   ;;  %s10560_s15 = smov 120  }
 0x357   : > { %7578 = vmatpush3.bf16.msra.mxu0 %v7577_v5  ;;  %v2439_v19 = vld [vmem:[%s10703_s13] sm:$0xff]  ;;  %v2440_v20 = vld [vmem:[%s10703_s13 + $0x8] sm:$0xff]  ;;  %v2441_v21 = vld [vmem:[%s10703_s13 + $0x10] sm:$0xff]  ;;  %s10705_s12 = smov %s10704_s17  ;;  %s10553_s1 = smov 112  }
 0x358   : > { %7579 = vmatprep.subr.bf16.mxu0 %v9142_v0  ;;  %v7583_v22 = vpack.c.bf16 %v2440_v20, %v2439_v19  ;;  %v2442_v23 = vld [vmem:[%s10703_s13 + $0x18] sm:$0xff]  ;;  %v2530_v34 = vld [vmem:[%s10704_s17] sm:$0xff]  ;;  %v2531_v35 = vld [vmem:[%s10705_s12 + $0x8] sm:$0xff]  ;;  %s10554_s17 = smov 80   ;;  %p10757_p5 = scmp.ne.s32.totalorder %s10653_s26, 0 }
 0x359   : > { %v7586_v24 = vpack.c.bf16 %v2442_v23, %v2441_v21  ;;  %v7589_v36 = vpack.c.bf16 %v2531_v35, %v2530_v34  ;;  %v2532_v37 = vld [vmem:[%s10705_s12 + $0x10] sm:$0xff]  ;;  %v2533_v38 = vld [vmem:[%s10705_s12 + $0x18] sm:$0xff]  ;;  %v2534_v40 = vld [vmem:[%s10705_s12 + $0x20] sm:$0xff] }
 0x35a   : > { %7584 = vmatpush3.bf16.msra.mxu1 %v7583_v22  ;;  %v7592_v39 = vpack.c.bf16 %v2533_v38, %v2532_v37  ;;  %v2535_v41 = vld [vmem:[%s10705_s12 + $0x28] sm:$0xff]  ;;  %v2536_v43 = vld [vmem:[%s10705_s12 + $0x30] sm:$0xff]  ;;  %v2537_v44 = vld [vmem:[%s10705_s12 + $0x38] sm:$0xff] }
 0x35b   : > { %7581 = vmatpush3.bf16.msra.mxu0 %v7580_v7  ;;  %7585 = vmatprep.subr.bf16.mxu1 %v9142_v0  ;;  %v7595_v42 = vpack.c.bf16 %v2535_v41, %v2534_v40  ;;  %v7598_v45 = vpack.c.bf16 %v2537_v44, %v2536_v43  ;;  %v2650_v5 = vld [vmem:[%s10706_s4] sm:$0xff]  ;;  %v2651_v6 = vld [vmem:[%s10706_s4 + $0x8] sm:$0xff]  ;;  %v6959_v20 = vld [vmem:[#allocation19] ss:$0 sm:$0xff] }
 0x35c   : > { %7588 = vmatprep.subr.bf16.mxu0 %v9142_v0  ;;  %v7601_v7 = vpack.c.bf16 %v2651_v6, %v2650_v5  ;;  %v2745_v44 = vld [vmem:[#allocation12] sm:$0x1f] }
 0x35e   : > { %7225 = vmatmul.mubr.msk.f32.vlgmr.msra.gmra.mrb[0].mxu0 %vm2309_vm1, %v2297_v8  ;;  %7587 = vmatpush3.bf16.msra.mxu1 %v7586_v24  ;;  %v2652_v8 = vld [vmem:[%s10706_s4 + $0x10] sm:$0xff] }
 0x35f   : > { %7254 = vmatprep.mubr.msk.f32.mxu0 %vm9143_vm0, %v9144_v1  ;;  %7600 = vmatprep.subr.bf16.mxu1 %v9142_v0 }
 0x360   : > { %7590 = vmatpush3.bf16.msra.mxu0 %v7589_v36 }
 0x361   : > { %7591 = vmatprep.subr.bf16.mxu0 %v9142_v0 }
 0x364   : > { %7593 = vmatpush3.bf16.msra.mxu0 %v7592_v39 }
 0x365   : > { %7594 = vmatprep.subr.bf16.mxu0 %v9142_v0 }
 0x368   : > { %7596 = vmatpush3.bf16.msra.mxu0 %v7595_v42 }
 0x369   : > { %7597 = vmatprep.subr.bf16.mxu0 %v9142_v0 }
 0x36c   : > { %7599 = vmatpush3.bf16.msra.mxu0 %v7598_v45 }
 0x36d   : > { %7288 = vmatprep.subr.mxu0 %v9144_v1 }
 0x431   : > { %v2379_v10 = vpop.f32.mrb[0].mxu0 }
 0x432   : > { %v9932_v11 = vadd.f32 %v6943_v9, %v2379_v10  ;;  %v7226_v12 = vpop.f32.mrb[1].mxu0  ;;  %v2653_v9 = vld [vmem:[%s10706_s4 + $0x18] sm:$0xff]  ;;  %s10736_s4 = sld [smem:[#allocation97_spill]] }
 0x433   : > { %v7604_v10 = vpack.c.bf16 %v2653_v9, %v2652_v8 }
 0x434   : > { %v2411_v13 = vsel %vm2309_vm1, %v9932_v11, 0.0 }
 0x435   : > { %2412 = vadd.xlane.f32.xlu0 %v2411_v13 }
 0x4c2   : > { %v2413_v14 = vpop.xlane.xlu0 %2412 }
 0x4c3   : > { %v2415_v15 = vmul.f32 0.03125, %v2413_v14 }
 0x4c5   : > { %v2416_v16 = vsub.f32 %v9932_v11, %v2415_v15  ;;  %v6957_v15 = vld [vmem:[#allocation18] ss:$0 sm:$0xff] }
 0x4c7   : > { %v2417_v17 = vmul.f32 %v2416_v16, %v2416_v16 }
 0x4c9   : > { %v2418_v18 = vsel %vm2309_vm1, %v2417_v17, 0.0  ;;  %v6958_v17 = vld [vmem:[#allocation16] ss:$0 sm:$0xff] }
 0x4ca   : > { %2419 = vadd.xlane.f32.xlu0 %v2418_v18 }
 0x557   : > { %v2420_v25 = vpop.xlane.xlu0 %2419 }
 0x558   : > { %v2421_v26 = vmul.f32 0.03125, %v2420_v25 }
 0x55a   : > { %v2422_v27 = vadd.f32 1e-05, %v2421_v26 }
 0x55c   : > { %8095 = vrsqrt.f32 %v2422_v27 }
 0x566   : > { %v8096_v28 = vpop.eup %8095 }
 0x567   : > { %v2424_v30 = vmul.f32 %v8096_v28, %v2416_v16  ;;  %v2383_v28 = vlaneseq }
 0x569   : > { %v2431_v32 = vmul.f32 %v6950_v29, %v2424_v30  ;;  %v9979_v29 = vshrl.u32 %v2383_v28, 7  ;;  %v9981_v30 = vand.u32 127, %v2383_v28 }
 0x56b   : > { %v2438_v33 = vadd.f32 %v6951_v31, %v2431_v32  ;;  %v2390_v31 = vadd.s32 4294967294, %v9979_v29  ;;  %v2405_v32 = vadd.s32 2, %v9979_v29  ;;  %vm2398_vm7 = vcmp.eq.s32.totalorder %v9981_v30, %v9979_v29 }
 0x56c   : > { %v2401_v39 = vadd.s32 1, %v9979_v29  ;;  %v10017_v40 = vsel %vm2398_vm7, 1.0, %v9144_v1  ;;  %v2822_v42 = vsub.s32 0, %v9979_v29  ;;  %v2901_v43 = vsub.s32 1, %v9979_v29 }
 0x56d   : > { %7236 = vmatmul.mubr.msk.f32.vlgmr.msra.gmra.mrb[0].mxu1 %vm2309_vm1, %v2438_v33  ;;  %vm2391_vm3 = vcmp.eq.s32.totalorder %v9981_v30, %v2390_v31  ;;  %v2394_v33 = vadd.s32 4294967295, %v9979_v29  ;;  %vm2406_vm4 = vcmp.eq.s32.totalorder %v9981_v30, %v2405_v32  ;;  %v3201_v31 = vld [vmem:[%s10707_s3 + $0x18] sm:$0xff] }
 0x56e   : > { %7265 = vmatprep.mubr.msk.f32.mxu1 %vm9143_vm0, %v9144_v1  ;;  %7602 = vmatpush3.bf16.msra.mxu1 %v7601_v7  ;;  %v9989_v36 = vsel %vm2391_vm3, 1.0, %v9144_v1  ;;  %v9993_v37 = vsel %vm2406_vm4, 1.0, %v9144_v1  ;;  %vm2402_vm8 = vcmp.eq.s32.totalorder %v9981_v30, %v2401_v39 }
 0x56f   : > { %7603 = vmatprep.subr.bf16.mxu1 %v9142_v0  ;;  %vm2395_vm6 = vcmp.eq.s32.totalorder %v9981_v30, %v2394_v33  ;;  %v10026_v41 = vsel %vm2402_vm8, 1.0, %v9144_v1 }
 0x570   : > { %v10001_v38 = vsel %vm2395_vm6, 1.0, %v9144_v1 }
 0x572   : > { %7605 = vmatpush3.bf16.msra.mxu1 %v7604_v10  ;;  %v6967_v10 = vld [vmem:[#allocation10] ss:$0 sm:$0xff] }
 0x573   : > { %7268 = vmatprep.subr.mxu1 %v9144_v1 }
 0x640   : > { %v2519_v47 = vpop.f32.mrb[0].mxu1 }
 0x641   : > { %v2520_v48 = vadd.f32 %v6952_v46, %v2519_v47  ;;  %v7237_v49 = vpop.f32.mrb[1].mxu1  ;;  %v2980_v46 = vsub.s32 2, %v9979_v29  ;;  %v2823_v47 = vrot.slane %v2745_v44, %v2822_v42 }
 0x642   : > { %v2902_v49 = vrot.slane %v2745_v44, %v2901_v43 }
 0x643   : > { %v6954_v50 = vmul.f32 -1.442695, %v2520_v48 }
 0x645   : > { %8097 = vpow2.f32 %v6954_v50 }
 0x64f   : > { %v8098_v51 = vpop.eup %8097 }
 0x650   : > { %v2526_v52 = vadd.f32 1.0, %v8098_v51 }
 0x652   : > { %8099 = vrcp.f32 %v2526_v52 }
 0x65c   : > { %v8100_v53 = vpop.eup %8099 }
 0x65d   : > { %v2529_v54 = vmul.f32 %v8100_v53, %v2520_v48  ;;  %v2981_v53 = vrot.slane %v2745_v44, %v2980_v46 }
 0x65f   : > { %7255 = vmatmul.mubr.msk.f32.vlgmr.msra.gmra.mrb[2].mxu0 %vm2545_vm2, %v2529_v54 }
 0x660   : > { %7290 = vmatprep.mubr.msk.f32.mxu0 %vm9143_vm0, %v9144_v1 }
 0x732   : > { %v2615_v56 = vpop.f32.mrb[2].mxu0 }
 0x733   : > { %v2616_v57 = vadd.f32 %v6955_v55, %v2615_v56  ;;  %v7256_v58 = vpop.f32.mrb[3].mxu0 }
 0x734   : > { %v3138_v58 = vsub.s32 4, %v9979_v29 }
 0x735   : > { %v2619_v59 = vmul.f32 0.5, %v2616_v57  ;;  %v3059_v57 = vsub.s32 3, %v9979_v29 }
 0x737   : > { %v9963_v60 = vadd.f32 %v2619_v59, %v9932_v11 }
 0x739   : > { %v2623_v61 = vsel %vm2309_vm1, %v9963_v60, 0.0 }
 0x73a   : > { %2624 = vadd.xlane.f32.xlu1 %v2623_v61 }
 0x7c7   : > { %v2625_v62 = vpop.xlane.xlu1 %2624 }
 0x7c8   : > { %v2626_v63 = vmul.f32 0.03125, %v2625_v62 }
 0x7ca   : > { %v2627_v2 = vsub.f32 %v9963_v60, %v2626_v63 }
 0x7cc   : > { %v2628_v3 = vmul.f32 %v2627_v2, %v2627_v2 }
 0x7ce   : > { %v2629_v4 = vsel %vm2309_vm1, %v2628_v3, 0.0  ;;  %v3139_v3 = vrot.slane %v2745_v44, %v3138_v58 }
 0x7cf   : > { %2630 = vadd.xlane.f32.xlu1 %v2629_v4 }
 0x85c   : > { %v2631_v11 = vpop.xlane.xlu1 %2630 }
 0x85d   : > { %v2632_v12 = vmul.f32 0.03125, %v2631_v11 }
 0x85f   : > { %v2633_v13 = vadd.f32 1e-05, %v2632_v12 }
 0x861   : > { %8101 = vrsqrt.f32 %v2633_v13 }
 0x86b   : > { %v8102_v14 = vpop.eup %8101 }
 0x86c   : > { %v2635_v16 = vmul.f32 %v8102_v14, %v2627_v2  ;;  %v3060_v2 = vrot.slane %v2745_v44, %v3059_v57 }
 0x86e   : > { %v2642_v18 = vmul.f32 %v6957_v15, %v2635_v16 }
 0x870   : > { %v2649_v19 = vadd.f32 %v6958_v17, %v2642_v18 }
 0x872   : > { %7266 = vmatmul.mubr.msk.f32.vlgmr.msra.gmra.mrb[2].mxu1 %vm2309_vm1, %v2649_v19 }
 0x873   : > { %7270 = vmatprep.mubr.msk.f32.mxu1 %vm9143_vm0, %v9144_v1 }
 0x945   : > { %v2730_v21 = vpop.f32.mrb[2].mxu1 }
 0x946   : > { %v2731_v22 = vadd.f32 %v6959_v20, %v2730_v21  ;;  %v7267_v23 = vpop.f32.mrb[3].mxu1 }
 0x948   : > { %v6961_v24 = vmul.f32 -1.442695, %v2731_v22 }
 0x94a   : > { %8103 = vpow2.f32 %v6961_v24 }
 0x954   : > { %v8104_v25 = vpop.eup %8103 }
 0x955   : > { %v2737_v26 = vadd.f32 1.0, %v8104_v25  ;;  %v3198_v25 = vld [vmem:[%s10707_s3] sm:$0xff] }
 0x957   : > { %8105 = vrcp.f32 %v2737_v26  ;;  %v3199_v26 = vld [vmem:[%s10707_s3 + $0x8] sm:$0xff] }
 0x958   : > { %v7607_v28 = vpack.c.bf16 %v3199_v26, %v3198_v25 }
 0x961   : > { %v8106_v27 = vpop.eup %8105 }
 0x962   : > { %2741 = vrot.lane.b32.xlu0 %v8106_v27, %s10563_s9  ;;  %v3200_v27 = vld [vmem:[%s10707_s3 + $0x10] sm:$0xff]  ;;  %s10728_s3 = sld [smem:[#allocation104_spill]] }
 0x963   : > { %v7610_v32 = vpack.c.bf16 %v3201_v31, %v3200_v27  ;;  %v6975_v27 = vld [vmem:[#allocation9] ss:$0 sm:$0xff] }
 0x9d4   : > { %v2742_v34 = vpop.permute.xlu0 %2741 }
 0x9d5   : > { %v2744_v35 = vmul.f32 %v2742_v34, %v2731_v22 }
 0x9d7   : > { %7269 = vmatpush3.msra.mxu1 %v2744_v35  ;;  %7289 = vmatpush3.msra.mxu0 %v2744_v35 }
 0x9d8   : > { %7271 = vmatmul.mubr.msk.f32.vlgmr.msra.gmra.mrb[4].mxu1 %vm2746_vm5, %v9989_v36  ;;  %7273 = vmatprep.subr.mxu1 %v9144_v1 }
 0x9d9   : > { %7274 = vmatpush3.msra.mxu1 %v2744_v35  ;;  %7275 = vmatprep.mubr.msk.f32.mxu1 %vm9143_vm0, %v9144_v1 }
 0x9da   : > { %7278 = vmatprep.subr.mxu1 %v9144_v1  ;;  %7291 = vmatmul.mubr.msk.f32.vlgmr.msra.gmra.mrb[4].mxu0 %vm2746_vm5, %v9993_v37 }
 0x9db   : > { %7612 = vmatprep.subr.bf16.mxu0 %v9142_v0  ;;  %7312 = vmatprep.mubr.msk.f32.mxu0 %vm9143_vm0, %v9144_v1 }
 0x9dc   : > { %7276 = vmatmul.mubr.msk.f32.vlgmr.msra.gmra.mrb[6].mxu1 %vm2746_vm5, %v10001_v38 }
 0x9dd   : > { %7279 = vmatpush3.msra.mxu1 %v2744_v35  ;;  %7280 = vmatprep.mubr.msk.f32.mxu1 %vm9143_vm0, %v9144_v1 }
 0x9de   : > { %7283 = vmatprep.subr.mxu1 %v9144_v1 }
 0x9e0   : > { %7281 = vmatmul.mubr.msk.f32.vlgmr.msra.gmra.mrb[8].mxu1 %vm2746_vm5, %v10017_v40 }
 0x9e1   : > { %7284 = vmatpush3.msra.mxu1 %v2744_v35  ;;  %7285 = vmatprep.mubr.msk.f32.mxu1 %vm9143_vm0, %v9144_v1 }
 0x9e2   : > { %7606 = vmatprep.subr.bf16.mxu1 %v9142_v0 }
 0x9e4   : > { %7286 = vmatmul.mubr.msk.f32.vlgmr.msra.gmra.mrb[10].mxu1 %vm2746_vm5, %v10026_v41 }
 0x9e5   : > { %7301 = vmatprep.mubr.msk.f32.mxu1 %vm9143_vm0, %v9144_v1  ;;  %7608 = vmatpush3.bf16.msra.mxu1 %v7607_v28 }
 0x9e6   : > { %7609 = vmatprep.subr.bf16.mxu1 %v9142_v0 }
 0x9e9   : > { %7611 = vmatpush3.bf16.msra.mxu1 %v7610_v32 }
 0x9ea   : > { %7315 = vmatprep.subr.mxu1 %v9144_v1 }
 0xaab   : > { %v2816_v45 = vpop.f32.mrb[4].mxu1 }
 0xaac   : > { %v7272_v48 = vpop.f32.mrb[5].mxu1  ;;  %v2824_v54 = vmul.f32 %v2823_v47, %v2816_v45 }
 0xaad   : > { %v3132_v50 = vpop.f32.mrb[4].mxu0 }
 0xaae   : > { %v7292_v51 = vpop.f32.mrb[5].mxu0  ;;  %v3140_v8 = vmul.f32 %v3139_v3, %v3132_v50 }
 0xaaf   : > { %v2895_v52 = vpop.f32.mrb[6].mxu1  ;;  %v6968_v51 = vld [vmem:[#allocation15] ss:$0 sm:$0xff] }
 0xab0   : > { %v2903_v55 = vmul.f32 %v2902_v49, %v2895_v52  ;;  %v7277_v56 = vpop.f32.mrb[7].mxu1 }
 0xab2   : > { %v2904_v59 = vadd.f32 %v2903_v55, %v2824_v54 }
 0xab3   : > { %v2974_v61 = vpop.f32.mrb[8].mxu1 }
 0xab4   : > { %v2982_v62 = vmul.f32 %v2981_v53, %v2974_v61  ;;  %v7282_v63 = vpop.f32.mrb[9].mxu1  ;;  %v6969_v53 = vld [vmem:[#allocation13] ss:$0 sm:$0xff] }
 0xab6   : > { %v2983_v4 = vadd.f32 %v2982_v62, %v2904_v59 }
 0xab7   : > { %v3053_v5 = vpop.f32.mrb[10].mxu1 }
 0xab8   : > { %v3061_v6 = vmul.f32 %v3060_v2, %v3053_v5  ;;  %v7287_v7 = vpop.f32.mrb[11].mxu1  ;;  %v6971_v2 = vld [vmem:[#allocation21] ss:$0 sm:$0xff] }
 0xaba   : > { %v3062_v9 = vadd.f32 %v3061_v6, %v2983_v4 }
 0xabc   : > { %v3141_v11 = vadd.f32 %v3140_v8, %v3062_v9 }
 0xabe   : > { %v3149_v12 = vadd.f32 %v6967_v10, %v3141_v11 }
 0xac0   : > { %v3150_v13 = vsel %vm2309_vm1, %v3149_v12, 0.0 }
 0xac1   : > { %3151 = vadd.xlane.f32.xlu1 %v3150_v13  ;;  %v3312_v13 = vld [vmem:[%s10708_s22] sm:$0xff] }
 0xb4e   : > { %v3152_v14 = vpop.xlane.xlu1 %3151 }
 0xb4f   : > { %v3153_v15 = vrot.slane %v3152_v14, 4 }
 0xb51   : > { %v3154_v16 = vadd.f32 %v3153_v15, %v3152_v14  ;;  %v3313_v14 = vld [vmem:[%s10708_s22 + $0x8] sm:$0xff] }
 0xb52   : > { %v7613_v15 = vpack.c.bf16 %v3313_v14, %v3312_v13 }
 0xb53   : > { %v3155_v17 = vrot.slane %v3154_v16, 2 }
 0xb54   : > { %7614 = vmatpush3.bf16.msra.mxu0 %v7613_v15 }
 0xb55   : > { %v3156_v18 = vadd.f32 %v3155_v17, %v3154_v16  ;;  %v3314_v16 = vld [vmem:[%s10708_s22 + $0x10] sm:$0xff]  ;;  %7615 = vmatprep.subr.bf16.mxu0 %v9142_v0 }
 0xb57   : > { %v3157_v19 = vrot.slane %v3156_v18, 1 }
 0xb59   : > { %v3158_v20 = vadd.f32 %v3157_v19, %v3156_v18 }
 0xb5b   : > { %v3159_v21 = vmul.f32 0.00390625, %v3158_v20 }
 0xb5d   : > { %v3160_v22 = vsub.f32 %v3149_v12, %v3159_v21 }
 0xb5f   : > { %v3161_v23 = vmul.f32 %v3160_v22, %v3160_v22 }
 0xb61   : > { %v3162_v24 = vsel %vm2309_vm1, %v3161_v23, 0.0 }
 0xb62   : > { %3163 = vadd.xlane.f32.xlu1 %v3162_v24  ;;  %v6974_v24 = vld [vmem:[%s10709_s28] ss:$0 sm:$0xff]  ;;  %s10551_s28 = smov 104  }
 0xbef   : > { %v3164_v33 = vpop.xlane.xlu1 %3163 }
 0xbf0   : > { %v3165_v34 = vrot.slane %v3164_v33, 4 }
 0xbf2   : > { %v3166_v35 = vadd.f32 %v3165_v34, %v3164_v33 }
 0xbf4   : > { %v3167_v39 = vrot.slane %v3166_v35, 2 }
 0xbf6   : > { %v3168_v44 = vadd.f32 %v3167_v39, %v3166_v35 }
 0xbf8   : > { %v3169_v45 = vrot.slane %v3168_v44, 1 }
 0xbfa   : > { %v3170_v47 = vadd.f32 %v3169_v45, %v3168_v44 }
 0xbfc   : > { %v3171_v48 = vmul.f32 0.00390625, %v3170_v47 }
 0xbfe   : > { %v3172_v49 = vadd.f32 1e-05, %v3171_v48 }
 0xc00   : > { %8107 = vrsqrt.f32 %v3172_v49 }
 0xc0a   : > { %v8108_v50 = vpop.eup %8107 }
 0xc0b   : > { %v3174_v52 = vmul.f32 %v8108_v50, %v3160_v22  ;;  %v6973_v22 = vld [vmem:[#allocation4] ss:$0 sm:$0xff]  ;;  %v9152_v50 = vmov -1e+30  }
 0xc0d   : > { %v3182_v54 = vmul.f32 %v6968_v51, %v3174_v52 }
 0xc0f   : > { %v3190_v55 = vadd.f32 %v6969_v53, %v3182_v54 }
 0xc11   : > { %v6970_v56 = vmul.f32 -1.442695, %v3190_v55 }
 0xc13   : > { %8109 = vpow2.f32 %v6970_v56 }
 0xc1d   : > { %v8110_v59 = vpop.eup %8109 }
 0xc1e   : > { %v3194_v61 = vadd.f32 1.0, %v8110_v59 }
 0xc20   : > { %8111 = vrcp.f32 %v3194_v61 }
 0xc2a   : > { %v8112_v62 = vpop.eup %8111 }
 0xc2b   : > { %v3197_v63 = vmul.f32 %v8112_v62, %v3190_v55 }
 0xc2d   : > { %7302 = vmatmul.mubr.msk.f32.vlgmr.msra.gmra.mrb[12].mxu1 %vm2309_vm1, %v3197_v63 }
 0xc2e   : > { %7317 = vmatprep.mubr.msk.f32.mxu1 %vm9143_vm0, %v9144_v1 }
 0xd00   : > { %v3278_v3 = vpop.f32.mrb[12].mxu1 }
 0xd01   : > { %v3279_v4 = vadd.f32 %v6971_v2, %v3278_v3  ;;  %v7303_v5 = vpop.f32.mrb[13].mxu1 }
 0xd03   : > { %v10060_v6 = vadd.f32 %v3279_v4, %v9963_v60  ;;  %v3315_v60 = vld [vmem:[%s10708_s22 + $0x18] sm:$0xff] }
 0xd04   : > { %v7616_v17 = vpack.c.bf16 %v3315_v60, %v3314_v16 }
 0xd05   : > { %v3285_v7 = vsel %vm2309_vm1, %v10060_v6, 0.0 }
 0xd06   : > { %3286 = vadd.xlane.f32.xlu1 %v3285_v7  ;;  %7617 = vmatpush3.bf16.msra.mxu0 %v7616_v17 }
 0xd07   : > { %7320 = vmatprep.subr.mxu0 %v9144_v1 }
 0xd93   : > { %v3287_v8 = vpop.xlane.xlu1 %3286 }
 0xd94   : > { %v3288_v9 = vmul.f32 0.03125, %v3287_v8 }
 0xd96   : > { %v3289_v10 = vsub.f32 %v10060_v6, %v3288_v9 }
 0xd98   : > { %v3290_v11 = vmul.f32 %v3289_v10, %v3289_v10 }
 0xd9a   : > { %v3291_v12 = vsel %vm2309_vm1, %v3290_v11, 0.0 }
 0xd9b   : > { %3292 = vadd.xlane.f32.xlu1 %v3291_v12 }
 0xe28   : > { %v3293_v18 = vpop.xlane.xlu1 %3292 }
 0xe29   : > { %v3294_v19 = vmul.f32 0.03125, %v3293_v18 }
 0xe2b   : > { %v3295_v20 = vadd.f32 1e-05, %v3294_v19 }
 0xe2d   : > { %8113 = vrsqrt.f32 %v3295_v20 }
 0xe37   : > { %v8114_v21 = vpop.eup %8113 }
 0xe38   : > { %v3297_v23 = vmul.f32 %v8114_v21, %v3289_v10 }
 0xe3a   : > { %v3304_v25 = vmul.f32 %v6973_v22, %v3297_v23 }
 0xe3c   : > { %v3311_v26 = vadd.f32 %v6974_v24, %v3304_v25 }
 0xe3e   : > { %7313 = vmatmul.mubr.msk.f32.vlgmr.msra.gmra.mrb[6].mxu0 %vm2309_vm1, %v3311_v26 }
 0xe3f   : > { %7322 = vmatprep.mubr.msk.f32.mxu0 %vm9143_vm0, %v9144_v1 }
 0xf11   : > { %v3392_v28 = vpop.f32.mrb[6].mxu0 }
 0xf12   : > { %v10076_v31 = vadd.f32 %v6975_v27, %v3392_v28  ;;  %v7314_v32 = vpop.f32.mrb[7].mxu0 }
 0xf14   : > { %3564 = vrot.lane.b32.xlu0 %v10076_v31, %s10550_s2  ;;  %3397 = vrot.lane.b32.xlu1 %v10076_v31, %s10563_s9  ;;  %s10552_s2 = smov 72   ;;  %s10715_s9 = sld [smem:[#allocation89_spill]] }
 0xf18   : > { %3562 = vrot.lane.b32.xlu0 %v10076_v31, %s10560_s15  ;;  %3729 = vrot.lane.b32.xlu1 %v10076_v31, %s10553_s1  ;;  %s10558_s1 = smov 64  }
 0xf1c   : > { %3731 = vrot.lane.b32.xlu0 %v10076_v31, %s10554_s17  ;;  %3896 = vrot.lane.b32.xlu1 %v10076_v31, %s10551_s28  ;;  %s2296_s28 = sld [smem:[#allocation3 + %s9533_s11]]  ;;  %s10556_s17 = smov 40  }
 0xf20   : > { %3898 = vrot.lane.b32.xlu0 %v10076_v31, %s10552_s2  ;;  %s10557_s2 = smov 48  }
 0xf22   : > { %v2385_v48 = vstv %s2296_s28  ;;  %s10555_s28 = smov 56  }
 0xf23   : > { %vm2386_vm9 = vcmp.lt.s32.totalorder %v9981_v30, %v2385_v48 }
 0xf24   : > { %v10115_v51 = vsel %vm2386_vm9, 0.0, %v9152_v50 }
 0xf86   : > { %v3565_v33 = vpop.permute.xlu0 %3564  ;;  %v3398_v34 = vpop.permute.xlu1 %3397 }
 0xf87   : > { %7316 = vmatpush3.xpose.msk.msra.mxu1 %vm2746_vm5, %v3398_v34 }
 0xf88   : > { %7325 = vmatprep.subr.mxu1 %v9144_v1 }
 0xf8a   : > { %v3563_v35 = vpop.permute.xlu0 %3562  ;;  %7318 = vmatmul.mubr.msk.f32.vlgmr.msra.gmra.mrb[14].mxu1 %vm2746_vm5, %v10076_v31  ;;  %v3730_v44 = vpop.permute.xlu1 %3729 }
 0xf8b   : > { %7326 = vmatpush3.xpose.msk.msra.mxu1 %vm2746_vm5, %v3565_v33  ;;  %7327 = vmatprep.mubr.msk.f32.mxu1 %vm9143_vm0, %v9144_v1 }
 0xf8c   : > { %7335 = vmatprep.subr.mxu1 %v9144_v1 }
 0xf8e   : > { %v3732_v39 = vpop.permute.xlu0 %3731  ;;  %7328 = vmatmul.mubr.msk.f32.vlgmr.msra.gmra.mrb[16].mxu1 %vm2746_vm5, %v3563_v35  ;;  %v3897_v47 = vpop.permute.xlu1 %3896 }
 0xf8f   : > { %7336 = vmatpush3.xpose.msk.msra.mxu1 %vm2746_vm5, %v3732_v39  ;;  %7337 = vmatprep.mubr.msk.f32.mxu1 %vm9143_vm0, %v9144_v1 }
 0xf90   : > { %7345 = vmatprep.subr.mxu1 %v9144_v1 }
 0xf92   : > { %v3899_v45 = vpop.permute.xlu0 %3898  ;;  %7338 = vmatmul.mubr.msk.f32.vlgmr.msra.gmra.mrb[18].mxu1 %vm2746_vm5, %v3730_v44 }
 0xf93   : > { %7346 = vmatpush3.xpose.msk.msra.mxu1 %vm2746_vm5, %v3899_v45  ;;  %7347 = vmatprep.mubr.msk.f32.mxu1 %vm9143_vm0, %v9144_v1 }
 0xf94   : > { %7618 = vmatprep.subr.bf16.mxu1 %v9142_v0 }
 0xf96   : > { %7348 = vmatmul.mubr.msk.f32.vlgmr.msra.gmra.mrb[20].mxu1 %vm2746_vm5, %v3897_v47 }
 0xf97   : > { %7363 = vmatprep.mubr.msk.f32.mxu1 %vm9143_vm0, %v9144_v1 }
0x105d   : > { %v3469_v49 = vpop.f32.mrb[14].mxu1 }
0x105e   : > { %v3473_v52 = vmul.f32 0.35355338, %v3469_v49  ;;  %v7319_v53 = vpop.f32.mrb[15].mxu1 }
0x1060   : > { %v3474_v54 = vadd.f32 %v3473_v52, %v10115_v51 }
0x1061   : > { %v3636_v55 = vpop.f32.mrb[16].mxu1 }
0x1062   : > { %v3640_v56 = vmul.f32 0.35355338, %v3636_v55  ;;  %v7329_v59 = vpop.f32.mrb[17].mxu1  ;;  %v3475_v61 = vsel %vm2746_vm5, %v3474_v54, -inf }
0x1063   : > { %3476 = vmax.xlane.f32.xlu0 %v3475_v61 }
0x1064   : > { %v3641_v62 = vadd.f32 %v3640_v56, %v10115_v51 }
0x1065   : > { %v3803_v63 = vpop.f32.mrb[18].mxu1 }
0x1066   : > { %v3807_v2 = vmul.f32 0.35355338, %v3803_v63  ;;  %v7339_v3 = vpop.f32.mrb[19].mxu1  ;;  %v3642_v30 = vsel %vm2746_vm5, %v3641_v62, -inf }
0x1067   : > { %3643 = vmax.xlane.f32.xlu1 %v3642_v30 }
0x1068   : > { %v3808_v4 = vadd.f32 %v3807_v2, %v10115_v51 }
0x1069   : > { %v3970_v5 = vpop.f32.mrb[20].mxu1 }
0x106a   : > { %v3974_v7 = vmul.f32 0.35355338, %v3970_v5  ;;  %v7349_v8 = vpop.f32.mrb[21].mxu1  ;;  %v3809_v9 = vsel %vm2746_vm5, %v3808_v4, -inf }
0x106b   : > { %3810 = vmax.xlane.f32.xlu0 %v3809_v9 }
0x106c   : > { %v3975_v10 = vadd.f32 %v3974_v7, %v10115_v51 }
0x106e   : > { %v3976_v11 = vsel %vm2746_vm5, %v3975_v10, -inf }
0x106f   : > { %3977 = vmax.xlane.f32.xlu0 %v3976_v11 }
0x10f0   : > { %v3477_v12 = vpop.xlane.xlu0 %3476 }
0x10f1   : > { %v3478_v13 = vsub.f32 %v3474_v54, %v3477_v12 }
0x10f3   : > { %v3479_v14 = vmul.f32 1.442695, %v3478_v13 }
0x10f4   : > { %v3644_v15 = vpop.xlane.xlu1 %3643 }
0x10f5   : > { %8115 = vpow2.f32 %v3479_v14  ;;  %v3645_v16 = vsub.f32 %v3641_v62, %v3644_v15 }
0x10f7   : > { %v3646_v60 = vmul.f32 1.442695, %v3645_v16 }
0x10f8   : > { %v3811_v17 = vpop.xlane.xlu0 %3810 }
0x10f9   : > { %8117 = vpow2.f32 %v3646_v60  ;;  %v3812_v18 = vsub.f32 %v3808_v4, %v3811_v17 }
0x10fb   : > { %v3813_v19 = vmul.f32 1.442695, %v3812_v18  ;;  %v6989_v18 = vld [vmem:[#allocation7] ss:$0 sm:$0xff] }
0x10fc   : > { %v3978_v26 = vpop.xlane.xlu0 %3977 }
0x10fd   : > { %8119 = vpow2.f32 %v3813_v19  ;;  %v3979_v27 = vsub.f32 %v3975_v10, %v3978_v26 }
0x10ff   : > { %v8116_v20 = vpop.eup %8115  ;;  %v3980_v28 = vmul.f32 1.442695, %v3979_v27 }
0x1100   : > { %v3481_v21 = vsel %vm2746_vm5, %v8116_v20, 0.0 }
0x1101   : > { %3482 = vadd.xlane.f32.xlu0 %v3481_v21  ;;  %8121 = vpow2.f32 %v3980_v28 }
0x1103   : > { %v8118_v22 = vpop.eup %8117 }
0x1104   : > { %v3648_v23 = vsel %vm2746_vm5, %v8118_v22, 0.0 }
0x1105   : > { %3649 = vadd.xlane.f32.xlu1 %v3648_v23 }
0x1107   : > { %v8120_v24 = vpop.eup %8119 }
0x1108   : > { %v3815_v25 = vsel %vm2746_vm5, %v8120_v24, 0.0 }
0x1109   : > { %3816 = vadd.xlane.f32.xlu0 %v3815_v25 }
0x110b   : > { %v8122_v32 = vpop.eup %8121 }
0x110c   : > { %v3982_v33 = vsel %vm2746_vm5, %v8122_v32, 0.0 }
0x1116   : > { %3653 = vrot.lane.b32.xlu1 %v10076_v31, %s10555_s28  ;;  %s10710_s28 = sld [smem:[#allocation67_spill]] }
0x111a   : > { %3820 = vrot.lane.b32.xlu1 %v10076_v31, %s10557_s2  ;;  %s10562_s2 = smov 16  }
0x111c   : > { %v4080_v61 = vld [vmem:[%s10710_s28] sm:$0xff]  ;;  %v4081_v62 = vld [vmem:[%s10710_s28 + $0x8] sm:$0xff]  ;;  %v4082_v63 = vld [vmem:[%s10710_s28 + $0x10] sm:$0xff] }
0x111d   : > { %v7619_v2 = vpack.c.bf16 %v4081_v62, %v4080_v61  ;;  %v4083_v3 = vld [vmem:[%s10710_s28 + $0x18] sm:$0xff] }
0x111e   : > { %v7622_v30 = vpack.c.bf16 %v4083_v3, %v4082_v63  ;;  %v4288_v61 = vld [vmem:[%s10715_s9 + $0x18] sm:$0xff]  ;;  %v4289_v63 = vld [vmem:[%s10715_s9 + $0x20] sm:$0xff] }
0x111f   : > { %3486 = vrot.lane.b32.xlu0 %v10076_v31, %s10558_s1  ;;  %7620 = vmatpush3.bf16.msra.mxu1 %v7619_v2  ;;  %s10561_s1 = smov 24   ;;  %v4290_v2 = vld [vmem:[%s10715_s9 + $0x28] sm:$0xff] }
0x1120   : > { %7621 = vmatprep.subr.bf16.mxu1 %v9142_v0  ;;  %v7637_v3 = vpack.c.bf16 %v4290_v2, %v4289_v63 }
0x1123   : > { %7623 = vmatpush3.bf16.msra.mxu1 %v7622_v30  ;;  %v4291_v30 = vld [vmem:[%s10715_s9 + $0x30] sm:$0xff] }
0x1124   : > { %7630 = vmatprep.subr.bf16.mxu1 %v9142_v0 }
0x113e   : > { %3983 = vadd.xlane.f32.xlu1 %v3982_v33 }
0x114f   : > { %3987 = vrot.lane.b32.xlu1 %v10076_v31, %s10556_s17  ;;  %s10559_s17 = smov 8  }
0x118e   : > { %v3483_v34 = vpop.xlane.xlu0 %3482 }
0x118f   : > { %8123 = vrcp.f32 %v3483_v34 }
0x1192   : > { %v3650_v35 = vpop.xlane.xlu1 %3649 }
0x1193   : > { %8125 = vrcp.f32 %v3650_v35 }
0x1196   : > { %v3817_v39 = vpop.xlane.xlu0 %3816  ;;  %v3654_v47 = vpop.permute.xlu1 %3653 }
0x1197   : > { %8127 = vrcp.f32 %v3817_v39 }
0x1199   : > { %v8124_v44 = vpop.eup %8123 }
0x119a   : > { %v3485_v45 = vmul.f32 %v8124_v44, %v8116_v20  ;;  %v3487_v48 = vpop.permute.xlu0 %3486  ;;  %v3821_v50 = vpop.permute.xlu1 %3820 }
0x119b   : > { %7321 = vmatpush3.msra.mxu0 %v3487_v48 }
0x119c   : > { %7323 = vmatmul.mubr.msk.f32.vlgmr.msra.gmra.mrb[8].mxu0 %vm2746_vm5, %v3485_v45  ;;  %7330 = vmatprep.subr.mxu0 %v9144_v1 }
0x119d   : > { %v8126_v49 = vpop.eup %8125  ;;  %7331 = vmatpush3.msra.mxu0 %v3654_v47  ;;  %7332 = vmatprep.mubr.msk.f32.mxu0 %vm9143_vm0, %v9144_v1 }
0x119e   : > { %v3652_v31 = vmul.f32 %v8126_v49, %v8118_v22  ;;  %7340 = vmatprep.subr.mxu0 %v9144_v1 }
0x11a0   : > { %7333 = vmatmul.mubr.msk.f32.vlgmr.msra.gmra.mrb[10].mxu0 %vm2746_vm5, %v3652_v31 }
0x11a1   : > { %v8128_v52 = vpop.eup %8127  ;;  %7341 = vmatpush3.msra.mxu0 %v3821_v50  ;;  %7342 = vmatprep.mubr.msk.f32.mxu0 %vm9143_vm0, %v9144_v1 }
0x11a2   : > { %v3819_v53 = vmul.f32 %v8128_v52, %v8120_v24  ;;  %7350 = vmatprep.subr.mxu0 %v9144_v1 }
0x11a4   : > { %7343 = vmatmul.mubr.msk.f32.vlgmr.msra.gmra.mrb[12].mxu0 %vm2746_vm5, %v3819_v53 }
0x11a5   : > { %7352 = vmatprep.mubr.msk.f32.mxu0 %vm9143_vm0, %v9144_v1 }
0x11cb   : > { %v3984_v54 = vpop.xlane.xlu1 %3983 }
0x11cc   : > { %8129 = vrcp.f32 %v3984_v54  ;;  %v4285_v54 = vld [vmem:[%s10715_s9] sm:$0xff] }
0x11cf   : > { %v3988_v55 = vpop.permute.xlu1 %3987 }
0x11d0   : > { %7351 = vmatpush3.msra.mxu0 %v3988_v55  ;;  %v4286_v55 = vld [vmem:[%s10715_s9 + $0x8] sm:$0xff] }
0x11d1   : > { %7624 = vmatprep.subr.bf16.mxu0 %v9142_v0 }
0x11d6   : > { %v8130_v56 = vpop.eup %8129 }
0x11d7   : > { %v3986_v59 = vmul.f32 %v8130_v56, %v8122_v32  ;;  %v7631_v56 = vpack.c.bf16 %v4286_v55, %v4285_v54 }
0x11d9   : > { %7353 = vmatmul.mubr.msk.f32.vlgmr.msra.gmra.mrb[14].mxu0 %vm2746_vm5, %v3986_v59  ;;  %v4287_v59 = vld [vmem:[%s10715_s9 + $0x10] sm:$0xff] }
0x11da   : > { %7374 = vmatprep.mubr.msk.f32.mxu0 %vm9143_vm0, %v9144_v1  ;;  %v7634_v62 = vpack.c.bf16 %v4288_v61, %v4287_v59 }
0x126f   : > { %v3558_v4 = vpop.f32.mrb[8].mxu0 }
0x1270   : > { %v7324_v5 = vpop.f32.mrb[9].mxu0 }
0x1273   : > { %v3725_v7 = vpop.f32.mrb[10].mxu0 }
0x1274   : > { %4064 = vrot.lane.b32.xlu0 %v3725_v7, %s10559_s17  ;;  %v7334_v8 = vpop.f32.mrb[11].mxu0  ;;  %s10711_s17 = sld [smem:[#allocation88_spill]] }
0x1277   : > { %v3892_v9 = vpop.f32.mrb[12].mxu0 }
0x1278   : > { %4068 = vrot.lane.b32.xlu1 %v3892_v9, %s10562_s2  ;;  %v7344_v10 = vpop.f32.mrb[13].mxu0  ;;  %s10714_s2 = sld [smem:[#allocation86_spill]] }
0x127a   : > { %s10712_s15 = smov %s10711_s17  ;;  %v4194_v32 = vld [vmem:[%s10711_s17] sm:$0xff]  ;;  %s10718_s17 = sld [smem:[#allocation91_spill]] }
0x127b   : > { %v4195_v33 = vld [vmem:[%s10712_s15 + $0x8] sm:$0xff]  ;;  %v4197_v35 = vld [vmem:[%s10712_s15 + $0x18] sm:$0xff] }
0x127c   : > { %v7625_v34 = vpack.c.bf16 %v4195_v33, %v4194_v32 }
0x127e   : > { %7626 = vmatpush3.bf16.msra.mxu0 %v7625_v34  ;;  %v6992_v50 = vld [vmem:[%s10714_s2] ss:$0 sm:$0xff]  ;;  %s10717_s2 = sld [smem:[#allocation85_spill]] }
0x127f   : > { %7627 = vmatprep.subr.bf16.mxu0 %v9142_v0 }
0x12ac   : > { %v4059_v11 = vpop.f32.mrb[14].mxu0 }
0x12ad   : > { %4072 = vrot.lane.b32.xlu0 %v4059_v11, %s10561_s1  ;;  %v7354_v12 = vpop.f32.mrb[15].mxu0  ;;  %s10713_s1 = sld [smem:[#allocation87_spill]] }
0x12b3   : > { %v6991_v49 = vld [vmem:[%s10713_s1] ss:$0 sm:$0xff]  ;;  %s10716_s1 = sld [smem:[#allocation84_spill]] }
0x12b9   : > { %v6993_v7 = vld [vmem:[%s10716_s1] ss:$0 sm:$0xff]  ;;  %s10719_s1 = sld [smem:[#allocation90_spill]] }
0x12e6   : > { %v4065_v13 = vpop.permute.xlu0 %4064 }
0x12e7   : > { %v4075_v15 = vsel %vm2746_vm5, %v3558_v4, %v4065_v13  ;;  %v4292_v4 = vld [vmem:[%s10715_s9 + $0x38] sm:$0xff]  ;;  %s10745_s9 = smov 104  }
0x12e8   : > { %v7640_v5 = vpack.c.bf16 %v4292_v4, %v4291_v30  ;;  %v7001_v4 = vld [vmem:[#allocation28] ss:$0 sm:$0xff] }
0x12ea   : > { %v4069_v14 = vpop.permute.xlu1 %4068 }
0x12eb   : > { %v4077_v16 = vsel %vm4076_vm10, %v4075_v15, %v4069_v14 }
0x131f   : > { %v4073_v60 = vpop.permute.xlu0 %4072 }
0x1320   : > { %v4079_v17 = vsel %vm4078_vm11, %v4077_v16, %v4073_v60  ;;  %v6996_v16 = vld [vmem:[%s10717_s2] ss:$0 sm:$0xff]  ;;  %s10720_s2 = sld [smem:[#allocation112_spill]] }
0x1321   : > { %7364 = vmatmul.mubr.msk.f32.vlgmr.msra.gmra.mrb[22].mxu1 %vm2309_vm1, %v4079_v17 }
0x1322   : > { %7393 = vmatprep.mubr.msk.f32.mxu1 %vm9143_vm0, %v9144_v1  ;;  %7632 = vmatpush3.bf16.msra.mxu1 %v7631_v56 }
0x1323   : > { %7633 = vmatprep.subr.bf16.mxu1 %v9142_v0 }
0x1326   : > { %7635 = vmatpush3.bf16.msra.mxu1 %v7634_v62  ;;  %v4435_v55 = vld [vmem:[%s10720_s2 + $0x10] sm:$0xff]  ;;  %v4436_v56 = vld [vmem:[%s10720_s2 + $0x18] sm:$0xff] }
0x1327   : > { %7636 = vmatprep.subr.bf16.mxu1 %v9142_v0  ;;  %v7646_v59 = vpack.c.bf16 %v4436_v56, %v4435_v55 }
0x132a   : > { %7638 = vmatpush3.bf16.msra.mxu1 %v7637_v3  ;;  %v7000_v3 = vld [vmem:[#allocation30] ss:$0 sm:$0xff] }
0x132b   : > { %7639 = vmatprep.subr.bf16.mxu1 %v9142_v0 }
0x132e   : > { %7641 = vmatpush3.bf16.msra.mxu1 %v7640_v5 }
0x132f   : > { %7660 = vmatprep.subr.bf16.mxu1 %v9142_v0 }
0x13f4   : > { %v4160_v19 = vpop.f32.mrb[22].mxu1 }
0x13f5   : > { %v4161_v20 = vadd.f32 %v6989_v18, %v4160_v19  ;;  %v7365_v21 = vpop.f32.mrb[23].mxu1 }
0x13f7   : > { %v10169_v22 = vadd.f32 %v4161_v20, %v10060_v6  ;;  %v4196_v6 = vld [vmem:[%s10712_s15 + $0x10] sm:$0xff] }
0x13f8   : > { %v7628_v39 = vpack.c.bf16 %v4197_v35, %v4196_v6  ;;  %v6998_v6 = vld [vmem:[%s10718_s17] ss:$0 sm:$0xff]  ;;  %s10721_s17 = sld [smem:[#allocation113_spill]] }
0x13f9   : > { %v4167_v23 = vsel %vm2309_vm1, %v10169_v22, 0.0  ;;  %v6999_v35 = vld [vmem:[%s10719_s1] ss:$0 sm:$0xff] }
0x13fa   : > { %4168 = vadd.xlane.f32.xlu1 %v4167_v23  ;;  %7629 = vmatpush3.bf16.msra.mxu0 %v7628_v39 }
0x13fb   : > { %7642 = vmatprep.subr.bf16.mxu0 %v9142_v0 }
0x13fe   : > { %s10722_s1 = smov %s10721_s17 }
0x1487   : > { %v4169_v24 = vpop.xlane.xlu1 %4168 }
0x1488   : > { %v4170_v25 = vmul.f32 0.03125, %v4169_v24 }
0x148a   : > { %v4171_v26 = vsub.f32 %v10169_v22, %v4170_v25 }
0x148c   : > { %v4172_v27 = vmul.f32 %v4171_v26, %v4171_v26 }
0x148e   : > { %v4173_v28 = vsel %vm2309_vm1, %v4172_v27, 0.0 }
0x148f   : > { %4174 = vadd.xlane.f32.xlu0 %v4173_v28 }
0x151c   : > { %v4175_v44 = vpop.xlane.xlu0 %4174 }
0x151d   : > { %v4176_v45 = vmul.f32 0.03125, %v4175_v44 }
0x151f   : > { %v4177_v47 = vadd.f32 1e-05, %v4176_v45 }
0x1521   : > { %8131 = vrsqrt.f32 %v4177_v47 }
0x152b   : > { %v8132_v48 = vpop.eup %8131 }
0x152c   : > { %v4179_v31 = vmul.f32 %v8132_v48, %v4171_v26 }
0x152e   : > { %v4186_v52 = vmul.f32 %v6991_v49, %v4179_v31 }
0x1530   : > { %v4193_v53 = vadd.f32 %v6992_v50, %v4186_v52  ;;  %v4433_v52 = vld [vmem:[%s10720_s2] sm:$0xff] }
0x1532   : > { %7375 = vmatmul.mubr.msk.f32.vlgmr.msra.gmra.mrb[16].mxu0 %vm2309_vm1, %v4193_v53  ;;  %v4434_v53 = vld [vmem:[%s10720_s2 + $0x8] sm:$0xff]  ;;  %s10723_s2 = sld [smem:[#allocation108_spill]] }
0x1533   : > { %7404 = vmatprep.mubr.msk.f32.mxu0 %vm9143_vm0, %v9144_v1  ;;  %v7643_v54 = vpack.c.bf16 %v4434_v53, %v4433_v52 }
0x1535   : > { %7644 = vmatpush3.bf16.msra.mxu0 %v7643_v54 }
0x1536   : > { %7645 = vmatprep.subr.bf16.mxu0 %v9142_v0 }
0x1539   : > { %7647 = vmatpush3.bf16.msra.mxu0 %v7646_v59 }
0x153a   : > { %7648 = vmatprep.subr.bf16.mxu0 %v9142_v0 }
0x1605   : > { %v4274_v8 = vpop.f32.mrb[16].mxu0 }
0x1606   : > { %v4275_v9 = vadd.f32 %v6993_v7, %v4274_v8  ;;  %v7376_v10 = vpop.f32.mrb[17].mxu0  ;;  %v4524_v8 = vld [vmem:[%s10721_s17] sm:$0xff]  ;;  %s10724_s17 = sld [smem:[#allocation109_spill]] }
0x1608   : > { %v6995_v11 = vmul.f32 -1.442695, %v4275_v9 }
0x160a   : > { %8133 = vpow2.f32 %v6995_v11  ;;  %v4526_v11 = vld [vmem:[%s10722_s1 + $0x10] sm:$0xff] }
0x1614   : > { %v8134_v12 = vpop.eup %8133 }
0x1615   : > { %v4281_v13 = vadd.f32 1.0, %v8134_v12  ;;  %v4527_v12 = vld [vmem:[%s10722_s1 + $0x18] sm:$0xff] }
0x1617   : > { %8135 = vrcp.f32 %v4281_v13  ;;  %v7652_v13 = vpack.c.bf16 %v4527_v12, %v4526_v11 }
0x1621   : > { %v8136_v14 = vpop.eup %8135 }
0x1622   : > { %v4284_v15 = vmul.f32 %v8136_v14, %v4275_v9  ;;  %v4525_v9 = vld [vmem:[%s10722_s1 + $0x8] sm:$0xff]  ;;  %v4528_v14 = vld [vmem:[%s10722_s1 + $0x20] sm:$0xff] }
0x1623   : > { %v7649_v10 = vpack.c.bf16 %v4525_v9, %v4524_v8 }
0x1624   : > { %7394 = vmatmul.mubr.msk.f32.vlgmr.msra.gmra.mrb[24].mxu1 %vm2545_vm2, %v4284_v15  ;;  %v4529_v15 = vld [vmem:[%s10722_s1 + $0x28] sm:$0xff] }
0x1625   : > { %7434 = vmatprep.mubr.msk.f32.mxu1 %vm9143_vm0, %v9144_v1 }
0x16f7   : > { %v4369_v60 = vpop.f32.mrb[24].mxu1 }
0x16f8   : > { %v4370_v17 = vadd.f32 %v6996_v16, %v4369_v60  ;;  %v7395_v18 = vpop.f32.mrb[25].mxu1  ;;  %v7655_v16 = vpack.c.bf16 %v4529_v15, %v4528_v14  ;;  %v4530_v60 = vld [vmem:[%s10722_s1 + $0x30] sm:$0xff] }
0x16fa   : > { %v4373_v19 = vmul.f32 0.5, %v4370_v17  ;;  %v4531_v17 = vld [vmem:[%s10722_s1 + $0x38] sm:$0xff]  ;;  %s10725_s1 = sld [smem:[#allocation105_spill]] }
0x16fb   : > { %v7658_v18 = vpack.c.bf16 %v4531_v17, %v4530_v60 }
0x16fc   : > { %v4374_v20 = vadd.f32 %v4373_v19, %v10169_v22  ;;  %v7002_v19 = vld [vmem:[%s10723_s2] ss:$0 sm:$0xff]  ;;  %s10726_s2 = sld [smem:[#allocation103_spill]] }
0x16fe   : > { %v4377_v21 = vsel %vm2309_vm1, %v4374_v20, 0.0 }
0x16ff   : > { %4378 = vadd.xlane.f32.xlu0 %v4377_v21 }
0x1700   : > { %v4644_v52 = vld [vmem:[%s10725_s1 + $0x8] sm:$0xff]  ;;  %v4646_v54 = vld [vmem:[%s10725_s1 + $0x18] sm:$0xff] }
0x178c   : > { %v4379_v23 = vpop.xlane.xlu0 %4378 }
0x178d   : > { %v4380_v24 = vmul.f32 0.03125, %v4379_v23 }
0x178f   : > { %v4381_v25 = vsub.f32 %v4374_v20, %v4380_v24 }
0x1791   : > { %v4382_v26 = vmul.f32 %v4381_v25, %v4381_v25 }
0x1793   : > { %v4383_v27 = vsel %vm2309_vm1, %v4382_v26, 0.0 }
0x1794   : > { %4384 = vadd.xlane.f32.xlu0 %v4383_v27 }
0x1821   : > { %v4385_v28 = vpop.xlane.xlu0 %4384 }
0x1822   : > { %v4386_v32 = vmul.f32 0.03125, %v4385_v28 }
0x1824   : > { %v4387_v33 = vadd.f32 1e-05, %v4386_v32  ;;  %v7005_v32 = vld [vmem:[%s10724_s17] ss:$0 sm:$0xff]  ;;  %s10727_s17 = sld [smem:[#allocation102_spill]] }
0x1826   : > { %8137 = vrsqrt.f32 %v4387_v33 }
0x1830   : > { %v8138_v34 = vpop.eup %8137 }
0x1831   : > { %v4389_v22 = vmul.f32 %v8138_v34, %v4381_v25 }
0x1833   : > { %v4396_v39 = vmul.f32 %v6998_v6, %v4389_v22 }
0x1835   : > { %v10208_v44 = vadd.f32 %v6999_v35, %v4396_v39 }
0x1837   : > { %v4406_v45 = vsel %vm2309_vm1, %v10208_v44, 0.0 }
0x1838   : > { %4407 = vadd.xlane.f32.xlu1 %v4406_v45 }
0x18c5   : > { %v4408_v47 = vpop.xlane.xlu1 %4407 }
0x18c6   : > { %v4409_v48 = vmul.f32 0.03125, %v4408_v47 }
0x18c8   : > { %v4410_v49 = vsub.f32 %v10208_v44, %v4409_v48 }
0x18ca   : > { %v4411_v31 = vmul.f32 %v4410_v49, %v4410_v49 }
0x18cc   : > { %v4412_v50 = vsel %vm2309_vm1, %v4411_v31, 0.0 }
0x18cd   : > { %4413 = vadd.xlane.f32.xlu0 %v4412_v50  ;;  %v4643_v50 = vld [vmem:[%s10725_s1] sm:$0xff] }
0x18ce   : > { %v7661_v53 = vpack.c.bf16 %v4644_v52, %v4643_v50 }
0x18d0   : > { %7662 = vmatpush3.bf16.msra.mxu1 %v7661_v53 }
0x18d1   : > { %7663 = vmatprep.subr.bf16.mxu1 %v9142_v0 }
0x195a   : > { %v4414_v61 = vpop.xlane.xlu0 %4413 }
0x195b   : > { %v4415_v62 = vmul.f32 0.03125, %v4414_v61 }
0x195d   : > { %v4416_v63 = vadd.f32 1e-05, %v4415_v62 }
0x195f   : > { %8139 = vrsqrt.f32 %v4416_v63  ;;  %v7007_v63 = vld [vmem:[%s10726_s2] ss:$0 sm:$0xff]  ;;  %s10729_s2 = smov 96  }
0x1969   : > { %v8140_v2 = vpop.eup %8139 }
0x196a   : > { %v4418_v30 = vmul.f32 %v8140_v2, %v4410_v49 }
0x196c   : > { %v4425_v5 = vmul.f32 %v7000_v3, %v4418_v30  ;;  %v7008_v3 = vld [vmem:[%s10727_s17] ss:$0 sm:$0xff]  ;;  %s10731_s17 = sld [smem:[#allocation98_spill]] }
0x196e   : > { %v4432_v7 = vadd.f32 %v7001_v4, %v4425_v5  ;;  %v7009_v5 = vld [vmem:[%s10728_s3] ss:$0 sm:$0xff]  ;;  %s10730_s3 = sld [smem:[#allocation99_spill]] }
0x1970   : > { %7405 = vmatmul.mubr.msk.f32.vlgmr.msra.gmra.mrb[18].mxu0 %vm2309_vm1, %v4432_v7 }
0x1971   : > { %7423 = vmatprep.mubr.msk.f32.mxu0 %vm9143_vm0, %v9144_v1  ;;  %7650 = vmatpush3.bf16.msra.mxu0 %v7649_v10 }
0x1972   : > { %7651 = vmatprep.subr.bf16.mxu0 %v9142_v0 }
0x1975   : > { %7653 = vmatpush3.bf16.msra.mxu0 %v7652_v13 }
0x1976   : > { %7654 = vmatprep.subr.bf16.mxu0 %v9142_v0 }
0x1979   : > { %7656 = vmatpush3.bf16.msra.mxu0 %v7655_v16 }
0x197a   : > { %7657 = vmatprep.subr.bf16.mxu0 %v9142_v0 }
0x197d   : > { %7659 = vmatpush3.bf16.msra.mxu0 %v7658_v18 }
0x197e   : > { %7442 = vmatprep.subr.mxu0 %v9144_v1 }
0x1a43   : > { %v4513_v20 = vpop.f32.mrb[18].mxu0 }
0x1a44   : > { %v4514_v21 = vadd.f32 %v7002_v19, %v4513_v20  ;;  %v7406_v23 = vpop.f32.mrb[19].mxu0 }
0x1a46   : > { %v7004_v24 = vmul.f32 -1.442695, %v4514_v21 }
0x1a48   : > { %8141 = vpow2.f32 %v7004_v24 }
0x1a52   : > { %v8142_v25 = vpop.eup %8141 }
0x1a53   : > { %v4520_v26 = vadd.f32 1.0, %v8142_v25 }
0x1a55   : > { %8143 = vrcp.f32 %v4520_v26 }
0x1a5f   : > { %v8144_v27 = vpop.eup %8143 }
0x1a60   : > { %v4523_v28 = vmul.f32 %v8144_v27, %v4514_v21 }
0x1a62   : > { %7424 = vmatmul.mubr.msk.f32.vlgmr.msra.gmra.mrb[20].mxu0 %vm2545_vm2, %v4523_v28 }
0x1a63   : > { %7444 = vmatprep.mubr.msk.f32.mxu0 %vm9143_vm0, %v9144_v1 }
0x1b35   : > { %v4608_v33 = vpop.f32.mrb[20].mxu0 }
0x1b36   : > { %v4609_v34 = vadd.f32 %v7005_v32, %v4608_v33  ;;  %v7425_v6 = vpop.f32.mrb[21].mxu0 }
0x1b38   : > { %v4612_v22 = vmul.f32 0.5, %v4609_v34 }
0x1b3a   : > { %v10241_v35 = vadd.f32 %v4612_v22, %v10208_v44  ;;  %v4645_v44 = vld [vmem:[%s10725_s1 + $0x10] sm:$0xff]  ;;  %v7017_v22 = vld [vmem:[%s10731_s17] ss:$0 sm:$0xff]  ;;  %s10733_s17 = sld [smem:[#allocation101_spill]]  ;;  %s10734_s1 = sld [smem:[#allocation100_spill]] }
0x1b3b   : > { %v7664_v55 = vpack.c.bf16 %v4646_v54, %v4645_v44 }
0x1b3c   : > { %v4616_v39 = vsel %vm2309_vm1, %v10241_v35, 0.0 }
0x1b3d   : > { %4617 = vadd.xlane.f32.xlu1 %v4616_v39  ;;  %7665 = vmatpush3.bf16.msra.mxu1 %v7664_v55 }
0x1b3e   : > { %7437 = vmatprep.subr.mxu1 %v9144_v1 }
0x1bca   : > { %v4618_v45 = vpop.xlane.xlu1 %4617 }
0x1bcb   : > { %v4619_v47 = vmul.f32 0.03125, %v4618_v45 }
0x1bcd   : > { %v4620_v48 = vsub.f32 %v10241_v35, %v4619_v47 }
0x1bcf   : > { %v4621_v49 = vmul.f32 %v4620_v48, %v4620_v48 }
0x1bd1   : > { %v4622_v31 = vsel %vm2309_vm1, %v4621_v49, 0.0 }
0x1bd2   : > { %4623 = vadd.xlane.f32.xlu0 %v4622_v31 }
0x1c5f   : > { %v4624_v56 = vpop.xlane.xlu0 %4623 }
0x1c60   : > { %v4625_v59 = vmul.f32 0.03125, %v4624_v56 }
0x1c62   : > { %v4626_v61 = vadd.f32 1e-05, %v4625_v59 }
0x1c64   : > { %8145 = vrsqrt.f32 %v4626_v61 }
0x1c6e   : > { %v8146_v62 = vpop.eup %8145 }
0x1c6f   : > { %v4628_v2 = vmul.f32 %v8146_v62, %v4620_v48 }
0x1c71   : > { %v4635_v30 = vmul.f32 %v7007_v63, %v4628_v2 }
0x1c73   : > { %v4642_v4 = vadd.f32 %v7008_v3, %v4635_v30 }
0x1c75   : > { %7435 = vmatmul.mubr.msk.f32.vlgmr.msra.gmra.mrb[26].mxu1 %vm2309_vm1, %v4642_v4 }
0x1c76   : > { %7439 = vmatprep.mubr.msk.f32.mxu1 %vm9143_vm0, %v9144_v1 }
0x1d48   : > { %v4723_v7 = vpop.f32.mrb[26].mxu1 }
0x1d49   : > { %v4724_v8 = vadd.f32 %v7009_v5, %v4723_v7  ;;  %v7436_v9 = vpop.f32.mrb[27].mxu1 }
0x1d4b   : > { %v7011_v10 = vmul.f32 -1.442695, %v4724_v8 }
0x1d4d   : > { %8147 = vpow2.f32 %v7011_v10 }
0x1d57   : > { %v8148_v11 = vpop.eup %8147 }
0x1d58   : > { %v4730_v12 = vadd.f32 1.0, %v8148_v11  ;;  %v7018_v11 = vld [vmem:[%s10733_s17] ss:$0 sm:$0xff]  ;;  %s10739_s17 = sld [smem:[#allocation96_spill]] }
0x1d5a   : > { %8149 = vrcp.f32 %v4730_v12 }
0x1d64   : > { %v8150_v13 = vpop.eup %8149 }
0x1d65   : > { %4734 = vrot.lane.b32.xlu1 %v8150_v13, %s10729_s2  ;;  %v7019_v13 = vld [vmem:[%s10734_s1] ss:$0 sm:$0xff]  ;;  %s10737_s1 = sld [smem:[#allocation93_spill]] }
0x1dd7   : > { %v4735_v14 = vpop.permute.xlu1 %4734 }
0x1dd8   : > { %v4737_v15 = vmul.f32 %v4735_v14, %v4724_v8 }
0x1dda   : > { %7438 = vmatpush3.msra.mxu1 %v4737_v15  ;;  %7443 = vmatpush3.msra.mxu0 %v4737_v15 }
0x1ddb   : > { %7440 = vmatmul.mubr.msk.f32.vlgmr.msra.gmra.mrb[28].mxu1 %vm2746_vm5, %v9989_v36  ;;  %7445 = vmatmul.mubr.msk.f32.vlgmr.msra.gmra.mrb[22].mxu0 %vm2746_vm5, %v10001_v38  ;;  %v4738_v36 = vld [vmem:[%s10730_s3] sm:$0x1f]  ;;  %s10732_s3 = sld [smem:[#allocation107_spill]] }
0x1ddc   : > { %7447 = vmatprep.subr.mxu1 %v9144_v1  ;;  %7452 = vmatprep.subr.mxu0 %v9144_v1  ;;  %v4812_v38 = vrot.slane %v4738_v36, %v2822_v42  ;;  %v5040_v20 = vrot.slane %v4738_v36, %v3059_v57 }
0x1ddd   : > { %7448 = vmatpush3.msra.mxu1 %v4737_v15  ;;  %7453 = vmatpush3.msra.mxu0 %v4737_v15 }
0x1dde   : > { %7449 = vmatprep.mubr.msk.f32.mxu1 %vm9143_vm0, %v9144_v1  ;;  %7457 = vmatprep.subr.mxu1 %v9144_v1 }
0x1ddf   : > { %7450 = vmatmul.mubr.msk.f32.vlgmr.msra.gmra.mrb[30].mxu1 %vm2746_vm5, %v10017_v40  ;;  %7454 = vmatprep.mubr.msk.f32.mxu0 %vm9143_vm0, %v9144_v1  ;;  %v4888_v40 = vrot.slane %v4738_v36, %v2901_v43  ;;  %v5116_v43 = vrot.slane %v4738_v36, %v3138_v58 }
0x1de0   : > { %7458 = vmatpush3.msra.mxu1 %v4737_v15  ;;  %7455 = vmatmul.mubr.msk.f32.vlgmr.msra.gmra.mrb[24].mxu0 %vm2746_vm5, %v10026_v41 }
0x1de1   : > { %7459 = vmatprep.mubr.msk.f32.mxu1 %vm9143_vm0, %v9144_v1  ;;  %7666 = vmatprep.subr.bf16.mxu0 %v9142_v0  ;;  %v5175_v54 = vld [vmem:[%s10732_s3] sm:$0xff]  ;;  %v5176_v55 = vld [vmem:[%s10732_s3 + $0x8] sm:$0xff]  ;;  %v5177_v56 = vld [vmem:[%s10732_s3 + $0x10] sm:$0xff] }
0x1de2   : > { %7470 = vmatprep.mubr.msk.f32.mxu0 %vm9143_vm0, %v9144_v1  ;;  %7672 = vmatprep.subr.bf16.mxu1 %v9142_v0  ;;  %v7667_v59 = vpack.c.bf16 %v5176_v55, %v5175_v54  ;;  %v5178_v61 = vld [vmem:[%s10732_s3 + $0x18] sm:$0xff]  ;;  %s10735_s3 = sld [smem:[#allocation106_spill]] }
0x1de3   : > { %7460 = vmatmul.mubr.msk.f32.vlgmr.msra.gmra.mrb[32].mxu1 %vm2746_vm5, %v9993_v37  ;;  %v4964_v37 = vrot.slane %v4738_v36, %v2980_v46  ;;  %v7670_v62 = vpack.c.bf16 %v5178_v61, %v5177_v56 }
0x1de4   : > { %7481 = vmatprep.mubr.msk.f32.mxu1 %vm9143_vm0, %v9144_v1  ;;  %7668 = vmatpush3.bf16.msra.mxu0 %v7667_v59 }
0x1de5   : > { %7669 = vmatprep.subr.bf16.mxu0 %v9142_v0 }
0x1de8   : > { %7671 = vmatpush3.bf16.msra.mxu0 %v7670_v62 }
0x1de9   : > { %7484 = vmatprep.subr.mxu0 %v9144_v1 }
0x1eae   : > { %v4805_v41 = vpop.f32.mrb[28].mxu1  ;;  %v4881_v16 = vpop.f32.mrb[22].mxu0 }
0x1eaf   : > { %v4813_v60 = vmul.f32 %v4812_v38, %v4805_v41  ;;  %v4889_v17 = vmul.f32 %v4888_v40, %v4881_v16  ;;  %v7441_v18 = vpop.f32.mrb[29].mxu1  ;;  %v7446_v19 = vpop.f32.mrb[23].mxu0 }
0x1eb1   : > { %v4890_v21 = vadd.f32 %v4889_v17, %v4813_v60  ;;  %v7021_v60 = vld [vmem:[%s10735_s3] ss:$0 sm:$0xff]  ;;  %s10738_s3 = sld [smem:[#allocation92_spill]] }
0x1eb2   : > { %v4957_v23 = vpop.f32.mrb[30].mxu1 }
0x1eb3   : > { %v4965_v24 = vmul.f32 %v4964_v37, %v4957_v23  ;;  %v7451_v42 = vpop.f32.mrb[31].mxu1  ;;  %v5033_v25 = vpop.f32.mrb[24].mxu0 }
0x1eb4   : > { %v5041_v26 = vmul.f32 %v5040_v20, %v5033_v25  ;;  %v7456_v27 = vpop.f32.mrb[25].mxu0 }
0x1eb5   : > { %v4966_v28 = vadd.f32 %v4965_v24, %v4890_v21 }
0x1eb6   : > { %v5109_v32 = vpop.f32.mrb[32].mxu1 }
0x1eb7   : > { %v5042_v33 = vadd.f32 %v5041_v26, %v4966_v28  ;;  %v5117_v34 = vmul.f32 %v5116_v43, %v5109_v32  ;;  %v7461_v6 = vpop.f32.mrb[33].mxu1  ;;  %v5289_v43 = vld [vmem:[%s10736_s4] sm:$0xff]  ;;  %v5290_v26 = vld [vmem:[%s10736_s4 + $0x8] sm:$0xff]  ;;  %v5292_v28 = vld [vmem:[%s10736_s4 + $0x18] sm:$0xff] }
0x1eb8   : > { %v7673_v27 = vpack.c.bf16 %v5290_v26, %v5289_v43 }
0x1eb9   : > { %v5118_v46 = vadd.f32 %v5117_v34, %v5042_v33 }
0x1eba   : > { %7674 = vmatpush3.bf16.msra.mxu1 %v7673_v27 }
0x1ebb   : > { %v5126_v39 = vadd.f32 %v7017_v22, %v5118_v46  ;;  %7675 = vmatprep.subr.bf16.mxu1 %v9142_v0  ;;  %v7023_v46 = vld [vmem:[%s10737_s1] ss:$0 sm:$0xff]  ;;  %s10741_s1 = smov 120  }
0x1ebd   : > { %v5127_v57 = vsel %vm2309_vm1, %v5126_v39, 0.0 }
0x1ebe   : > { %5128 = vadd.xlane.f32.xlu0 %v5127_v57  ;;  %v7024_v57 = vld [vmem:[%s10738_s3] ss:$0 sm:$0xff]  ;;  %s10742_s3 = smov 80  }
0x1f4b   : > { %v5129_v45 = vpop.xlane.xlu0 %5128 }
0x1f4c   : > { %v5130_v29 = vrot.slane %v5129_v45, 4 }
0x1f4e   : > { %v5131_v58 = vadd.f32 %v5130_v29, %v5129_v45 }
0x1f50   : > { %v5132_v47 = vrot.slane %v5131_v58, 2 }
0x1f52   : > { %v5133_v48 = vadd.f32 %v5132_v47, %v5131_v58  ;;  %v7025_v58 = vld [vmem:[%s10739_s17] ss:$0 sm:$0xff]  ;;  %s10744_s17 = smov 72  }
0x1f54   : > { %v5134_v49 = vrot.slane %v5133_v48, 1 }
0x1f56   : > { %v5135_v31 = vadd.f32 %v5134_v49, %v5133_v48 }
0x1f58   : > { %v5136_v50 = vmul.f32 0.00390625, %v5135_v31 }
0x1f5a   : > { %v5137_v52 = vsub.f32 %v5126_v39, %v5136_v50 }
0x1f5c   : > { %v5138_v53 = vmul.f32 %v5137_v52, %v5137_v52 }
0x1f5e   : > { %v5139_v44 = vsel %vm2309_vm1, %v5138_v53, 0.0 }
0x1f5f   : > { %5140 = vadd.xlane.f32.xlu0 %v5139_v44 }
0x1fec   : > { %v5141_v63 = vpop.xlane.xlu0 %5140 }
0x1fed   : > { %v5142_v2 = vrot.slane %v5141_v63, 4 }
0x1fef   : > { %v5143_v3 = vadd.f32 %v5142_v2, %v5141_v63 }
0x1ff1   : > { %v5144_v30 = vrot.slane %v5143_v3, 2 }
0x1ff3   : > { %v5145_v4 = vadd.f32 %v5144_v30, %v5143_v3 }
0x1ff5   : > { %v5146_v5 = vrot.slane %v5145_v4, 1 }
0x1ff7   : > { %v5147_v7 = vadd.f32 %v5146_v5, %v5145_v4 }
0x1ff9   : > { %v5148_v8 = vmul.f32 0.00390625, %v5147_v7 }
0x1ffb   : > { %v5149_v9 = vadd.f32 1e-05, %v5148_v8 }
0x1ffd   : > { %8151 = vrsqrt.f32 %v5149_v9 }
0x2007   : > { %v8152_v10 = vpop.eup %8151 }
0x2008   : > { %v5151_v12 = vmul.f32 %v8152_v10, %v5137_v52 }
0x200a   : > { %v5159_v14 = vmul.f32 %v7018_v11, %v5151_v12 }
0x200c   : > { %v5167_v15 = vadd.f32 %v7019_v13, %v5159_v14 }
0x200e   : > { %v7020_v36 = vmul.f32 -1.442695, %v5167_v15 }
0x2010   : > { %8153 = vpow2.f32 %v7020_v36 }
0x201a   : > { %v8154_v38 = vpop.eup %8153 }
0x201b   : > { %v5171_v40 = vadd.f32 1.0, %v8154_v38 }
0x201d   : > { %8155 = vrcp.f32 %v5171_v40 }
0x2027   : > { %v8156_v41 = vpop.eup %8155 }
0x2028   : > { %v5174_v16 = vmul.f32 %v8156_v41, %v5167_v15 }
0x202a   : > { %7471 = vmatmul.mubr.msk.f32.vlgmr.msra.gmra.mrb[26].mxu0 %vm2309_vm1, %v5174_v16 }
0x202b   : > { %7486 = vmatprep.mubr.msk.f32.mxu0 %vm9143_vm0, %v9144_v1 }
0x20fd   : > { %v5255_v17 = vpop.f32.mrb[26].mxu0 }
0x20fe   : > { %v5256_v18 = vadd.f32 %v7021_v60, %v5255_v17  ;;  %v7472_v19 = vpop.f32.mrb[27].mxu0 }
0x2100   : > { %v10312_v37 = vadd.f32 %v5256_v18, %v10241_v35  ;;  %v5291_v35 = vld [vmem:[%s10736_s4 + $0x10] sm:$0xff]  ;;  %s10740_s4 = smov 88  }
0x2101   : > { %v7676_v32 = vpack.c.bf16 %v5292_v28, %v5291_v35 }
0x2102   : > { %v5262_v20 = vsel %vm2309_vm1, %v10312_v37, 0.0 }
0x2103   : > { %5263 = vadd.xlane.f32.xlu0 %v5262_v20  ;;  %7677 = vmatpush3.bf16.msra.mxu1 %v7676_v32 }
0x2104   : > { %7489 = vmatprep.subr.mxu1 %v9144_v1 }
0x2190   : > { %v5264_v21 = vpop.xlane.xlu0 %5263 }
0x2191   : > { %v5265_v23 = vmul.f32 0.03125, %v5264_v21 }
0x2193   : > { %v5266_v24 = vsub.f32 %v10312_v37, %v5265_v23 }
0x2195   : > { %v5267_v42 = vmul.f32 %v5266_v24, %v5266_v24 }
0x2197   : > { %v5268_v25 = vsel %vm2309_vm1, %v5267_v42, 0.0 }
0x2198   : > { %5269 = vadd.xlane.f32.xlu0 %v5268_v25 }
0x2225   : > { %v5270_v33 = vpop.xlane.xlu0 %5269 }
0x2226   : > { %v5271_v34 = vmul.f32 0.03125, %v5270_v33 }
0x2228   : > { %v5272_v6 = vadd.f32 1e-05, %v5271_v34 }
0x222a   : > { %8157 = vrsqrt.f32 %v5272_v6 }
0x2234   : > { %v8158_v22 = vpop.eup %8157 }
0x2235   : > { %v5274_v39 = vmul.f32 %v8158_v22, %v5266_v24 }
0x2237   : > { %v5281_v45 = vmul.f32 %v7023_v46, %v5274_v39 }
0x2239   : > { %v5288_v29 = vadd.f32 %v7024_v57, %v5281_v45 }
0x223b   : > { %7482 = vmatmul.mubr.msk.f32.vlgmr.msra.gmra.mrb[34].mxu1 %vm2309_vm1, %v5288_v29 }
0x223c   : > { %7491 = vmatprep.mubr.msk.f32.mxu1 %vm9143_vm0, %v9144_v1 }
0x230e   : > { %v5369_v47 = vpop.f32.mrb[34].mxu1 }
0x230f   : > { %v10330_v48 = vadd.f32 %v7025_v58, %v5369_v47  ;;  %v7483_v49 = vpop.f32.mrb[35].mxu1 }
0x2311   : > { %5541 = vrot.lane.b32.xlu0 %v10330_v48, %s10740_s4  ;;  %5374 = vrot.lane.b32.xlu1 %v10330_v48, %s10729_s2  ;;  %s10747_s4 = smov 48   ;;  %s10749_s2 = smov 56  }
0x2315   : > { %5539 = vrot.lane.b32.xlu1 %v10330_v48, %s10741_s1  ;;  %s10750_s1 = sld [smem:[#allocation95_spill]] }
0x2319   : > { %5708 = vrot.lane.b32.xlu1 %v10330_v48, %s10742_s3  ;;  %s10751_s3 = smov 8  }
0x231d   : > { %5706 = vrot.lane.b32.xlu1 %v10330_v48, %s10743_s6  ;;  %s10746_s6 = smov 64  }
0x2321   : > { %5875 = vrot.lane.b32.xlu1 %v10330_v48, %s10744_s17  ;;  %s10752_s17 = sld [smem:[#allocation94_spill]] }
0x2325   : > { %5873 = vrot.lane.b32.xlu1 %v10330_v48, %s10745_s9  ;;  %s10748_s9 = smov 40  }
0x2383   : > { %v5375_v31 = vpop.permute.xlu1 %5374  ;;  %v5542_v50 = vpop.permute.xlu0 %5541 }
0x2384   : > { %7485 = vmatpush3.xpose.msk.msra.mxu0 %vm2746_vm5, %v5375_v31 }
0x2385   : > { %7494 = vmatprep.subr.mxu0 %v9144_v1 }
0x2387   : > { %7487 = vmatmul.mubr.msk.f32.vlgmr.msra.gmra.mrb[28].mxu0 %vm2746_vm5, %v10330_v48  ;;  %v5540_v52 = vpop.permute.xlu1 %5539 }
0x2388   : > { %7495 = vmatpush3.xpose.msk.msra.mxu0 %vm2746_vm5, %v5542_v50  ;;  %7496 = vmatprep.mubr.msk.f32.mxu0 %vm9143_vm0, %v9144_v1 }
0x2389   : > { %7504 = vmatprep.subr.mxu0 %v9144_v1 }
0x238b   : > { %7497 = vmatmul.mubr.msk.f32.vlgmr.msra.gmra.mrb[30].mxu0 %vm2746_vm5, %v5540_v52  ;;  %v5709_v53 = vpop.permute.xlu1 %5708  ;;  %v6055_v52 = vld [vmem:[%s10750_s1] sm:$0xff] }
0x238c   : > { %7505 = vmatpush3.xpose.msk.msra.mxu0 %vm2746_vm5, %v5709_v53  ;;  %7506 = vmatprep.mubr.msk.f32.mxu0 %vm9143_vm0, %v9144_v1  ;;  %v6056_v53 = vld [vmem:[%s10750_s1 + $0x8] sm:$0xff] }
0x238d   : > { %7514 = vmatprep.subr.mxu0 %v9144_v1 }
0x238f   : > { %v5707_v44 = vpop.permute.xlu1 %5706 }
0x2390   : > { %7507 = vmatmul.mubr.msk.f32.vlgmr.msra.gmra.mrb[32].mxu0 %vm2746_vm5, %v5707_v44  ;;  %v7679_v44 = vpack.c.bf16 %v6056_v53, %v6055_v52 }
0x2391   : > { %7516 = vmatprep.mubr.msk.f32.mxu0 %vm9143_vm0, %v9144_v1 }
0x2393   : > { %v5876_v54 = vpop.permute.xlu1 %5875 }
0x2394   : > { %7515 = vmatpush3.xpose.msk.msra.mxu0 %vm2746_vm5, %v5876_v54 }
0x2395   : > { %7678 = vmatprep.subr.bf16.mxu0 %v9142_v0 }
0x2397   : > { %v5874_v55 = vpop.permute.xlu1 %5873 }
0x2398   : > { %7517 = vmatmul.mubr.msk.f32.vlgmr.msra.gmra.mrb[34].mxu0 %vm2746_vm5, %v5874_v55 }
0x2399   : > { %7532 = vmatprep.mubr.msk.f32.mxu0 %vm9143_vm0, %v9144_v1  ;;  %7680 = vmatpush3.bf16.msra.mxu0 %v7679_v44 }
0x239a   : > { %7681 = vmatprep.subr.bf16.mxu0 %v9142_v0 }
0x245a   : > { %v5446_v56 = vpop.f32.mrb[28].mxu0 }
0x245b   : > { %v5450_v59 = vmul.f32 0.35355338, %v5446_v56  ;;  %v7488_v61 = vpop.f32.mrb[29].mxu0  ;;  %v6057_v56 = vld [vmem:[%s10750_s1 + $0x10] sm:$0xff] }
0x245d   : > { %v5451_v62 = vadd.f32 %v5450_v59, %v10115_v51  ;;  %v6058_v59 = vld [vmem:[%s10750_s1 + $0x18] sm:$0xff] }
0x245e   : > { %v5613_v63 = vpop.f32.mrb[30].mxu0  ;;  %v7682_v61 = vpack.c.bf16 %v6058_v59, %v6057_v56 }
0x245f   : > { %v5617_v2 = vmul.f32 0.35355338, %v5613_v63  ;;  %v7498_v3 = vpop.f32.mrb[31].mxu0  ;;  %v5452_v30 = vsel %vm2746_vm5, %v5451_v62, -inf }
0x2460   : > { %5453 = vmax.xlane.f32.xlu1 %v5452_v30  ;;  %7683 = vmatpush3.bf16.msra.mxu0 %v7682_v61 }
0x2461   : > { %v5618_v4 = vadd.f32 %v5617_v2, %v10115_v51  ;;  %7690 = vmatprep.subr.bf16.mxu0 %v9142_v0 }
0x2463   : > { %v5780_v5 = vpop.f32.mrb[32].mxu0  ;;  %v5619_v7 = vsel %vm2746_vm5, %v5618_v4, -inf }
0x2464   : > { %v5784_v8 = vmul.f32 0.35355338, %v5780_v5  ;;  %5620 = vmax.xlane.f32.xlu0 %v5619_v7  ;;  %v7508_v9 = vpop.f32.mrb[33].mxu0 }
0x2466   : > { %v5785_v10 = vadd.f32 %v5784_v8, %v10115_v51 }
0x2468   : > { %v5786_v11 = vsel %vm2746_vm5, %v5785_v10, -inf }
0x2469   : > { %5787 = vmax.xlane.f32.xlu0 %v5786_v11 }
0x246b   : > { %v5947_v12 = vpop.f32.mrb[34].mxu0 }
0x246c   : > { %v5951_v13 = vmul.f32 0.35355338, %v5947_v12  ;;  %v7518_v14 = vpop.f32.mrb[35].mxu0  ;;  %v7039_v12 = vld [vmem:[%s10752_s17] ss:$0 sm:$0xff] }
0x246e   : > { %v5952_v15 = vadd.f32 %v5951_v13, %v10115_v51 }
0x2470   : > { %v5953_v36 = vsel %vm2746_vm5, %v5952_v15, -inf }
0x2471   : > { %5463 = vrot.lane.b32.xlu1 %v10330_v48, %s10746_s6  ;;  %5954 = vmax.xlane.f32.xlu0 %v5953_v36  ;;  %s10753_s6 = smov 16  }
0x24ed   : > { %v5454_v38 = vpop.xlane.xlu1 %5453 }
0x24ee   : > { %v5455_v40 = vsub.f32 %v5451_v62, %v5454_v38 }
0x24f0   : > { %v5456_v41 = vmul.f32 1.442695, %v5455_v40 }
0x24f1   : > { %v5464_v16 = vpop.permute.xlu1 %5463  ;;  %v5621_v60 = vpop.xlane.xlu0 %5620 }
0x24f2   : > { %8159 = vpow2.f32 %v5456_v41  ;;  %v5622_v17 = vsub.f32 %v5618_v4, %v5621_v60  ;;  %7490 = vmatpush3.msra.mxu1 %v5464_v16 }
0x24f3   : > { %7499 = vmatprep.subr.mxu1 %v9144_v1 }
0x24f4   : > { %v5623_v18 = vmul.f32 1.442695, %v5622_v17 }
0x24f6   : > { %8161 = vpow2.f32 %v5623_v18  ;;  %v5788_v19 = vpop.xlane.xlu0 %5787 }
0x24f7   : > { %v5789_v51 = vsub.f32 %v5785_v10, %v5788_v19 }
0x24f9   : > { %v5790_v20 = vmul.f32 1.442695, %v5789_v51 }
0x24fb   : > { %8163 = vpow2.f32 %v5790_v20 }
0x24fc   : > { %v8160_v21 = vpop.eup %8159 }
0x24fd   : > { %v5458_v23 = vsel %vm2746_vm5, %v8160_v21, 0.0 }
0x24fe   : > { %5459 = vadd.xlane.f32.xlu1 %v5458_v23  ;;  %v5955_v24 = vpop.xlane.xlu0 %5954 }
0x24ff   : > { %v5956_v42 = vsub.f32 %v5952_v15, %v5955_v24 }
0x2500   : > { %v8162_v25 = vpop.eup %8161 }
0x2501   : > { %v5957_v43 = vmul.f32 1.442695, %v5956_v42  ;;  %v5625_v26 = vsel %vm2746_vm5, %v8162_v25, 0.0 }
0x2502   : > { %5626 = vadd.xlane.f32.xlu0 %v5625_v26 }
0x2503   : > { %8165 = vpow2.f32 %v5957_v43  ;;  %v7041_v43 = vld [vmem:[#allocation36] ss:$0 sm:$0xff] }
0x2505   : > { %v8164_v27 = vpop.eup %8163 }
0x2506   : > { %v5792_v35 = vsel %vm2746_vm5, %v8164_v27, 0.0 }
0x2507   : > { %5793 = vadd.xlane.f32.xlu1 %v5792_v35 }
0x250d   : > { %v8166_v28 = vpop.eup %8165 }
0x250e   : > { %v5959_v32 = vsel %vm2746_vm5, %v8166_v28, 0.0 }
0x250f   : > { %5960 = vadd.xlane.f32.xlu0 %v5959_v32 }
0x2518   : > { %5797 = vrot.lane.b32.xlu1 %v10330_v48, %s10747_s4  ;;  %s10754_s4 = smov 24  }
0x251c   : > { %5964 = vrot.lane.b32.xlu1 %v10330_v48, %s10748_s9  ;;  %s10755_s9 = sld [smem:[#allocation118_spill]] }
0x2522   : > { %v6169_v18 = vld [vmem:[%s10755_s9] sm:$0xff]  ;;  %v6170_v19 = vld [vmem:[%s10755_s9 + $0x8] sm:$0xff]  ;;  %v6171_v20 = vld [vmem:[%s10755_s9 + $0x10] sm:$0xff] }
0x2523   : > { %v7685_v51 = vpack.c.bf16 %v6170_v19, %v6169_v18  ;;  %v7050_v18 = vld [vmem:[#allocation43] ss:$0 sm:$0xff] }
0x2525   : > { %5630 = vrot.lane.b32.xlu0 %v10330_v48, %s10749_s2  ;;  %s10756_s2 = sld [smem:[#allocation119_spill]] }
0x252b   : > { %v6260_v32 = vld [vmem:[%s10756_s2] sm:$0xff] }
0x258b   : > { %v5460_v33 = vpop.xlane.xlu1 %5459 }
0x258c   : > { %8167 = vrcp.f32 %v5460_v33  ;;  %v6261_v33 = vld [vmem:[%s10756_s2 + $0x8] sm:$0xff] }
0x258f   : > { %v5627_v34 = vpop.xlane.xlu0 %5626 }
0x2590   : > { %8169 = vrcp.f32 %v5627_v34  ;;  %v7691_v34 = vpack.c.bf16 %v6261_v33, %v6260_v32  ;;  %v7053_v32 = vld [vmem:[#allocation40] ss:$0 sm:$0xff] }
0x2594   : > { %v5794_v6 = vpop.xlane.xlu1 %5793 }
0x2595   : > { %8171 = vrcp.f32 %v5794_v6  ;;  %v6262_v6 = vld [vmem:[%s10756_s2 + $0x10] sm:$0xff] }
0x2596   : > { %v8168_v22 = vpop.eup %8167 }
0x2597   : > { %v5462_v46 = vmul.f32 %v8168_v22, %v8160_v21  ;;  %v6172_v21 = vld [vmem:[%s10755_s9 + $0x18] sm:$0xff] }
0x2598   : > { %v5798_v29 = vpop.permute.xlu1 %5797  ;;  %v6263_v22 = vld [vmem:[%s10756_s2 + $0x18] sm:$0xff] }
0x2599   : > { %7492 = vmatmul.mubr.msk.f32.vlgmr.msra.gmra.mrb[36].mxu1 %vm2746_vm5, %v5462_v46  ;;  %v7694_v46 = vpack.c.bf16 %v6263_v22, %v6262_v6 }
0x259a   : > { %7501 = vmatprep.mubr.msk.f32.mxu1 %vm9143_vm0, %v9144_v1  ;;  %v8170_v57 = vpop.eup %8169 }
0x259b   : > { %v5629_v45 = vmul.f32 %v8170_v57, %v8162_v25  ;;  %v6265_v57 = vld [vmem:[%s10756_s2 + $0x28] sm:$0xff] }
0x259c   : > { %v5961_v39 = vpop.xlane.xlu0 %5960  ;;  %v5965_v49 = vpop.permute.xlu1 %5964 }
0x259d   : > { %8173 = vrcp.f32 %v5961_v39  ;;  %v6264_v39 = vld [vmem:[%s10756_s2 + $0x20] sm:$0xff] }
0x259f   : > { %v8172_v47 = vpop.eup %8171 }
0x25a0   : > { %v5631_v58 = vpop.permute.xlu0 %5630  ;;  %v5796_v48 = vmul.f32 %v8172_v47, %v8164_v27  ;;  %v7042_v27 = vld [vmem:[#allocation34] ss:$0 sm:$0xff]  ;;  %v7043_v47 = vld [vmem:[#allocation31] ss:$0 sm:$0xff] }
0x25a1   : > { %7500 = vmatpush3.msra.mxu1 %v5631_v58 }
0x25a2   : > { %7502 = vmatmul.mubr.msk.f32.vlgmr.msra.gmra.mrb[38].mxu1 %vm2746_vm5, %v5629_v45  ;;  %7509 = vmatprep.subr.mxu1 %v9144_v1  ;;  %v7697_v45 = vpack.c.bf16 %v6265_v57, %v6264_v39 }
0x25a3   : > { %7510 = vmatpush3.msra.mxu1 %v5798_v29  ;;  %7511 = vmatprep.mubr.msk.f32.mxu1 %vm9143_vm0, %v9144_v1  ;;  %v6267_v29 = vld [vmem:[%s10756_s2 + $0x38] sm:$0xff] }
0x25a4   : > { %7519 = vmatprep.subr.mxu1 %v9144_v1 }
0x25a6   : > { %7512 = vmatmul.mubr.msk.f32.vlgmr.msra.gmra.mrb[40].mxu1 %vm2746_vm5, %v5796_v48 }
0x25a7   : > { %v8174_v31 = vpop.eup %8173  ;;  %7520 = vmatpush3.msra.mxu1 %v5965_v49  ;;  %7521 = vmatprep.mubr.msk.f32.mxu1 %vm9143_vm0, %v9144_v1 }
0x25a8   : > { %v5963_v50 = vmul.f32 %v8174_v31, %v8166_v28  ;;  %7684 = vmatprep.subr.bf16.mxu1 %v9142_v0 }
0x25aa   : > { %7522 = vmatmul.mubr.msk.f32.vlgmr.msra.gmra.mrb[42].mxu1 %vm2746_vm5, %v5963_v50 }
0x25ab   : > { %7543 = vmatprep.mubr.msk.f32.mxu1 %vm9143_vm0, %v9144_v1  ;;  %7686 = vmatpush3.bf16.msra.mxu1 %v7685_v51 }
0x25ac   : > { %7687 = vmatprep.subr.bf16.mxu1 %v9142_v0 }
0x266c   : > { %v5535_v54 = vpop.f32.mrb[36].mxu1 }
0x266d   : > { %v7493_v55 = vpop.f32.mrb[37].mxu1 }
0x266e   : > { %v7046_v55 = vld [vmem:[#allocation33] ss:$0 sm:$0xff] }
0x2675   : > { %v5702_v62 = vpop.f32.mrb[38].mxu1 }
0x2676   : > { %6041 = vrot.lane.b32.xlu1 %v5702_v62, %s10751_s3  ;;  %v7503_v63 = vpop.f32.mrb[39].mxu1  ;;  %s2289_s3 = sand.u32 1, %s9037_s5  }
0x2677   : > { %s6941_s17 = sshll.u32 %s2289_s3, 3  ;;  %s6495_s9 = scalar_lea.sflag [#allocation6], %s2289_s3 }
0x2679   : > { %v5869_v2 = vpop.f32.mrb[40].mxu1 }
0x267a   : > { %6045 = vrot.lane.b32.xlu0 %v5869_v2, %s10753_s6  ;;  %v7513_v3 = vpop.f32.mrb[41].mxu1  ;;  %s7055_s6 = sshll.u32 %s9533_s11, 7  ;;  %s9160_s11 = smov [#allocation45]  }
0x267d   : > { %v6036_v30 = vpop.f32.mrb[42].mxu1 }
0x267e   : > { %6049 = vrot.lane.b32.xlu1 %v6036_v30, %s10754_s4  ;;  %v7523_v4 = vpop.f32.mrb[43].mxu1  ;;  %s2291_s4 = scalar_lea.vmem [#allocation45], %s6941_s17  ;;  %s8929_s17 = sshll.u32 %s9160_s11, 4  ;;  %s8930_s17 = int_to_ptr.vmem [resolvable:$false] %s8929_s17 }
0x267f   : > { %s6508_s1 = sshll.u32 %s2291_s4, 4  ;;  %s8931_s12 = scalar_lea.vmem %s8930_s17, 256  ;;  %s10463_s1 = int_to_ptr.vmem [resolvable:$true] %s6508_s1 }
0x2680   : > { %s8925_s10 = scalar_lea.vmem %s10463_s1, 128  ;;  %p8932_p3 = scmp.lt.s32.totalorder %s10463_s1, %s8930_s17 }
0x2681   : > { %p8926_p7 = scmp.ne.s32.totalorder %s10463_s1, %s8925_s10  ;;  %p8933_p10 = scmp.lt.s32.totalorder %s8931_s12, %s8925_s10 }
0x2683   : > { %p8927_p8 = pnand %p8926_p7, %p10757_p5  ;;  %p8934_p11 = por %p8933_p10, %p8932_p3 }
0x2685   : > { %p8928_p9 = pneg %p8927_p8 }
0x2687   : > { %p8935_p0 = pnand %p8934_p11, %p8928_p9 }
0x26e8   : > { %v6042_v5 = vpop.permute.xlu1 %6041 }
0x26e9   : > { %v6052_v8 = vsel %vm2746_vm5, %v5535_v54, %v6042_v5 }
0x26ec   : > { %v6046_v7 = vpop.permute.xlu0 %6045 }
0x26ed   : > { %v6053_v9 = vsel %vm4076_vm10, %v6052_v8, %v6046_v7  ;;  %v6379_v8 = vld [vmem:[%s9504_s23] sm:$0xff] }
0x26f0   : > { %v6050_v10 = vpop.permute.xlu1 %6049 }
0x26f1   : > { %v6054_v11 = vsel %vm4078_vm11, %v6053_v9, %v6050_v10  ;;  %v6380_v9 = vld [vmem:[%s9504_s23 + $0x8] sm:$0xff] }
0x26f2   : > { %7533 = vmatmul.mubr.msk.f32.vlgmr.msra.gmra.mrb[36].mxu0 %vm2309_vm1, %v6054_v11  ;;  %v7703_v10 = vpack.c.bf16 %v6380_v9, %v6379_v8  ;;  %v6381_v11 = vld [vmem:[%s9504_s23 + $0x10] sm:$0xff] }
0x26f3   : > { %7562 = vmatprep.mubr.msk.f32.mxu0 %vm9143_vm0, %v9144_v1  ;;  %7692 = vmatpush3.bf16.msra.mxu0 %v7691_v34 }
0x26f4   : > { %7693 = vmatprep.subr.bf16.mxu0 %v9142_v0 }
0x26f7   : > { %7695 = vmatpush3.bf16.msra.mxu0 %v7694_v46 }
0x26f8   : > { %7696 = vmatprep.subr.bf16.mxu0 %v9142_v0 }
0x26fb   : > { %7698 = vmatpush3.bf16.msra.mxu0 %v7697_v45 }
0x26fc   : > { %7699 = vmatprep.subr.bf16.mxu0 %v9142_v0 }
0x27c5   : > { %v6135_v13 = vpop.f32.mrb[36].mxu0 }
0x27c6   : > { %v6136_v14 = vadd.f32 %v7039_v12, %v6135_v13  ;;  %v7534_v15 = vpop.f32.mrb[37].mxu0  ;;  %v6382_v12 = vld [vmem:[%s9504_s23 + $0x18] sm:$0xff] }
0x27c7   : > { %v7706_v13 = vpack.c.bf16 %v6382_v12, %v6381_v11 }
0x27c8   : > { %v10420_v36 = vadd.f32 %v6136_v14, %v10312_v37  ;;  %v7688_v37 = vpack.c.bf16 %v6172_v21, %v6171_v20 }
0x27ca   : > { %v6142_v38 = vsel %vm2309_vm1, %v10420_v36, 0.0  ;;  %7689 = vmatpush3.bf16.msra.mxu1 %v7688_v37 }
0x27cb   : > { %6143 = vadd.xlane.f32.xlu0 %v6142_v38  ;;  %7702 = vmatprep.subr.bf16.mxu1 %v9142_v0 }
0x2858   : > { %v6144_v40 = vpop.xlane.xlu0 %6143 }
0x2859   : > { %v6145_v41 = vmul.f32 0.03125, %v6144_v40  ;;  %v7048_v40 = vld [vmem:[#allocation39] ss:$0 sm:$0xff] }
0x285b   : > { %v6146_v16 = vsub.f32 %v10420_v36, %v6145_v41 }
0x285d   : > { %v6147_v60 = vmul.f32 %v6146_v16, %v6146_v16 }
0x285f   : > { %v6148_v17 = vsel %vm2309_vm1, %v6147_v60, 0.0 }
0x2860   : > { %6149 = vadd.xlane.f32.xlu1 %v6148_v17 }
0x28ed   : > { %v6150_v23 = vpop.xlane.xlu1 %6149 }
0x28ee   : > { %v6151_v24 = vmul.f32 0.03125, %v6150_v23 }
0x28f0   : > { %v6152_v42 = vadd.f32 1e-05, %v6151_v24 }
0x28f2   : > { %8175 = vrsqrt.f32 %v6152_v42 }
0x28fc   : > { %v8176_v25 = vpop.eup %8175 }
0x28fd   : > { %v6154_v26 = vmul.f32 %v8176_v25, %v6146_v16  ;;  %v7049_v16 = vld [vmem:[#allocation37] ss:$0 sm:$0xff] }
0x28ff   : > { %v6161_v35 = vmul.f32 %v7041_v43, %v6154_v26 }
0x2901   : > { %v6168_v28 = vadd.f32 %v7042_v27, %v6161_v35  ;;  %v7052_v35 = vld [vmem:[#allocation42] ss:$0 sm:$0xff] }
0x2903   : > { %7544 = vmatmul.mubr.msk.f32.vlgmr.msra.gmra.mrb[44].mxu1 %vm2309_vm1, %v6168_v28 }
0x2904   : > { %7573 = vmatprep.mubr.msk.f32.mxu1 %vm9143_vm0, %v9144_v1  ;;  %v6266_v1 = vld [vmem:[%s10756_s2 + $0x30] sm:$0xff]  ;;  %7704 = vmatpush3.bf16.msra.mxu1 %v7703_v10  ;;  %s10461_s2 = scalar_lea.hbm %s9509_s8, %s7055_s6 }
0x2905   : > { %v7700_v58 = vpack.c.bf16 %v6267_v29, %v6266_v1  ;;  %7705 = vmatprep.subr.bf16.mxu1 %v9142_v0 }
0x2907   : > { %7701 = vmatpush3.bf16.msra.mxu0 %v7700_v58 }
0x2908   : > { %7707 = vmatpush3.bf16.msra.mxu1 %v7706_v13 }
0x29d6   : > { %v6249_v48 = vpop.f32.mrb[44].mxu1 }
0x29d7   : > { %v6250_v49 = vadd.f32 %v7043_v47, %v6249_v48  ;;  %v7545_v31 = vpop.f32.mrb[45].mxu1 }
0x29d9   : > { %v7045_v50 = vmul.f32 -1.442695, %v6250_v49 }
0x29db   : > { %8177 = vpow2.f32 %v7045_v50 }
0x29e5   : > { %v8178_v52 = vpop.eup %8177 }
0x29e6   : > { %v6256_v53 = vadd.f32 1.0, %v8178_v52 }
0x29e8   : > { %8179 = vrcp.f32 %v6256_v53 }
0x29f2   : > { %v8180_v44 = vpop.eup %8179 }
0x29f3   : > { %v6259_v54 = vmul.f32 %v8180_v44, %v6250_v49 }
0x29f5   : > { %7563 = vmatmul.mubr.msk.f32.vlgmr.msra.gmra.mrb[38].mxu0 %vm2545_vm2, %v6259_v54 }
0x2ac8   : > { %v6344_v56 = vpop.f32.mrb[38].mxu0 }
0x2ac9   : > { %v6345_v59 = vadd.f32 %v7046_v55, %v6344_v56  ;;  %v7564_v61 = vpop.f32.mrb[39].mxu0 }
0x2acb   : > { %v6348_v62 = vmul.f32 0.5, %v6345_v59 }
0x2acd   : > { %v6349_v63 = vadd.f32 %v6348_v62, %v10420_v36 }
0x2acf   : > { %v6352_v2 = vsel %vm2309_vm1, %v6349_v63, 0.0 }
0x2ad0   : > { %6353 = vadd.xlane.f32.xlu0 %v6352_v2 }
0x2b5d   : > { %v6354_v3 = vpop.xlane.xlu0 %6353 }
0x2b5e   : > { %v6355_v30 = vmul.f32 0.03125, %v6354_v3 }
0x2b60   : > { %v6356_v4 = vsub.f32 %v6349_v63, %v6355_v30 }
0x2b62   : > { %v6357_v5 = vmul.f32 %v6356_v4, %v6356_v4 }
0x2b64   : > { %v6358_v7 = vsel %vm2309_vm1, %v6357_v5, 0.0 }
0x2b65   : > { %6359 = vadd.xlane.f32.xlu0 %v6358_v7 }
0x2bf2   : > { %v6360_v14 = vpop.xlane.xlu0 %6359 }
0x2bf3   : > { %v6361_v15 = vmul.f32 0.03125, %v6360_v14 }
0x2bf5   : > { %v6362_v36 = vadd.f32 1e-05, %v6361_v15 }
0x2bf7   : > { %8181 = vrsqrt.f32 %v6362_v36 }
0x2c01   : > { %v8182_v38 = vpop.eup %8181 }
0x2c02   : > { %v6364_v41 = vmul.f32 %v8182_v38, %v6356_v4 }
0x2c04   : > { %v6371_v60 = vmul.f32 %v7048_v40, %v6364_v41 }
0x2c06   : > { %v6378_v17 = vadd.f32 %v7049_v16, %v6371_v60 }
0x2c08   : > { %7574 = vmatmul.mubr.msk.f32.vlgmr.msra.gmra.mrb[46].mxu1 %vm2309_vm1, %v6378_v17 }
0x2cdb   : > { %v6459_v19 = vpop.f32.mrb[46].mxu1 }
0x2cdc   : > { %v6460_v51 = vadd.f32 %v7050_v18, %v6459_v19  ;;  %v7575_v20 = vpop.f32.mrb[47].mxu1 }
0x2cde   : > { %v6465_v0 = vsel %vm4078_vm11, %v6460_v51, 0.0 }
0x2cdf   : > { %6466 = vadd.xlane.f32.xlu0 %v6465_v0 }
0x2d6c   : > { %v6467_v21 = vpop.xlane.xlu0 %6466 }
0x2d6d   : > { %v6469_v37 = vmul.f32 0.041666668, %v6467_v21 }
0x2d6f   : > { %v6470_v23 = vsub.f32 %v6460_v51, %v6469_v37 }
0x2d71   : > { %v6471_v24 = vmul.f32 %v6470_v23, %v6470_v23 }
0x2d73   : > { %v6472_v42 = vsel %vm4078_vm11, %v6471_v24, 0.0 }
0x2d74   : > { %6473 = vadd.xlane.f32.xlu1 %v6472_v42 }
0x2e01   : > { %v6474_v25 = vpop.xlane.xlu1 %6473 }
0x2e02   : > { %v6475_v43 = vmul.f32 0.041666668, %v6474_v25 }
0x2e04   : > { %v6476_v26 = vadd.f32 1e-05, %v6475_v43 }
0x2e06   : > { %8183 = vrsqrt.f32 %v6476_v26 }
0x2e10   : > { %v8184_v27 = vpop.eup %8183 }
0x2e11   : > { %v6478_v28 = vmul.f32 %v8184_v27, %v6470_v23 }
0x2e13   : > { %v6485_v33 = vmul.f32 %v7052_v35, %v6478_v28 }
0x2e15   : > { %v6492_v34 = vadd.f32 %v7053_v32, %v6485_v33 }
0x2e17   : > { %6493 = vst.msk [vmem:[%s2291_s4] sm:$0xff] %vm4078_vm11, %v6492_v34 }
0x2e18   : > { %8938 = shalt.err (!%p8935_p0)
}
0x2e19   : > { %s8939_s3 = scalar_lea.hbm %s10461_s2, 128  ;;  %s8943_s6 = scalar_lea.hbm %s9509_s8, 256 }
0x2e1a   : > { %p8940_p1 = scmp.ne.s32.totalorder %s10461_s2, %s8939_s3  ;;  %p8944_p2 = scmp.lt.u32.totalorder %s10461_s2, %s9509_s8 }
0x2e1b   : > { %p8945_p4 = scmp.lt.u32.totalorder %s8943_s6, %s8939_s3  ;;  %p8947_p7 = scmp.lt.u32.totalorder %s8939_s3, %s10461_s2 }
0x2e1c   : > { %p8941_p12 = pnand %p8940_p1, %p10757_p5 }
0x2e1d   : > { %p8946_p6 = por %p8945_p4, %p8944_p2 }
0x2e1e   : > { %p8942_p13 = pneg %p8941_p12 }
0x2e1f   : > { %p8948_p8 = por %p8947_p7, %p8946_p6 }
0x2e21   : > { %p8949_p9 = pnand %p8948_p8, %p8942_p13 }
0x2e23   : > { %8952 = shalt.err (!%p8949_p9)
}
0x2e24   : > { %7812 = dma.vmem_to_hbm [thread:$0]  (%p10757_p5), %s10463_s1, 128, %s10461_s2, %s6495_s9  }
0x2e25 PF: > { %s10758_s10 = sld [smem:[#allocation126_spill]]  ;;  %p7949_p3 = scmp.ge.s32.totalorder %s9045_s7, 2 }
0x2e26   : > { %s6520_s12 = sand.u32 1, %s9033_s0  }
0x2e27   : > { %s6521_s4 = scalar_lea.sflag [#allocation6], %s6520_s12 }
0x2e2b   : > { %p10759_p10 = scmp.ne.s32.totalorder %s10758_s10, 0 }
0x2e2d   : > { %p7894_p11 = pnand %p7949_p3, %p10759_p10 }
0x2e2f   : > { %9028 = dma.done.wait (!%p7894_p11), %s6521_s4, 128  }
0x2e30   : > { %9030 = vsyncadd (!%p7894_p11), %s6521_s4, 4294967168  ;;  %s10760_s7 = sld [smem:[#allocation124_spill]]  ;;  %s10761_s11 = sld [smem:[#allocation123_spill]] }
0x2e31   : > { %s10762_s17 = sld [smem:[#allocation125_spill]]  ;;  %s10763_s0 = smov %s9037_s5 }
0x2e36   : > { %p167_p0 = scmp.ge.s32.totalorder %s10760_s7, 4   ;;  %s10764_s5 = smov %s10761_s11 }
0x2e38   :  { %169 = sbr.rel (!%p167_p0) target bundleno = 161 (0xa1), region = 496 }
0x2e3f   :  { %6526 = vsyncpa [#allocation5], 1 }
0x2e40   :  { %6528 = vsyncpa [#allocation5 + $0x1], 1 }
0x2e41   :  { %6529 = vsyncpa [#allocation8], 1 }
0x2e42   :  { %6530 = vsyncpa [#allocation11], 1 }
0x2e43   :  { %6531 = vsyncpa [#allocation14], 1 }
0x2e44   :  { %6532 = vsyncpa [#allocation17], 1 }
0x2e45   :  { %6533 = vsyncpa [#allocation20], 1 }
0x2e46   :  { %6534 = vsyncpa [#allocation23], 1 }
0x2e47   :  { %6535 = vsyncpa [#allocation26], 1 }
0x2e48   :  { %6536 = vsyncpa [#allocation29], 1 }
0x2e49   :  { %6537 = vsyncpa [#allocation32], 1 }
0x2e4a   :  { %6538 = vsyncpa [#allocation35], 1 }
0x2e4b   :  { %6539 = vsyncpa [#allocation38], 1 }
0x2e4c   :  { %6540 = vsyncpa [#allocation41], 1 }
0x2e4d   :  { %6541 = vsyncpa [#allocation44], 1 }
0x2e4e   :  { %6542 = vsyncpa [#allocation6], 1 }
0x2e4f   :  { %6544 = vsyncpa [#allocation6 + $0x1], 1 }

</bundles_post_ra>
